<compile_context>
chip_gen: v7x
topology: tpu7x:2x2x1
jax: 0.10.0
libtpu: 0.0.40
codegen_flags: <defaults>
</compile_context>

<pallas_src>
import numpy as np
import jax
import jax.numpy as jnp
from jax.experimental import pallas as pl
from jax.experimental.pallas import tpu as pltpu

BTILE = 128  # images per grid step == lane width


def _ds2(start, size):
    """Stride-2 sublane slice (plain slice when size == 1)."""
    return pl.ds(start, size, stride=2) if size > 1 else pl.ds(start, 1)


# ---------------------------------------------------------------------------
# Layer 1: row-pair conv + ReLU + pool (batch in lanes, W in sublanes)
# ---------------------------------------------------------------------------
def _conv_relu_pool_rows(x_ref, w_ref, b_ref, p_ref, scr_ref, cc):
    """VALID 3x3 conv + bias + ReLU + MaxPool2d(2,2), pooled-row at a time.

    x_ref : VMEM (Cin, Hin, Win, B)   w_ref/b_ref : SMEM flat (kh,kw,ci,co) / (co,)
    p_ref : VMEM (Cout, Ho, Wo, B)    scr_ref     : VMEM (>=2*Wo, B) row scratch
    """
    cin = x_ref.shape[0]
    cout, ho, wo, _ = p_ref.shape
    wc = 2 * wo
    assert cout % cc == 0
    n_chunks = cout // cc

    @pl.loop(0, ho)
    def _row(i):
        @pl.loop(0, n_chunks)
        def _chunk(ch):
            co0 = ch * cc
            # accumulators initialized to the broadcast bias (bias add folded away)
            acc = [jnp.full((2, wc, scr_ref.shape[-1]), b_ref[co0 + c], jnp.float32)
                   for c in range(cc)]
            for ci in range(cin):
                for kh in range(3):
                    for kw in range(3):
                        # one window load, reused across the whole co chunk
                        xw = x_ref[ci, pl.ds(2 * i + kh, 2), pl.ds(kw, wc), :]
                        wbase = ((kh * 3 + kw) * cin + ci) * cout + co0
                        for c in range(cc):
                            acc[c] = acc[c] + xw * w_ref[wbase + c]
            for c in range(cc):
                y = jnp.maximum(acc[c], 0.0)                 # ReLU
                hp = jnp.maximum(y[0], y[1])                 # H-pool -> (wc, B)
                scr_ref[pl.ds(0, wc), :] = hp                # W-pool via strided reads
                ev = scr_ref[_ds2(0, wo), :]
                od = scr_ref[_ds2(1, wo), :]
                p_ref[co0 + c, i, :, :] = jnp.maximum(ev, od)


def _repack_rows(p_ref, pf_ref):
    """(Cout, Ho, Wo, B) -> (Cout, Ho*Wo, B): pack spatial rows into dense sublanes."""
    cout, ho, wo, _ = p_ref.shape

    @pl.loop(0, cout)
    def _co(co):
        for r in range(ho):
            pf_ref[co, pl.ds(r * wo, wo), :] = p_ref[co, r, :, :]


# ---------------------------------------------------------------------------
# Layers 2-3: conv + ReLU + pool on flattened (C, H*W, B) activations.
# Keeping the accumulator at the *input* row stride makes the 3x3 conv nine
# contiguous shifted accumulations (static sublane offsets, zero relayout).
# ---------------------------------------------------------------------------
def _conv_relu_pool_flat(x_ref, w_ref, b_ref, o_ref, scr_ref, *,
                         hin, win, ho, wo, cc, rows_per_group):
    cin = x_ref.shape[0]
    cout = o_ref.shape[0]
    b = x_ref.shape[-1]
    assert cout % cc == 0
    n_chunks = cout // cc
    shifts = [kh * win + kw for kh in range(3) for kw in range(3)]

    pi0 = 0
    while pi0 < ho:                       # static groups of pooled rows
        npr = min(rows_per_group, ho - pi0)
        base = 2 * pi0 * win                            # flat offset of first conv row
        acc_len = (2 * npr - 1) * win + 2 * wo          # last needed flat index + 1
        assert base + shifts[-1] + acc_len <= hin * win  # loads stay in bounds

        @pl.loop(0, n_chunks)
        def _chunk(ch):
            co0 = ch * cc
            acc0 = tuple(jnp.full((acc_len, b), b_ref[co0 + c], jnp.float32)
                         for c in range(cc))

            def ci_body(ci, acc):
                new = list(acc)
                for k, s in enumerate(shifts):
                    # contiguous, statically-offset window; reused across the co chunk
                    xw = x_ref[ci, pl.ds(base + s, acc_len), :]
                    wbase = k * cin * cout + ci * cout + co0
                    for c in range(cc):
                        new[c] = new[c] + xw * w_ref[wbase + c]
                return tuple(new)

            acc = jax.lax.fori_loop(0, cin, ci_body, acc0)

            for c in range(cc):
                y = jnp.maximum(acc[c], 0.0)             # ReLU (garbage cols never read)
                scr_ref[pl.ds(0, acc_len), :] = y
                for pr in range(npr):
                    rb = 2 * pr * win
                    p00 = scr_ref[_ds2(rb, wo), :]
                    p01 = scr_ref[_ds2(rb + 1, wo), :]
                    p10 = scr_ref[_ds2(rb + win, wo), :]
                    p11 = scr_ref[_ds2(rb + win + 1, wo), :]
                    pooled = jnp.maximum(jnp.maximum(p00, p01), jnp.maximum(p10, p11))
                    o_ref[co0 + c, pl.ds((pi0 + pr) * wo, wo), :] = pooled

        pi0 += npr


def _fc_mxu(p3_ref, wfc_ref, out_ref):
    """Linear(27 -> 10) for the whole tile on the MXU; bias folded via a ones-row."""
    nfeat = p3_ref.shape[0]
    b = p3_ref.shape[-1]
    pieces = [p3_ref[c, :, :] for c in range(nfeat)]        # each (1, B)
    pieces.append(jnp.ones((1, b), jnp.float32))            # bias column
    feats = jnp.concatenate(pieces, axis=0)                 # (28, B)
    out_ref[...] = jnp.dot(wfc_ref[...], feats,
                           preferred_element_type=jnp.float32)   # (10, B), lane-dense


def net1_kernel(x_ref, w1_ref, b1_ref, w2_ref, b2_ref, w3_ref, b3_ref, wfc_ref,
                out_ref, p1_ref, p1f_ref, p2f_ref, p3f_ref, scr_ref):
    # (1,28,28,B) -> pooled (10,13,13,B)
    _conv_relu_pool_rows(x_ref, w1_ref, b1_ref, p1_ref, scr_ref, cc=2)
    # pack layer-1 output spatially dense: (10, 169, B)
    _repack_rows(p1_ref, p1f_ref)
    # (10,169,B) -> (18, 25, B)   [13x13 -> pooled 5x5]
    _conv_relu_pool_flat(p1f_ref, w2_ref, b2_ref, p2f_ref, scr_ref,
                         hin=13, win=13, ho=5, wo=5, cc=2, rows_per_group=3)
    # (18,25,B) -> (27, 1, B)     [5x5 -> pooled 1x1]
    _conv_relu_pool_flat(p2f_ref, w3_ref, b3_ref, p3f_ref, scr_ref,
                         hin=5, win=5, ho=1, wo=1, cc=3, rows_per_group=1)
    # Linear(27,10) on the MXU
    _fc_mxu(p3f_ref, wfc_ref, out_ref)


# ---------------------------------------------------------------------------
# Wrapper: NCHW -> (C,H,W,Btile) batch-in-lanes layout, grid over batch tiles
# ---------------------------------------------------------------------------
def net1_forward(x_nchw, params, btile=BTILE):
    w1, b1, w2, b2, w3, b3, wfc, bfc = params
    B, Cin, H, W = x_nchw.shape
    assert (Cin, H, W) == (1, 28, 28), "Net1 requires 1x28x28 inputs"
    assert wfc.shape == (27, 10) and bfc.shape == (10,)
    ncls = 10

    nt = pl.cdiv(B, btile)   # v7x note: with B > btile this parallel axis has >=2 steps
    Bp = nt * btile
    x = x_nchw.astype(jnp.float32)
    if Bp != B:
        x = jnp.concatenate([x, jnp.zeros((Bp - B, Cin, H, W), jnp.float32)], axis=0)
    # (Bp,1,28,28) -> (nt, 1, 28, 28, btile): batch fills the lane dim
    x = x.reshape(nt, btile, Cin, H, W).transpose(0, 2, 3, 4, 1)

    # conv params flattened for SMEM scalar access, (kh, kw, ci, co) row-major
    w1f, w2f, w3f = w1.reshape(-1), w2.reshape(-1), w3.reshape(-1)
    b1f, b2f, b3f = b1.reshape(-1), b2.reshape(-1), b3.reshape(-1)
    # FC weight for the MXU: (10, 27) with the bias appended as a 28th column
    wfc_aug = jnp.concatenate(
        [wfc.T.astype(jnp.float32), bfc.reshape(ncls, 1).astype(jnp.float32)], axis=1)

    macs_per_img = (26 * 26 * 10 * 9 * 1 + 10 * 10 * 18 * 9 * 10 +
                    2 * 2 * 27 * 9 * 18 + 27 * 10)
    weight_bytes = sum(int(a.size) * 4 for a in (w1, b1, w2, b2, w3, b3, wfc, bfc))
    cost = pl.CostEstimate(
        flops=int(Bp) * 2 * macs_per_img,
        transcendentals=0,
        bytes_accessed=int(Bp) * (H * W * 4 + ncls * 4) + weight_bytes,
    )

    smem = pl.BlockSpec(memory_space=pltpu.MemorySpace.SMEM)

    out = pl.pallas_call(
        net1_kernel,
        out_shape=jax.ShapeDtypeStruct((nt, ncls, btile), jnp.float32),
        grid_spec=pltpu.PrefetchScalarGridSpec(
            num_scalar_prefetch=0,
            grid=(nt,),
            in_specs=[
                pl.BlockSpec((None, 1, H, W, btile), lambda g: (g, 0, 0, 0, 0)),
                smem, smem,          # w1, b1
                smem, smem,          # w2, b2
                smem, smem,          # w3, b3
                pl.BlockSpec((ncls, 28), lambda g: (0, 0)),   # wfc (+bias col) in VMEM
            ],
            out_specs=pl.BlockSpec((None, ncls, btile), lambda g: (g, 0, 0)),
            scratch_shapes=[
                pltpu.VMEM((10, 13, 13, btile), jnp.float32),   # pooled layer-1 acts
                pltpu.VMEM((10, 169, btile), jnp.float32),      # layer-1 acts, flat
                pltpu.VMEM((18, 25, btile), jnp.float32),       # layer-2 acts, flat
                pltpu.VMEM((27, 1, btile), jnp.float32),        # layer-3 acts, flat
                pltpu.VMEM((80, btile), jnp.float32),           # conv/pool row scratch
            ],
        ),
        compiler_params=pltpu.CompilerParams(
            dimension_semantics=("parallel",),        # batch tiles are independent
            vmem_limit_bytes=32 * 1024 * 1024,        # ~3 MB used; plenty of headroom
        ),
        cost_estimate=cost,
    )(x, w1f, b1f, w2f, b2f, w3f, b3f, wfc_aug)

    # (nt, 10, btile) -> (Bp, 10) -> (B, 10)
    return out.transpose(0, 2, 1).reshape(Bp, ncls)[:B]


# ---------------------------------------------------------------------------
# Pure-JAX reference (correctness check only)
# ---------------------------------------------------------------------------
def net1_reference(x_nchw, params):
    w1, b1, w2, b2, w3, b3, wfc, bfc = params
    x = jnp.transpose(x_nchw, (0, 2, 3, 1)).astype(jnp.float32)

    def conv(x, w, b):
        y = jax.lax.conv_general_dilated(
            x, w, window_strides=(1, 1), padding="VALID",
            dimension_numbers=("NHWC", "HWIO", "NHWC"))
        return jnp.maximum(y + b.reshape(1, 1, 1, -1), 0.0)

    def pool(x):
        return jax.lax.reduce_window(x, -jnp.inf, jax.lax.max,
                                     (1, 2, 2, 1), (1, 2, 2, 1), "VALID")

    x = pool(conv(x, w1, b1))
    x = pool(conv(x, w2, b2))
    x = pool(conv(x, w3, b3))
    x = x.reshape(x.shape[0], -1)          # (B, 27), same order as torch .view
    return x @ wfc + bfc


# ---------------------------------------------------------------------------
# Deterministic parameter init (shapes from Net1.__init__, synthetic values)
# ---------------------------------------------------------------------------
def init_params(key):
    ks = jax.random.split(key, 8)

    def uinit(k, shape, fan_in):
        bound = 1.0 / np.sqrt(fan_in)
        return jax.random.uniform(k, shape, jnp.float32, -bound, bound)

    w1 = uinit(ks[0], (3, 3, 1, 10), 3 * 3 * 1)      # HWIO
    b1 = uinit(ks[1], (10,), 3 * 3 * 1)
    w2 = uinit(ks[2], (3, 3, 10, 18), 3 * 3 * 10)
    b2 = uinit(ks[3], (18,), 3 * 3 * 10)
    w3 = uinit(ks[4], (3, 3, 18, 27), 3 * 3 * 18)
    b3 = uinit(ks[5], (27,), 3 * 3 * 18)
    wfc = uinit(ks[6], (27, 10), 27)                 # == torch Linear weight.T
    bfc = uinit(ks[7], (10,), 27)
    return (w1, b1, w2, b2, w3, b3, wfc, bfc)


if __name__ == "__main__":
    key = jax.random.PRNGKey(0)
    k_param, k_x = jax.random.split(key)
    params = init_params(k_param)

    # batch=2, 1 channel, 28x28 (the only spatial size consistent with Linear(27, 10))
    x = jax.random.normal(k_x, (2, 1, 28, 28), jnp.float32)

    out = jax.block_until_ready(net1_forward(x, params))
    ref = jax.block_until_ready(net1_reference(x, params))

    # tolerance relaxed vs f32 exact: the FC now runs on the MXU (and the reference
    # conv/matmul use XLA's default TPU matmul passes); any real indexing/weight bug
    # would produce errors orders of magnitude above this.
    np.testing.assert_allclose(np.asarray(out), np.asarray(ref), rtol=2e-3, atol=2e-3)
    assert out.shape == (2, 10) and out.dtype == jnp.float32

    print("KERNEL_OK")
</pallas_src>

<mosaic_0001>
module attributes {stable_mosaic.version = 11 : i64} {
  func.func @net1_kernel(%arg0: i32, %arg1: memref<1x1x28x28x128xf32, #tpu.memory_space<vmem>>, %arg2: memref<90xf32, #tpu.memory_space<smem>>, %arg3: memref<10xf32, #tpu.memory_space<smem>>, %arg4: memref<1620xf32, #tpu.memory_space<smem>>, %arg5: memref<18xf32, #tpu.memory_space<smem>>, %arg6: memref<4374xf32, #tpu.memory_space<smem>>, %arg7: memref<27xf32, #tpu.memory_space<smem>>, %arg8: memref<10x28xf32, #tpu.memory_space<vmem>>, %arg9: memref<1x10x128xf32, #tpu.memory_space<vmem>>, %arg10: memref<10x13x13x128xf32, #tpu.memory_space<vmem>>, %arg11: memref<10x169x128xf32, #tpu.memory_space<vmem>>, %arg12: memref<18x25x128xf32, #tpu.memory_space<vmem>>, %arg13: memref<27x1x128xf32, #tpu.memory_space<vmem>>, %arg14: memref<80x128xf32, #tpu.memory_space<vmem>>) attributes {dimension_semantics = [#tpu.dimension_semantics<parallel>], iteration_bounds = array<i64: 1>, scalar_prefetch = 0 : i64, scratch_operands = 5 : i64, tpu.core_type = #tpu.core_type<tc>, window_params = [{transform_indices = @transform_0, window_bounds = array<i64: 1, 1, 28, 28, 128>}, {transform_indices = @transform_1, window_bounds = array<i64: 90>}, {transform_indices = @transform_2, window_bounds = array<i64: 10>}, {transform_indices = @transform_3, window_bounds = array<i64: 1620>}, {transform_indices = @transform_4, window_bounds = array<i64: 18>}, {transform_indices = @transform_5, window_bounds = array<i64: 4374>}, {transform_indices = @transform_6, window_bounds = array<i64: 27>}, {pipeline_mode = #tpu.pipeline_mode<synchronous>, transform_indices = @transform_7, window_bounds = array<i64: 10, 28>}, {transform_indices = @transform_8, window_bounds = array<i64: 1, 10, 128>}]} {
    %c0_i32 = arith.constant 0 : i32
    %c13_i32 = arith.constant 13 : i32
    %0 = arith.addi %c0_i32, %c13_i32 : i32
    %c1_i32 = arith.constant 1 : i32
    scf.for %arg15 = %c0_i32 to %0 step %c1_i32  : i32 {
      %c1_i32_75 = arith.constant 1 : i32
      %68 = arith.muli %arg15, %c1_i32_75 : i32
      %c0_i32_76 = arith.constant 0 : i32
      %69 = arith.addi %c0_i32_76, %68 : i32
      %c0_i32_77 = arith.constant 0 : i32
      %c5_i32 = arith.constant 5 : i32
      %70 = arith.addi %c0_i32_77, %c5_i32 : i32
      %c1_i32_78 = arith.constant 1 : i32
      scf.for %arg16 = %c0_i32_77 to %70 step %c1_i32_78  : i32 {
        %c1_i32_80 = arith.constant 1 : i32
        %71 = arith.muli %arg16, %c1_i32_80 : i32
        %c0_i32_81 = arith.constant 0 : i32
        %72 = arith.addi %c0_i32_81, %71 : i32
        %c2_i32 = arith.constant 2 : i32
        %73 = arith.muli %72, %c2_i32 : i32
        %c0_i32_82 = arith.constant 0 : i32
        %74 = arith.addi %73, %c0_i32_82 : i32
        %75 = arith.index_cast %74 : i32 to index
        %76 = memref.load %arg3[%75] : memref<10xf32, #tpu.memory_space<smem>>
        %77 = vector.broadcast %76 : f32 to vector<2x26x128xf32>
        %c1_i32_83 = arith.constant 1 : i32
        %78 = arith.addi %73, %c1_i32_83 : i32
        %79 = arith.index_cast %78 : i32 to index
        %80 = memref.load %arg3[%79] : memref<10xf32, #tpu.memory_space<smem>>
        %81 = vector.broadcast %80 : f32 to vector<2x26x128xf32>
        %c2_i32_84 = arith.constant 2 : i32
        %82 = arith.muli %c2_i32_84, %69 : i32
        %c0_i32_85 = arith.constant 0 : i32
        %83 = arith.addi %82, %c0_i32_85 : i32
        %c0_86 = arith.constant 0 : index
        %c0_87 = arith.constant 0 : index
        %84 = arith.index_cast %83 : i32 to index
        %c0_88 = arith.constant 0 : index
        %c0_89 = arith.constant 0 : index
        %85 = vector.load %arg1[%c0_86, %c0_87, %84, %c0_88, %c0_89] : memref<1x1x28x28x128xf32, #tpu.memory_space<vmem>>, vector<1x1x2x26x128xf32>
        %86 = vector.shape_cast %85 : vector<1x1x2x26x128xf32> to vector<2x26x128xf32>
        %c0_i32_90 = arith.constant 0 : i32
        %87 = arith.addi %c0_i32_90, %73 : i32
        %c0_i32_91 = arith.constant 0 : i32
        %88 = arith.addi %87, %c0_i32_91 : i32
        %89 = arith.index_cast %88 : i32 to index
        %90 = memref.load %arg2[%89] : memref<90xf32, #tpu.memory_space<smem>>
        %91 = vector.broadcast %90 : f32 to vector<2x26x128xf32>
        %92 = arith.mulf %86, %91 : vector<2x26x128xf32>
        %93 = arith.addf %77, %92 : vector<2x26x128xf32>
        %c1_i32_92 = arith.constant 1 : i32
        %94 = arith.addi %87, %c1_i32_92 : i32
        %95 = arith.index_cast %94 : i32 to index
        %96 = memref.load %arg2[%95] : memref<90xf32, #tpu.memory_space<smem>>
        %97 = vector.broadcast %96 : f32 to vector<2x26x128xf32>
        %98 = arith.mulf %86, %97 : vector<2x26x128xf32>
        %99 = arith.addf %81, %98 : vector<2x26x128xf32>
        %c2_i32_93 = arith.constant 2 : i32
        %100 = arith.muli %c2_i32_93, %69 : i32
        %c0_i32_94 = arith.constant 0 : i32
        %101 = arith.addi %100, %c0_i32_94 : i32
        %c0_95 = arith.constant 0 : index
        %c0_96 = arith.constant 0 : index
        %102 = arith.index_cast %101 : i32 to index
        %c1_97 = arith.constant 1 : index
        %c0_98 = arith.constant 0 : index
        %103 = vector.load %arg1[%c0_95, %c0_96, %102, %c1_97, %c0_98] : memref<1x1x28x28x128xf32, #tpu.memory_space<vmem>>, vector<1x1x2x26x128xf32>
        %104 = vector.shape_cast %103 : vector<1x1x2x26x128xf32> to vector<2x26x128xf32>
        %c10_i32_99 = arith.constant 10 : i32
        %105 = arith.addi %c10_i32_99, %73 : i32
        %c0_i32_100 = arith.constant 0 : i32
        %106 = arith.addi %105, %c0_i32_100 : i32
        %107 = arith.index_cast %106 : i32 to index
        %108 = memref.load %arg2[%107] : memref<90xf32, #tpu.memory_space<smem>>
        %109 = vector.broadcast %108 : f32 to vector<2x26x128xf32>
        %110 = arith.mulf %104, %109 : vector<2x26x128xf32>
        %111 = arith.addf %93, %110 : vector<2x26x128xf32>
        %c1_i32_101 = arith.constant 1 : i32
        %112 = arith.addi %105, %c1_i32_101 : i32
        %113 = arith.index_cast %112 : i32 to index
        %114 = memref.load %arg2[%113] : memref<90xf32, #tpu.memory_space<smem>>
        %115 = vector.broadcast %114 : f32 to vector<2x26x128xf32>
        %116 = arith.mulf %104, %115 : vector<2x26x128xf32>
        %117 = arith.addf %99, %116 : vector<2x26x128xf32>
        %c2_i32_102 = arith.constant 2 : i32
        %118 = arith.muli %c2_i32_102, %69 : i32
        %c0_i32_103 = arith.constant 0 : i32
        %119 = arith.addi %118, %c0_i32_103 : i32
        %c0_104 = arith.constant 0 : index
        %c0_105 = arith.constant 0 : index
        %120 = arith.index_cast %119 : i32 to index
        %c2_106 = arith.constant 2 : index
        %c0_107 = arith.constant 0 : index
        %121 = vector.load %arg1[%c0_104, %c0_105, %120, %c2_106, %c0_107] : memref<1x1x28x28x128xf32, #tpu.memory_space<vmem>>, vector<1x1x2x26x128xf32>
        %122 = vector.shape_cast %121 : vector<1x1x2x26x128xf32> to vector<2x26x128xf32>
        %c20_i32 = arith.constant 20 : i32
        %123 = arith.addi %c20_i32, %73 : i32
        %c0_i32_108 = arith.constant 0 : i32
        %124 = arith.addi %123, %c0_i32_108 : i32
        %125 = arith.index_cast %124 : i32 to index
        %126 = memref.load %arg2[%125] : memref<90xf32, #tpu.memory_space<smem>>
        %127 = vector.broadcast %126 : f32 to vector<2x26x128xf32>
        %128 = arith.mulf %122, %127 : vector<2x26x128xf32>
        %129 = arith.addf %111, %128 : vector<2x26x128xf32>
        %c1_i32_109 = arith.constant 1 : i32
        %130 = arith.addi %123, %c1_i32_109 : i32
        %131 = arith.index_cast %130 : i32 to index
        %132 = memref.load %arg2[%131] : memref<90xf32, #tpu.memory_space<smem>>
        %133 = vector.broadcast %132 : f32 to vector<2x26x128xf32>
        %134 = arith.mulf %122, %133 : vector<2x26x128xf32>
        %135 = arith.addf %117, %134 : vector<2x26x128xf32>
        %c2_i32_110 = arith.constant 2 : i32
        %136 = arith.muli %c2_i32_110, %69 : i32
        %c1_i32_111 = arith.constant 1 : i32
        %137 = arith.addi %136, %c1_i32_111 : i32
        %c0_112 = arith.constant 0 : index
        %c0_113 = arith.constant 0 : index
        %138 = arith.index_cast %137 : i32 to index
        %c0_114 = arith.constant 0 : index
        %c0_115 = arith.constant 0 : index
        %139 = vector.load %arg1[%c0_112, %c0_113, %138, %c0_114, %c0_115] : memref<1x1x28x28x128xf32, #tpu.memory_space<vmem>>, vector<1x1x2x26x128xf32>
        %140 = vector.shape_cast %139 : vector<1x1x2x26x128xf32> to vector<2x26x128xf32>
        %c30_i32 = arith.constant 30 : i32
        %141 = arith.addi %c30_i32, %73 : i32
        %c0_i32_116 = arith.constant 0 : i32
        %142 = arith.addi %141, %c0_i32_116 : i32
        %143 = arith.index_cast %142 : i32 to index
        %144 = memref.load %arg2[%143] : memref<90xf32, #tpu.memory_space<smem>>
        %145 = vector.broadcast %144 : f32 to vector<2x26x128xf32>
        %146 = arith.mulf %140, %145 : vector<2x26x128xf32>
        %147 = arith.addf %129, %146 : vector<2x26x128xf32>
        %c1_i32_117 = arith.constant 1 : i32
        %148 = arith.addi %141, %c1_i32_117 : i32
        %149 = arith.index_cast %148 : i32 to index
        %150 = memref.load %arg2[%149] : memref<90xf32, #tpu.memory_space<smem>>
        %151 = vector.broadcast %150 : f32 to vector<2x26x128xf32>
        %152 = arith.mulf %140, %151 : vector<2x26x128xf32>
        %153 = arith.addf %135, %152 : vector<2x26x128xf32>
        %c2_i32_118 = arith.constant 2 : i32
        %154 = arith.muli %c2_i32_118, %69 : i32
        %c1_i32_119 = arith.constant 1 : i32
        %155 = arith.addi %154, %c1_i32_119 : i32
        %c0_120 = arith.constant 0 : index
        %c0_121 = arith.constant 0 : index
        %156 = arith.index_cast %155 : i32 to index
        %c1_122 = arith.constant 1 : index
        %c0_123 = arith.constant 0 : index
        %157 = vector.load %arg1[%c0_120, %c0_121, %156, %c1_122, %c0_123] : memref<1x1x28x28x128xf32, #tpu.memory_space<vmem>>, vector<1x1x2x26x128xf32>
        %158 = vector.shape_cast %157 : vector<1x1x2x26x128xf32> to vector<2x26x128xf32>
        %c40_i32 = arith.constant 40 : i32
        %159 = arith.addi %c40_i32, %73 : i32
        %c0_i32_124 = arith.constant 0 : i32
        %160 = arith.addi %159, %c0_i32_124 : i32
        %161 = arith.index_cast %160 : i32 to index
        %162 = memref.load %arg2[%161] : memref<90xf32, #tpu.memory_space<smem>>
        %163 = vector.broadcast %162 : f32 to vector<2x26x128xf32>
        %164 = arith.mulf %158, %163 : vector<2x26x128xf32>
        %165 = arith.addf %147, %164 : vector<2x26x128xf32>
        %c1_i32_125 = arith.constant 1 : i32
        %166 = arith.addi %159, %c1_i32_125 : i32
        %167 = arith.index_cast %166 : i32 to index
        %168 = memref.load %arg2[%167] : memref<90xf32, #tpu.memory_space<smem>>
        %169 = vector.broadcast %168 : f32 to vector<2x26x128xf32>
        %170 = arith.mulf %158, %169 : vector<2x26x128xf32>
        %171 = arith.addf %153, %170 : vector<2x26x128xf32>
        %c2_i32_126 = arith.constant 2 : i32
        %172 = arith.muli %c2_i32_126, %69 : i32
        %c1_i32_127 = arith.constant 1 : i32
        %173 = arith.addi %172, %c1_i32_127 : i32
        %c0_128 = arith.constant 0 : index
        %c0_129 = arith.constant 0 : index
        %174 = arith.index_cast %173 : i32 to index
        %c2_130 = arith.constant 2 : index
        %c0_131 = arith.constant 0 : index
        %175 = vector.load %arg1[%c0_128, %c0_129, %174, %c2_130, %c0_131] : memref<1x1x28x28x128xf32, #tpu.memory_space<vmem>>, vector<1x1x2x26x128xf32>
        %176 = vector.shape_cast %175 : vector<1x1x2x26x128xf32> to vector<2x26x128xf32>
        %c50_i32 = arith.constant 50 : i32
        %177 = arith.addi %c50_i32, %73 : i32
        %c0_i32_132 = arith.constant 0 : i32
        %178 = arith.addi %177, %c0_i32_132 : i32
        %179 = arith.index_cast %178 : i32 to index
        %180 = memref.load %arg2[%179] : memref<90xf32, #tpu.memory_space<smem>>
        %181 = vector.broadcast %180 : f32 to vector<2x26x128xf32>
        %182 = arith.mulf %176, %181 : vector<2x26x128xf32>
        %183 = arith.addf %165, %182 : vector<2x26x128xf32>
        %c1_i32_133 = arith.constant 1 : i32
        %184 = arith.addi %177, %c1_i32_133 : i32
        %185 = arith.index_cast %184 : i32 to index
        %186 = memref.load %arg2[%185] : memref<90xf32, #tpu.memory_space<smem>>
        %187 = vector.broadcast %186 : f32 to vector<2x26x128xf32>
        %188 = arith.mulf %176, %187 : vector<2x26x128xf32>
        %189 = arith.addf %171, %188 : vector<2x26x128xf32>
        %c2_i32_134 = arith.constant 2 : i32
        %190 = arith.muli %c2_i32_134, %69 : i32
        %c2_i32_135 = arith.constant 2 : i32
        %191 = arith.addi %190, %c2_i32_135 : i32
        %c0_136 = arith.constant 0 : index
        %c0_137 = arith.constant 0 : index
        %192 = arith.index_cast %191 : i32 to index
        %c0_138 = arith.constant 0 : index
        %c0_139 = arith.constant 0 : index
        %193 = vector.load %arg1[%c0_136, %c0_137, %192, %c0_138, %c0_139] : memref<1x1x28x28x128xf32, #tpu.memory_space<vmem>>, vector<1x1x2x26x128xf32>
        %194 = vector.shape_cast %193 : vector<1x1x2x26x128xf32> to vector<2x26x128xf32>
        %c60_i32 = arith.constant 60 : i32
        %195 = arith.addi %c60_i32, %73 : i32
        %c0_i32_140 = arith.constant 0 : i32
        %196 = arith.addi %195, %c0_i32_140 : i32
        %197 = arith.index_cast %196 : i32 to index
        %198 = memref.load %arg2[%197] : memref<90xf32, #tpu.memory_space<smem>>
        %199 = vector.broadcast %198 : f32 to vector<2x26x128xf32>
        %200 = arith.mulf %194, %199 : vector<2x26x128xf32>
        %201 = arith.addf %183, %200 : vector<2x26x128xf32>
        %c1_i32_141 = arith.constant 1 : i32
        %202 = arith.addi %195, %c1_i32_141 : i32
        %203 = arith.index_cast %202 : i32 to index
        %204 = memref.load %arg2[%203] : memref<90xf32, #tpu.memory_space<smem>>
        %205 = vector.broadcast %204 : f32 to vector<2x26x128xf32>
        %206 = arith.mulf %194, %205 : vector<2x26x128xf32>
        %207 = arith.addf %189, %206 : vector<2x26x128xf32>
        %c2_i32_142 = arith.constant 2 : i32
        %208 = arith.muli %c2_i32_142, %69 : i32
        %c2_i32_143 = arith.constant 2 : i32
        %209 = arith.addi %208, %c2_i32_143 : i32
        %c0_144 = arith.constant 0 : index
        %c0_145 = arith.constant 0 : index
        %210 = arith.index_cast %209 : i32 to index
        %c1_146 = arith.constant 1 : index
        %c0_147 = arith.constant 0 : index
        %211 = vector.load %arg1[%c0_144, %c0_145, %210, %c1_146, %c0_147] : memref<1x1x28x28x128xf32, #tpu.memory_space<vmem>>, vector<1x1x2x26x128xf32>
        %212 = vector.shape_cast %211 : vector<1x1x2x26x128xf32> to vector<2x26x128xf32>
        %c70_i32 = arith.constant 70 : i32
        %213 = arith.addi %c70_i32, %73 : i32
        %c0_i32_148 = arith.constant 0 : i32
        %214 = arith.addi %213, %c0_i32_148 : i32
        %215 = arith.index_cast %214 : i32 to index
        %216 = memref.load %arg2[%215] : memref<90xf32, #tpu.memory_space<smem>>
        %217 = vector.broadcast %216 : f32 to vector<2x26x128xf32>
        %218 = arith.mulf %212, %217 : vector<2x26x128xf32>
        %219 = arith.addf %201, %218 : vector<2x26x128xf32>
        %c1_i32_149 = arith.constant 1 : i32
        %220 = arith.addi %213, %c1_i32_149 : i32
        %221 = arith.index_cast %220 : i32 to index
        %222 = memref.load %arg2[%221] : memref<90xf32, #tpu.memory_space<smem>>
        %223 = vector.broadcast %222 : f32 to vector<2x26x128xf32>
        %224 = arith.mulf %212, %223 : vector<2x26x128xf32>
        %225 = arith.addf %207, %224 : vector<2x26x128xf32>
        %c2_i32_150 = arith.constant 2 : i32
        %226 = arith.muli %c2_i32_150, %69 : i32
        %c2_i32_151 = arith.constant 2 : i32
        %227 = arith.addi %226, %c2_i32_151 : i32
        %c0_152 = arith.constant 0 : index
        %c0_153 = arith.constant 0 : index
        %228 = arith.index_cast %227 : i32 to index
        %c2_154 = arith.constant 2 : index
        %c0_155 = arith.constant 0 : index
        %229 = vector.load %arg1[%c0_152, %c0_153, %228, %c2_154, %c0_155] : memref<1x1x28x28x128xf32, #tpu.memory_space<vmem>>, vector<1x1x2x26x128xf32>
        %230 = vector.shape_cast %229 : vector<1x1x2x26x128xf32> to vector<2x26x128xf32>
        %c80_i32 = arith.constant 80 : i32
        %231 = arith.addi %c80_i32, %73 : i32
        %c0_i32_156 = arith.constant 0 : i32
        %232 = arith.addi %231, %c0_i32_156 : i32
        %233 = arith.index_cast %232 : i32 to index
        %234 = memref.load %arg2[%233] : memref<90xf32, #tpu.memory_space<smem>>
        %235 = vector.broadcast %234 : f32 to vector<2x26x128xf32>
        %236 = arith.mulf %230, %235 : vector<2x26x128xf32>
        %237 = arith.addf %219, %236 : vector<2x26x128xf32>
        %c1_i32_157 = arith.constant 1 : i32
        %238 = arith.addi %231, %c1_i32_157 : i32
        %239 = arith.index_cast %238 : i32 to index
        %240 = memref.load %arg2[%239] : memref<90xf32, #tpu.memory_space<smem>>
        %241 = vector.broadcast %240 : f32 to vector<2x26x128xf32>
        %242 = arith.mulf %230, %241 : vector<2x26x128xf32>
        %243 = arith.addf %225, %242 : vector<2x26x128xf32>
        %cst_158 = arith.constant 0.000000e+00 : f32
        %244 = vector.broadcast %cst_158 : f32 to vector<2x26x128xf32>
        %245 = arith.maximumf %237, %244 : vector<2x26x128xf32>
        %246 = vector.extract_strided_slice %245 {offsets = [0, 0, 0], sizes = [1, 26, 128], strides = [1, 1, 1]} : vector<2x26x128xf32> to vector<1x26x128xf32>
        %247 = vector.shape_cast %246 : vector<1x26x128xf32> to vector<26x128xf32>
        %248 = vector.extract_strided_slice %245 {offsets = [1, 0, 0], sizes = [1, 26, 128], strides = [1, 1, 1]} : vector<2x26x128xf32> to vector<1x26x128xf32>
        %249 = vector.shape_cast %248 : vector<1x26x128xf32> to vector<26x128xf32>
        %250 = arith.maximumf %247, %249 : vector<26x128xf32>
        %c0_159 = arith.constant 0 : index
        %c0_160 = arith.constant 0 : index
        %251 = vector.load %arg14[%c0_159, %c0_160] : memref<80x128xf32, #tpu.memory_space<vmem>>, vector<26x128xf32>
        tpu.vector_store %arg14[%c0_159, %c0_160], %250 {strides = array<i32>} : memref<80x128xf32, #tpu.memory_space<vmem>>, vector<26x128xf32>,
        %c0_161 = arith.constant 0 : index
        %c0_162 = arith.constant 0 : index
        %252 = tpu.strided_load %arg14[%c0_161, %c0_162] {strides = array<i32: 2, 1>} : memref<80x128xf32, #tpu.memory_space<vmem>>, vector<13x128xf32>
        %c1_163 = arith.constant 1 : index
        %c0_164 = arith.constant 0 : index
        %253 = tpu.strided_load %arg14[%c1_163, %c0_164] {strides = array<i32: 2, 1>} : memref<80x128xf32, #tpu.memory_space<vmem>>, vector<13x128xf32>
        %254 = arith.maximumf %252, %253 : vector<13x128xf32>
        %c0_i32_165 = arith.constant 0 : i32
        %255 = arith.addi %73, %c0_i32_165 : i32
        %256 = arith.index_cast %255 : i32 to index
        %257 = arith.index_cast %69 : i32 to index
        %c0_166 = arith.constant 0 : index
        %c0_167 = arith.constant 0 : index
        %258 = vector.load %arg10[%256, %257, %c0_166, %c0_167] : memref<10x13x13x128xf32, #tpu.memory_space<vmem>>, vector<1x1x13x128xf32>
        %259 = vector.shape_cast %258 : vector<1x1x13x128xf32> to vector<13x128xf32>
        %260 = vector.shape_cast %254 : vector<13x128xf32> to vector<1x1x13x128xf32>
        tpu.vector_store %arg10[%256, %257, %c0_166, %c0_167], %260 {strides = array<i32>} : memref<10x13x13x128xf32, #tpu.memory_space<vmem>>, vector<1x1x13x128xf32>,
        %cst_168 = arith.constant 0.000000e+00 : f32
        %261 = vector.broadcast %cst_168 : f32 to vector<2x26x128xf32>
        %262 = arith.maximumf %243, %261 : vector<2x26x128xf32>
        %263 = vector.extract_strided_slice %262 {offsets = [0, 0, 0], sizes = [1, 26, 128], strides = [1, 1, 1]} : vector<2x26x128xf32> to vector<1x26x128xf32>
        %264 = vector.shape_cast %263 : vector<1x26x128xf32> to vector<26x128xf32>
        %265 = vector.extract_strided_slice %262 {offsets = [1, 0, 0], sizes = [1, 26, 128], strides = [1, 1, 1]} : vector<2x26x128xf32> to vector<1x26x128xf32>
        %266 = vector.shape_cast %265 : vector<1x26x128xf32> to vector<26x128xf32>
        %267 = arith.maximumf %264, %266 : vector<26x128xf32>
        %c0_169 = arith.constant 0 : index
        %c0_170 = arith.constant 0 : index
        %268 = vector.load %arg14[%c0_169, %c0_170] : memref<80x128xf32, #tpu.memory_space<vmem>>, vector<26x128xf32>
        tpu.vector_store %arg14[%c0_169, %c0_170], %267 {strides = array<i32>} : memref<80x128xf32, #tpu.memory_space<vmem>>, vector<26x128xf32>,
        %c0_171 = arith.constant 0 : index
        %c0_172 = arith.constant 0 : index
        %269 = tpu.strided_load %arg14[%c0_171, %c0_172] {strides = array<i32: 2, 1>} : memref<80x128xf32, #tpu.memory_space<vmem>>, vector<13x128xf32>
        %c1_173 = arith.constant 1 : index
        %c0_174 = arith.constant 0 : index
        %270 = tpu.strided_load %arg14[%c1_173, %c0_174] {strides = array<i32: 2, 1>} : memref<80x128xf32, #tpu.memory_space<vmem>>, vector<13x128xf32>
        %271 = arith.maximumf %269, %270 : vector<13x128xf32>
        %c1_i32_175 = arith.constant 1 : i32
        %272 = arith.addi %73, %c1_i32_175 : i32
        %273 = arith.index_cast %272 : i32 to index
        %274 = arith.index_cast %69 : i32 to index
        %c0_176 = arith.constant 0 : index
        %c0_177 = arith.constant 0 : index
        %275 = vector.load %arg10[%273, %274, %c0_176, %c0_177] : memref<10x13x13x128xf32, #tpu.memory_space<vmem>>, vector<1x1x13x128xf32>
        %276 = vector.shape_cast %275 : vector<1x1x13x128xf32> to vector<13x128xf32>
        %277 = vector.shape_cast %271 : vector<13x128xf32> to vector<1x1x13x128xf32>
        tpu.vector_store %arg10[%273, %274, %c0_176, %c0_177], %277 {strides = array<i32>} : memref<10x13x13x128xf32, #tpu.memory_space<vmem>>, vector<1x1x13x128xf32>,
      }
      %c5_i32_79 = arith.constant 5 : i32
    }
    %c13_i32_0 = arith.constant 13 : i32
    %c0_i32_1 = arith.constant 0 : i32
    %c10_i32 = arith.constant 10 : i32
    %1 = arith.addi %c0_i32_1, %c10_i32 : i32
    %c1_i32_2 = arith.constant 1 : i32
    scf.for %arg15 = %c0_i32_1 to %1 step %c1_i32_2  : i32 {
      %c1_i32_75 = arith.constant 1 : i32
      %68 = arith.muli %arg15, %c1_i32_75 : i32
      %c0_i32_76 = arith.constant 0 : i32
      %69 = arith.addi %c0_i32_76, %68 : i32
      %70 = arith.index_cast %69 : i32 to index
      %c0_77 = arith.constant 0 : index
      %c0_78 = arith.constant 0 : index
      %c0_79 = arith.constant 0 : index
      %71 = vector.load %arg10[%70, %c0_77, %c0_78, %c0_79] : memref<10x13x13x128xf32, #tpu.memory_space<vmem>>, vector<1x1x13x128xf32>
      %72 = vector.shape_cast %71 : vector<1x1x13x128xf32> to vector<13x128xf32>
      %73 = arith.index_cast %69 : i32 to index
      %c0_80 = arith.constant 0 : index
      %c0_81 = arith.constant 0 : index
      %74 = vector.load %arg11[%73, %c0_80, %c0_81] : memref<10x169x128xf32, #tpu.memory_space<vmem>>, vector<1x13x128xf32>
      %75 = vector.shape_cast %74 : vector<1x13x128xf32> to vector<13x128xf32>
      %76 = vector.shape_cast %72 : vector<13x128xf32> to vector<1x13x128xf32>
      tpu.vector_store %arg11[%73, %c0_80, %c0_81], %76 {strides = array<i32>} : memref<10x169x128xf32, #tpu.memory_space<vmem>>, vector<1x13x128xf32>,
      %77 = arith.index_cast %69 : i32 to index
      %c1_82 = arith.constant 1 : index
      %c0_83 = arith.constant 0 : index
      %c0_84 = arith.constant 0 : index
      %78 = vector.load %arg10[%77, %c1_82, %c0_83, %c0_84] : memref<10x13x13x128xf32, #tpu.memory_space<vmem>>, vector<1x1x13x128xf32>
      %79 = vector.shape_cast %78 : vector<1x1x13x128xf32> to vector<13x128xf32>
      %80 = arith.index_cast %69 : i32 to index
      %c13_85 = arith.constant 13 : index
      %c0_86 = arith.constant 0 : index
      %81 = vector.load %arg11[%80, %c13_85, %c0_86] : memref<10x169x128xf32, #tpu.memory_space<vmem>>, vector<1x13x128xf32>
      %82 = vector.shape_cast %81 : vector<1x13x128xf32> to vector<13x128xf32>
      %83 = vector.shape_cast %79 : vector<13x128xf32> to vector<1x13x128xf32>
      tpu.vector_store %arg11[%80, %c13_85, %c0_86], %83 {strides = array<i32>} : memref<10x169x128xf32, #tpu.memory_space<vmem>>, vector<1x13x128xf32>,
      %84 = arith.index_cast %69 : i32 to index
      %c2_87 = arith.constant 2 : index
      %c0_88 = arith.constant 0 : index
      %c0_89 = arith.constant 0 : index
      %85 = vector.load %arg10[%84, %c2_87, %c0_88, %c0_89] : memref<10x13x13x128xf32, #tpu.memory_space<vmem>>, vector<1x1x13x128xf32>
      %86 = vector.shape_cast %85 : vector<1x1x13x128xf32> to vector<13x128xf32>
      %87 = arith.index_cast %69 : i32 to index
      %c26_90 = arith.constant 26 : index
      %c0_91 = arith.constant 0 : index
      %88 = vector.load %arg11[%87, %c26_90, %c0_91] : memref<10x169x128xf32, #tpu.memory_space<vmem>>, vector<1x13x128xf32>
      %89 = vector.shape_cast %88 : vector<1x13x128xf32> to vector<13x128xf32>
      %90 = vector.shape_cast %86 : vector<13x128xf32> to vector<1x13x128xf32>
      tpu.vector_store %arg11[%87, %c26_90, %c0_91], %90 {strides = array<i32>} : memref<10x169x128xf32, #tpu.memory_space<vmem>>, vector<1x13x128xf32>,
      %91 = arith.index_cast %69 : i32 to index
      %c3_92 = arith.constant 3 : index
      %c0_93 = arith.constant 0 : index
      %c0_94 = arith.constant 0 : index
      %92 = vector.load %arg10[%91, %c3_92, %c0_93, %c0_94] : memref<10x13x13x128xf32, #tpu.memory_space<vmem>>, vector<1x1x13x128xf32>
      %93 = vector.shape_cast %92 : vector<1x1x13x128xf32> to vector<13x128xf32>
      %94 = arith.index_cast %69 : i32 to index
      %c39 = arith.constant 39 : index
      %c0_95 = arith.constant 0 : index
      %95 = vector.load %arg11[%94, %c39, %c0_95] : memref<10x169x128xf32, #tpu.memory_space<vmem>>, vector<1x13x128xf32>
      %96 = vector.shape_cast %95 : vector<1x13x128xf32> to vector<13x128xf32>
      %97 = vector.shape_cast %93 : vector<13x128xf32> to vector<1x13x128xf32>
      tpu.vector_store %arg11[%94, %c39, %c0_95], %97 {strides = array<i32>} : memref<10x169x128xf32, #tpu.memory_space<vmem>>, vector<1x13x128xf32>,
      %98 = arith.index_cast %69 : i32 to index
      %c4_96 = arith.constant 4 : index
      %c0_97 = arith.constant 0 : index
      %c0_98 = arith.constant 0 : index
      %99 = vector.load %arg10[%98, %c4_96, %c0_97, %c0_98] : memref<10x13x13x128xf32, #tpu.memory_space<vmem>>, vector<1x1x13x128xf32>
      %100 = vector.shape_cast %99 : vector<1x1x13x128xf32> to vector<13x128xf32>
      %101 = arith.index_cast %69 : i32 to index
      %c52 = arith.constant 52 : index
      %c0_99 = arith.constant 0 : index
      %102 = vector.load %arg11[%101, %c52, %c0_99] : memref<10x169x128xf32, #tpu.memory_space<vmem>>, vector<1x13x128xf32>
      %103 = vector.shape_cast %102 : vector<1x13x128xf32> to vector<13x128xf32>
      %104 = vector.shape_cast %100 : vector<13x128xf32> to vector<1x13x128xf32>
      tpu.vector_store %arg11[%101, %c52, %c0_99], %104 {strides = array<i32>} : memref<10x169x128xf32, #tpu.memory_space<vmem>>, vector<1x13x128xf32>,
      %105 = arith.index_cast %69 : i32 to index
      %c5_100 = arith.constant 5 : index
      %c0_101 = arith.constant 0 : index
      %c0_102 = arith.constant 0 : index
      %106 = vector.load %arg10[%105, %c5_100, %c0_101, %c0_102] : memref<10x13x13x128xf32, #tpu.memory_space<vmem>>, vector<1x1x13x128xf32>
      %107 = vector.shape_cast %106 : vector<1x1x13x128xf32> to vector<13x128xf32>
      %108 = arith.index_cast %69 : i32 to index
      %c65 = arith.constant 65 : index
      %c0_103 = arith.constant 0 : index
      %109 = vector.load %arg11[%108, %c65, %c0_103] : memref<10x169x128xf32, #tpu.memory_space<vmem>>, vector<1x13x128xf32>
      %110 = vector.shape_cast %109 : vector<1x13x128xf32> to vector<13x128xf32>
      %111 = vector.shape_cast %107 : vector<13x128xf32> to vector<1x13x128xf32>
      tpu.vector_store %arg11[%108, %c65, %c0_103], %111 {strides = array<i32>} : memref<10x169x128xf32, #tpu.memory_space<vmem>>, vector<1x13x128xf32>,
      %112 = arith.index_cast %69 : i32 to index
      %c6_104 = arith.constant 6 : index
      %c0_105 = arith.constant 0 : index
      %c0_106 = arith.constant 0 : index
      %113 = vector.load %arg10[%112, %c6_104, %c0_105, %c0_106] : memref<10x13x13x128xf32, #tpu.memory_space<vmem>>, vector<1x1x13x128xf32>
      %114 = vector.shape_cast %113 : vector<1x1x13x128xf32> to vector<13x128xf32>
      %115 = arith.index_cast %69 : i32 to index
      %c78 = arith.constant 78 : index
      %c0_107 = arith.constant 0 : index
      %116 = vector.load %arg11[%115, %c78, %c0_107] : memref<10x169x128xf32, #tpu.memory_space<vmem>>, vector<1x13x128xf32>
      %117 = vector.shape_cast %116 : vector<1x13x128xf32> to vector<13x128xf32>
      %118 = vector.shape_cast %114 : vector<13x128xf32> to vector<1x13x128xf32>
      tpu.vector_store %arg11[%115, %c78, %c0_107], %118 {strides = array<i32>} : memref<10x169x128xf32, #tpu.memory_space<vmem>>, vector<1x13x128xf32>,
      %119 = arith.index_cast %69 : i32 to index
      %c7_108 = arith.constant 7 : index
      %c0_109 = arith.constant 0 : index
      %c0_110 = arith.constant 0 : index
      %120 = vector.load %arg10[%119, %c7_108, %c0_109, %c0_110] : memref<10x13x13x128xf32, #tpu.memory_space<vmem>>, vector<1x1x13x128xf32>
      %121 = vector.shape_cast %120 : vector<1x1x13x128xf32> to vector<13x128xf32>
      %122 = arith.index_cast %69 : i32 to index
      %c91 = arith.constant 91 : index
      %c0_111 = arith.constant 0 : index
      %123 = vector.load %arg11[%122, %c91, %c0_111] : memref<10x169x128xf32, #tpu.memory_space<vmem>>, vector<1x13x128xf32>
      %124 = vector.shape_cast %123 : vector<1x13x128xf32> to vector<13x128xf32>
      %125 = vector.shape_cast %121 : vector<13x128xf32> to vector<1x13x128xf32>
      tpu.vector_store %arg11[%122, %c91, %c0_111], %125 {strides = array<i32>} : memref<10x169x128xf32, #tpu.memory_space<vmem>>, vector<1x13x128xf32>,
      %126 = arith.index_cast %69 : i32 to index
      %c8_112 = arith.constant 8 : index
      %c0_113 = arith.constant 0 : index
      %c0_114 = arith.constant 0 : index
      %127 = vector.load %arg10[%126, %c8_112, %c0_113, %c0_114] : memref<10x13x13x128xf32, #tpu.memory_space<vmem>>, vector<1x1x13x128xf32>
      %128 = vector.shape_cast %127 : vector<1x1x13x128xf32> to vector<13x128xf32>
      %129 = arith.index_cast %69 : i32 to index
      %c104 = arith.constant 104 : index
      %c0_115 = arith.constant 0 : index
      %130 = vector.load %arg11[%129, %c104, %c0_115] : memref<10x169x128xf32, #tpu.memory_space<vmem>>, vector<1x13x128xf32>
      %131 = vector.shape_cast %130 : vector<1x13x128xf32> to vector<13x128xf32>
      %132 = vector.shape_cast %128 : vector<13x128xf32> to vector<1x13x128xf32>
      tpu.vector_store %arg11[%129, %c104, %c0_115], %132 {strides = array<i32>} : memref<10x169x128xf32, #tpu.memory_space<vmem>>, vector<1x13x128xf32>,
      %133 = arith.index_cast %69 : i32 to index
      %c9_116 = arith.constant 9 : index
      %c0_117 = arith.constant 0 : index
      %c0_118 = arith.constant 0 : index
      %134 = vector.load %arg10[%133, %c9_116, %c0_117, %c0_118] : memref<10x13x13x128xf32, #tpu.memory_space<vmem>>, vector<1x1x13x128xf32>
      %135 = vector.shape_cast %134 : vector<1x1x13x128xf32> to vector<13x128xf32>
      %136 = arith.index_cast %69 : i32 to index
      %c117 = arith.constant 117 : index
      %c0_119 = arith.constant 0 : index
      %137 = vector.load %arg11[%136, %c117, %c0_119] : memref<10x169x128xf32, #tpu.memory_space<vmem>>, vector<1x13x128xf32>
      %138 = vector.shape_cast %137 : vector<1x13x128xf32> to vector<13x128xf32>
      %139 = vector.shape_cast %135 : vector<13x128xf32> to vector<1x13x128xf32>
      tpu.vector_store %arg11[%136, %c117, %c0_119], %139 {strides = array<i32>} : memref<10x169x128xf32, #tpu.memory_space<vmem>>, vector<1x13x128xf32>,
      %140 = arith.index_cast %69 : i32 to index
      %c10_120 = arith.constant 10 : index
      %c0_121 = arith.constant 0 : index
      %c0_122 = arith.constant 0 : index
      %141 = vector.load %arg10[%140, %c10_120, %c0_121, %c0_122] : memref<10x13x13x128xf32, #tpu.memory_space<vmem>>, vector<1x1x13x128xf32>
      %142 = vector.shape_cast %141 : vector<1x1x13x128xf32> to vector<13x128xf32>
      %143 = arith.index_cast %69 : i32 to index
      %c130 = arith.constant 130 : index
      %c0_123 = arith.constant 0 : index
      %144 = vector.load %arg11[%143, %c130, %c0_123] : memref<10x169x128xf32, #tpu.memory_space<vmem>>, vector<1x13x128xf32>
      %145 = vector.shape_cast %144 : vector<1x13x128xf32> to vector<13x128xf32>
      %146 = vector.shape_cast %142 : vector<13x128xf32> to vector<1x13x128xf32>
      tpu.vector_store %arg11[%143, %c130, %c0_123], %146 {strides = array<i32>} : memref<10x169x128xf32, #tpu.memory_space<vmem>>, vector<1x13x128xf32>,
      %147 = arith.index_cast %69 : i32 to index
      %c11_124 = arith.constant 11 : index
      %c0_125 = arith.constant 0 : index
      %c0_126 = arith.constant 0 : index
      %148 = vector.load %arg10[%147, %c11_124, %c0_125, %c0_126] : memref<10x13x13x128xf32, #tpu.memory_space<vmem>>, vector<1x1x13x128xf32>
      %149 = vector.shape_cast %148 : vector<1x1x13x128xf32> to vector<13x128xf32>
      %150 = arith.index_cast %69 : i32 to index
      %c143 = arith.constant 143 : index
      %c0_127 = arith.constant 0 : index
      %151 = vector.load %arg11[%150, %c143, %c0_127] : memref<10x169x128xf32, #tpu.memory_space<vmem>>, vector<1x13x128xf32>
      %152 = vector.shape_cast %151 : vector<1x13x128xf32> to vector<13x128xf32>
      %153 = vector.shape_cast %149 : vector<13x128xf32> to vector<1x13x128xf32>
      tpu.vector_store %arg11[%150, %c143, %c0_127], %153 {strides = array<i32>} : memref<10x169x128xf32, #tpu.memory_space<vmem>>, vector<1x13x128xf32>,
      %154 = arith.index_cast %69 : i32 to index
      %c12_128 = arith.constant 12 : index
      %c0_129 = arith.constant 0 : index
      %c0_130 = arith.constant 0 : index
      %155 = vector.load %arg10[%154, %c12_128, %c0_129, %c0_130] : memref<10x13x13x128xf32, #tpu.memory_space<vmem>>, vector<1x1x13x128xf32>
      %156 = vector.shape_cast %155 : vector<1x1x13x128xf32> to vector<13x128xf32>
      %157 = arith.index_cast %69 : i32 to index
      %c156 = arith.constant 156 : index
      %c0_131 = arith.constant 0 : index
      %158 = vector.load %arg11[%157, %c156, %c0_131] : memref<10x169x128xf32, #tpu.memory_space<vmem>>, vector<1x13x128xf32>
      %159 = vector.shape_cast %158 : vector<1x13x128xf32> to vector<13x128xf32>
      %160 = vector.shape_cast %156 : vector<13x128xf32> to vector<1x13x128xf32>
      tpu.vector_store %arg11[%157, %c156, %c0_131], %160 {strides = array<i32>} : memref<10x169x128xf32, #tpu.memory_space<vmem>>, vector<1x13x128xf32>,
    }
    %c10_i32_3 = arith.constant 10 : i32
    %c0_i32_4 = arith.constant 0 : i32
    %c9_i32 = arith.constant 9 : i32
    %2 = arith.addi %c0_i32_4, %c9_i32 : i32
    %c1_i32_5 = arith.constant 1 : i32
    scf.for %arg15 = %c0_i32_4 to %2 step %c1_i32_5  : i32 {
      %c1_i32_75 = arith.constant 1 : i32
      %68 = arith.muli %arg15, %c1_i32_75 : i32
      %c0_i32_76 = arith.constant 0 : i32
      %69 = arith.addi %c0_i32_76, %68 : i32
      %c2_i32 = arith.constant 2 : i32
      %70 = arith.muli %69, %c2_i32 : i32
      %c0_i32_77 = arith.constant 0 : i32
      %71 = arith.addi %70, %c0_i32_77 : i32
      %72 = arith.index_cast %71 : i32 to index
      %73 = memref.load %arg5[%72] : memref<18xf32, #tpu.memory_space<smem>>
      %74 = vector.broadcast %73 : f32 to vector<75x128xf32>
      %c1_i32_78 = arith.constant 1 : i32
      %75 = arith.addi %70, %c1_i32_78 : i32
      %76 = arith.index_cast %75 : i32 to index
      %77 = memref.load %arg5[%76] : memref<18xf32, #tpu.memory_space<smem>>
      %78 = vector.broadcast %77 : f32 to vector<75x128xf32>
      %c0_i32_79 = arith.constant 0 : i32
      %c10_i32_80 = arith.constant 10 : i32
      %79 = arith.addi %c0_i32_79, %c10_i32_80 : i32
      %c1_i32_81 = arith.constant 1 : i32
      %80:2 = scf.for %arg16 = %c0_i32_79 to %79 step %c1_i32_81 iter_args(%arg17 = %74, %arg18 = %78) -> (vector<75x128xf32>, vector<75x128xf32>)  : i32 {
        %159 = arith.index_cast %arg16 : i32 to index
        %c0_148 = arith.constant 0 : index
        %c0_149 = arith.constant 0 : index
        %160 = vector.load %arg11[%159, %c0_148, %c0_149] : memref<10x169x128xf32, #tpu.memory_space<vmem>>, vector<1x75x128xf32>
        %161 = vector.shape_cast %160 : vector<1x75x128xf32> to vector<75x128xf32>
        %c18_i32 = arith.constant 18 : i32
        %162 = arith.muli %arg16, %c18_i32 : i32
        %c0_i32_150 = arith.constant 0 : i32
        %163 = arith.addi %c0_i32_150, %162 : i32
        %164 = arith.addi %163, %70 : i32
        %c0_i32_151 = arith.constant 0 : i32
        %165 = arith.addi %164, %c0_i32_151 : i32
        %166 = arith.index_cast %165 : i32 to index
        %167 = memref.load %arg4[%166] : memref<1620xf32, #tpu.memory_space<smem>>
        %168 = vector.broadcast %167 : f32 to vector<75x128xf32>
        %169 = arith.mulf %161, %168 : vector<75x128xf32>
        %170 = arith.addf %arg17, %169 : vector<75x128xf32>
        %c1_i32_152 = arith.constant 1 : i32
        %171 = arith.addi %164, %c1_i32_152 : i32
        %172 = arith.index_cast %171 : i32 to index
        %173 = memref.load %arg4[%172] : memref<1620xf32, #tpu.memory_space<smem>>
        %174 = vector.broadcast %173 : f32 to vector<75x128xf32>
        %175 = arith.mulf %161, %174 : vector<75x128xf32>
        %176 = arith.addf %arg18, %175 : vector<75x128xf32>
        %177 = arith.index_cast %arg16 : i32 to index
        %c1_153 = arith.constant 1 : index
        %c0_154 = arith.constant 0 : index
        %178 = vector.load %arg11[%177, %c1_153, %c0_154] : memref<10x169x128xf32, #tpu.memory_space<vmem>>, vector<1x75x128xf32>
        %179 = vector.shape_cast %178 : vector<1x75x128xf32> to vector<75x128xf32>
        %c18_i32_155 = arith.constant 18 : i32
        %180 = arith.muli %arg16, %c18_i32_155 : i32
        %c180_i32 = arith.constant 180 : i32
        %181 = arith.addi %c180_i32, %180 : i32
        %182 = arith.addi %181, %70 : i32
        %c0_i32_156 = arith.constant 0 : i32
        %183 = arith.addi %182, %c0_i32_156 : i32
        %184 = arith.index_cast %183 : i32 to index
        %185 = memref.load %arg4[%184] : memref<1620xf32, #tpu.memory_space<smem>>
        %186 = vector.broadcast %185 : f32 to vector<75x128xf32>
        %187 = arith.mulf %179, %186 : vector<75x128xf32>
        %188 = arith.addf %170, %187 : vector<75x128xf32>
        %c1_i32_157 = arith.constant 1 : i32
        %189 = arith.addi %182, %c1_i32_157 : i32
        %190 = arith.index_cast %189 : i32 to index
        %191 = memref.load %arg4[%190] : memref<1620xf32, #tpu.memory_space<smem>>
        %192 = vector.broadcast %191 : f32 to vector<75x128xf32>
        %193 = arith.mulf %179, %192 : vector<75x128xf32>
        %194 = arith.addf %176, %193 : vector<75x128xf32>
        %195 = arith.index_cast %arg16 : i32 to index
        %c2_158 = arith.constant 2 : index
        %c0_159 = arith.constant 0 : index
        %196 = vector.load %arg11[%195, %c2_158, %c0_159] : memref<10x169x128xf32, #tpu.memory_space<vmem>>, vector<1x75x128xf32>
        %197 = vector.shape_cast %196 : vector<1x75x128xf32> to vector<75x128xf32>
        %c18_i32_160 = arith.constant 18 : i32
        %198 = arith.muli %arg16, %c18_i32_160 : i32
        %c360_i32 = arith.constant 360 : i32
        %199 = arith.addi %c360_i32, %198 : i32
        %200 = arith.addi %199, %70 : i32
        %c0_i32_161 = arith.constant 0 : i32
        %201 = arith.addi %200, %c0_i32_161 : i32
        %202 = arith.index_cast %201 : i32 to index
        %203 = memref.load %arg4[%202] : memref<1620xf32, #tpu.memory_space<smem>>
        %204 = vector.broadcast %203 : f32 to vector<75x128xf32>
        %205 = arith.mulf %197, %204 : vector<75x128xf32>
        %206 = arith.addf %188, %205 : vector<75x128xf32>
        %c1_i32_162 = arith.constant 1 : i32
        %207 = arith.addi %200, %c1_i32_162 : i32
        %208 = arith.index_cast %207 : i32 to index
        %209 = memref.load %arg4[%208] : memref<1620xf32, #tpu.memory_space<smem>>
        %210 = vector.broadcast %209 : f32 to vector<75x128xf32>
        %211 = arith.mulf %197, %210 : vector<75x128xf32>
        %212 = arith.addf %194, %211 : vector<75x128xf32>
        %213 = arith.index_cast %arg16 : i32 to index
        %c13_163 = arith.constant 13 : index
        %c0_164 = arith.constant 0 : index
        %214 = vector.load %arg11[%213, %c13_163, %c0_164] : memref<10x169x128xf32, #tpu.memory_space<vmem>>, vector<1x75x128xf32>
        %215 = vector.shape_cast %214 : vector<1x75x128xf32> to vector<75x128xf32>
        %c18_i32_165 = arith.constant 18 : i32
        %216 = arith.muli %arg16, %c18_i32_165 : i32
        %c540_i32 = arith.constant 540 : i32
        %217 = arith.addi %c540_i32, %216 : i32
        %218 = arith.addi %217, %70 : i32
        %c0_i32_166 = arith.constant 0 : i32
        %219 = arith.addi %218, %c0_i32_166 : i32
        %220 = arith.index_cast %219 : i32 to index
        %221 = memref.load %arg4[%220] : memref<1620xf32, #tpu.memory_space<smem>>
        %222 = vector.broadcast %221 : f32 to vector<75x128xf32>
        %223 = arith.mulf %215, %222 : vector<75x128xf32>
        %224 = arith.addf %206, %223 : vector<75x128xf32>
        %c1_i32_167 = arith.constant 1 : i32
        %225 = arith.addi %218, %c1_i32_167 : i32
        %226 = arith.index_cast %225 : i32 to index
        %227 = memref.load %arg4[%226] : memref<1620xf32, #tpu.memory_space<smem>>
        %228 = vector.broadcast %227 : f32 to vector<75x128xf32>
        %229 = arith.mulf %215, %228 : vector<75x128xf32>
        %230 = arith.addf %212, %229 : vector<75x128xf32>
        %231 = arith.index_cast %arg16 : i32 to index
        %c14_168 = arith.constant 14 : index
        %c0_169 = arith.constant 0 : index
        %232 = vector.load %arg11[%231, %c14_168, %c0_169] : memref<10x169x128xf32, #tpu.memory_space<vmem>>, vector<1x75x128xf32>
        %233 = vector.shape_cast %232 : vector<1x75x128xf32> to vector<75x128xf32>
        %c18_i32_170 = arith.constant 18 : i32
        %234 = arith.muli %arg16, %c18_i32_170 : i32
        %c720_i32 = arith.constant 720 : i32
        %235 = arith.addi %c720_i32, %234 : i32
        %236 = arith.addi %235, %70 : i32
        %c0_i32_171 = arith.constant 0 : i32
        %237 = arith.addi %236, %c0_i32_171 : i32
        %238 = arith.index_cast %237 : i32 to index
        %239 = memref.load %arg4[%238] : memref<1620xf32, #tpu.memory_space<smem>>
        %240 = vector.broadcast %239 : f32 to vector<75x128xf32>
        %241 = arith.mulf %233, %240 : vector<75x128xf32>
        %242 = arith.addf %224, %241 : vector<75x128xf32>
        %c1_i32_172 = arith.constant 1 : i32
        %243 = arith.addi %236, %c1_i32_172 : i32
        %244 = arith.index_cast %243 : i32 to index
        %245 = memref.load %arg4[%244] : memref<1620xf32, #tpu.memory_space<smem>>
        %246 = vector.broadcast %245 : f32 to vector<75x128xf32>
        %247 = arith.mulf %233, %246 : vector<75x128xf32>
        %248 = arith.addf %230, %247 : vector<75x128xf32>
        %249 = arith.index_cast %arg16 : i32 to index
        %c15_173 = arith.constant 15 : index
        %c0_174 = arith.constant 0 : index
        %250 = vector.load %arg11[%249, %c15_173, %c0_174] : memref<10x169x128xf32, #tpu.memory_space<vmem>>, vector<1x75x128xf32>
        %251 = vector.shape_cast %250 : vector<1x75x128xf32> to vector<75x128xf32>
        %c18_i32_175 = arith.constant 18 : i32
        %252 = arith.muli %arg16, %c18_i32_175 : i32
        %c900_i32 = arith.constant 900 : i32
        %253 = arith.addi %c900_i32, %252 : i32
        %254 = arith.addi %253, %70 : i32
        %c0_i32_176 = arith.constant 0 : i32
        %255 = arith.addi %254, %c0_i32_176 : i32
        %256 = arith.index_cast %255 : i32 to index
        %257 = memref.load %arg4[%256] : memref<1620xf32, #tpu.memory_space<smem>>
        %258 = vector.broadcast %257 : f32 to vector<75x128xf32>
        %259 = arith.mulf %251, %258 : vector<75x128xf32>
        %260 = arith.addf %242, %259 : vector<75x128xf32>
        %c1_i32_177 = arith.constant 1 : i32
        %261 = arith.addi %254, %c1_i32_177 : i32
        %262 = arith.index_cast %261 : i32 to index
        %263 = memref.load %arg4[%262] : memref<1620xf32, #tpu.memory_space<smem>>
        %264 = vector.broadcast %263 : f32 to vector<75x128xf32>
        %265 = arith.mulf %251, %264 : vector<75x128xf32>
        %266 = arith.addf %248, %265 : vector<75x128xf32>
        %267 = arith.index_cast %arg16 : i32 to index
        %c26_178 = arith.constant 26 : index
        %c0_179 = arith.constant 0 : index
        %268 = vector.load %arg11[%267, %c26_178, %c0_179] : memref<10x169x128xf32, #tpu.memory_space<vmem>>, vector<1x75x128xf32>
        %269 = vector.shape_cast %268 : vector<1x75x128xf32> to vector<75x128xf32>
        %c18_i32_180 = arith.constant 18 : i32
        %270 = arith.muli %arg16, %c18_i32_180 : i32
        %c1080_i32 = arith.constant 1080 : i32
        %271 = arith.addi %c1080_i32, %270 : i32
        %272 = arith.addi %271, %70 : i32
        %c0_i32_181 = arith.constant 0 : i32
        %273 = arith.addi %272, %c0_i32_181 : i32
        %274 = arith.index_cast %273 : i32 to index
        %275 = memref.load %arg4[%274] : memref<1620xf32, #tpu.memory_space<smem>>
        %276 = vector.broadcast %275 : f32 to vector<75x128xf32>
        %277 = arith.mulf %269, %276 : vector<75x128xf32>
        %278 = arith.addf %260, %277 : vector<75x128xf32>
        %c1_i32_182 = arith.constant 1 : i32
        %279 = arith.addi %272, %c1_i32_182 : i32
        %280 = arith.index_cast %279 : i32 to index
        %281 = memref.load %arg4[%280] : memref<1620xf32, #tpu.memory_space<smem>>
        %282 = vector.broadcast %281 : f32 to vector<75x128xf32>
        %283 = arith.mulf %269, %282 : vector<75x128xf32>
        %284 = arith.addf %266, %283 : vector<75x128xf32>
        %285 = arith.index_cast %arg16 : i32 to index
        %c27_183 = arith.constant 27 : index
        %c0_184 = arith.constant 0 : index
        %286 = vector.load %arg11[%285, %c27_183, %c0_184] : memref<10x169x128xf32, #tpu.memory_space<vmem>>, vector<1x75x128xf32>
        %287 = vector.shape_cast %286 : vector<1x75x128xf32> to vector<75x128xf32>
        %c18_i32_185 = arith.constant 18 : i32
        %288 = arith.muli %arg16, %c18_i32_185 : i32
        %c1260_i32 = arith.constant 1260 : i32
        %289 = arith.addi %c1260_i32, %288 : i32
        %290 = arith.addi %289, %70 : i32
        %c0_i32_186 = arith.constant 0 : i32
        %291 = arith.addi %290, %c0_i32_186 : i32
        %292 = arith.index_cast %291 : i32 to index
        %293 = memref.load %arg4[%292] : memref<1620xf32, #tpu.memory_space<smem>>
        %294 = vector.broadcast %293 : f32 to vector<75x128xf32>
        %295 = arith.mulf %287, %294 : vector<75x128xf32>
        %296 = arith.addf %278, %295 : vector<75x128xf32>
        %c1_i32_187 = arith.constant 1 : i32
        %297 = arith.addi %290, %c1_i32_187 : i32
        %298 = arith.index_cast %297 : i32 to index
        %299 = memref.load %arg4[%298] : memref<1620xf32, #tpu.memory_space<smem>>
        %300 = vector.broadcast %299 : f32 to vector<75x128xf32>
        %301 = arith.mulf %287, %300 : vector<75x128xf32>
        %302 = arith.addf %284, %301 : vector<75x128xf32>
        %303 = arith.index_cast %arg16 : i32 to index
        %c28 = arith.constant 28 : index
        %c0_188 = arith.constant 0 : index
        %304 = vector.load %arg11[%303, %c28, %c0_188] : memref<10x169x128xf32, #tpu.memory_space<vmem>>, vector<1x75x128xf32>
        %305 = vector.shape_cast %304 : vector<1x75x128xf32> to vector<75x128xf32>
        %c18_i32_189 = arith.constant 18 : i32
        %306 = arith.muli %arg16, %c18_i32_189 : i32
        %c1440_i32 = arith.constant 1440 : i32
        %307 = arith.addi %c1440_i32, %306 : i32
        %308 = arith.addi %307, %70 : i32
        %c0_i32_190 = arith.constant 0 : i32
        %309 = arith.addi %308, %c0_i32_190 : i32
        %310 = arith.index_cast %309 : i32 to index
        %311 = memref.load %arg4[%310] : memref<1620xf32, #tpu.memory_space<smem>>
        %312 = vector.broadcast %311 : f32 to vector<75x128xf32>
        %313 = arith.mulf %305, %312 : vector<75x128xf32>
        %314 = arith.addf %296, %313 : vector<75x128xf32>
        %c1_i32_191 = arith.constant 1 : i32
        %315 = arith.addi %308, %c1_i32_191 : i32
        %316 = arith.index_cast %315 : i32 to index
        %317 = memref.load %arg4[%316] : memref<1620xf32, #tpu.memory_space<smem>>
        %318 = vector.broadcast %317 : f32 to vector<75x128xf32>
        %319 = arith.mulf %305, %318 : vector<75x128xf32>
        %320 = arith.addf %302, %319 : vector<75x128xf32>
        scf.yield %314, %320 : vector<75x128xf32>, vector<75x128xf32>
      }
      %c10_i32_82 = arith.constant 10 : i32
      %cst_83 = arith.constant 0.000000e+00 : f32
      %81 = vector.broadcast %cst_83 : f32 to vector<75x128xf32>
      %82 = arith.maximumf %80#0, %81 : vector<75x128xf32>
      %c0_84 = arith.constant 0 : index
      %c0_85 = arith.constant 0 : index
      %83 = vector.load %arg14[%c0_84, %c0_85] : memref<80x128xf32, #tpu.memory_space<vmem>>, vector<75x128xf32>
      tpu.vector_store %arg14[%c0_84, %c0_85], %82 {strides = array<i32>} : memref<80x128xf32, #tpu.memory_space<vmem>>, vector<75x128xf32>,
      %c0_86 = arith.constant 0 : index
      %c0_87 = arith.constant 0 : index
      %84 = tpu.strided_load %arg14[%c0_86, %c0_87] {strides = array<i32: 2, 1>} : memref<80x128xf32, #tpu.memory_space<vmem>>, vector<5x128xf32>
      %c1_88 = arith.constant 1 : index
      %c0_89 = arith.constant 0 : index
      %85 = tpu.strided_load %arg14[%c1_88, %c0_89] {strides = array<i32: 2, 1>} : memref<80x128xf32, #tpu.memory_space<vmem>>, vector<5x128xf32>
      %c13_90 = arith.constant 13 : index
      %c0_91 = arith.constant 0 : index
      %86 = tpu.strided_load %arg14[%c13_90, %c0_91] {strides = array<i32: 2, 1>} : memref<80x128xf32, #tpu.memory_space<vmem>>, vector<5x128xf32>
      %c14_92 = arith.constant 14 : index
      %c0_93 = arith.constant 0 : index
      %87 = tpu.strided_load %arg14[%c14_92, %c0_93] {strides = array<i32: 2, 1>} : memref<80x128xf32, #tpu.memory_space<vmem>>, vector<5x128xf32>
      %88 = arith.maximumf %84, %85 : vector<5x128xf32>
      %89 = arith.maximumf %86, %87 : vector<5x128xf32>
      %90 = arith.maximumf %88, %89 : vector<5x128xf32>
      %c0_i32_94 = arith.constant 0 : i32
      %91 = arith.addi %70, %c0_i32_94 : i32
      %92 = arith.index_cast %91 : i32 to index
      %c0_95 = arith.constant 0 : index
      %c0_96 = arith.constant 0 : index
      %93 = vector.load %arg12[%92, %c0_95, %c0_96] : memref<18x25x128xf32, #tpu.memory_space<vmem>>, vector<1x5x128xf32>
      %94 = vector.shape_cast %93 : vector<1x5x128xf32> to vector<5x128xf32>
      %95 = vector.shape_cast %90 : vector<5x128xf32> to vector<1x5x128xf32>
      tpu.vector_store %arg12[%92, %c0_95, %c0_96], %95 {strides = array<i32>} : memref<18x25x128xf32, #tpu.memory_space<vmem>>, vector<1x5x128xf32>,
      %c26_97 = arith.constant 26 : index
      %c0_98 = arith.constant 0 : index
      %96 = tpu.strided_load %arg14[%c26_97, %c0_98] {strides = array<i32: 2, 1>} : memref<80x128xf32, #tpu.memory_space<vmem>>, vector<5x128xf32>
      %c27 = arith.constant 27 : index
      %c0_99 = arith.constant 0 : index
      %97 = tpu.strided_load %arg14[%c27, %c0_99] {strides = array<i32: 2, 1>} : memref<80x128xf32, #tpu.memory_space<vmem>>, vector<5x128xf32>
      %c39 = arith.constant 39 : index
      %c0_100 = arith.constant 0 : index
      %98 = tpu.strided_load %arg14[%c39, %c0_100] {strides = array<i32: 2, 1>} : memref<80x128xf32, #tpu.memory_space<vmem>>, vector<5x128xf32>
      %c40 = arith.constant 40 : index
      %c0_101 = arith.constant 0 : index
      %99 = tpu.strided_load %arg14[%c40, %c0_101] {strides = array<i32: 2, 1>} : memref<80x128xf32, #tpu.memory_space<vmem>>, vector<5x128xf32>
      %100 = arith.maximumf %96, %97 : vector<5x128xf32>
      %101 = arith.maximumf %98, %99 : vector<5x128xf32>
      %102 = arith.maximumf %100, %101 : vector<5x128xf32>
      %c0_i32_102 = arith.constant 0 : i32
      %103 = arith.addi %70, %c0_i32_102 : i32
      %104 = arith.index_cast %103 : i32 to index
      %c5_103 = arith.constant 5 : index
      %c0_104 = arith.constant 0 : index
      %105 = vector.load %arg12[%104, %c5_103, %c0_104] : memref<18x25x128xf32, #tpu.memory_space<vmem>>, vector<1x5x128xf32>
      %106 = vector.shape_cast %105 : vector<1x5x128xf32> to vector<5x128xf32>
      %107 = vector.shape_cast %102 : vector<5x128xf32> to vector<1x5x128xf32>
      tpu.vector_store %arg12[%104, %c5_103, %c0_104], %107 {strides = array<i32>} : memref<18x25x128xf32, #tpu.memory_space<vmem>>, vector<1x5x128xf32>,
      %c52 = arith.constant 52 : index
      %c0_105 = arith.constant 0 : index
      %108 = tpu.strided_load %arg14[%c52, %c0_105] {strides = array<i32: 2, 1>} : memref<80x128xf32, #tpu.memory_space<vmem>>, vector<5x128xf32>
      %c53 = arith.constant 53 : index
      %c0_106 = arith.constant 0 : index
      %109 = tpu.strided_load %arg14[%c53, %c0_106] {strides = array<i32: 2, 1>} : memref<80x128xf32, #tpu.memory_space<vmem>>, vector<5x128xf32>
      %c65 = arith.constant 65 : index
      %c0_107 = arith.constant 0 : index
      %110 = tpu.strided_load %arg14[%c65, %c0_107] {strides = array<i32: 2, 1>} : memref<80x128xf32, #tpu.memory_space<vmem>>, vector<5x128xf32>
      %c66 = arith.constant 66 : index
      %c0_108 = arith.constant 0 : index
      %111 = tpu.strided_load %arg14[%c66, %c0_108] {strides = array<i32: 2, 1>} : memref<80x128xf32, #tpu.memory_space<vmem>>, vector<5x128xf32>
      %112 = arith.maximumf %108, %109 : vector<5x128xf32>
      %113 = arith.maximumf %110, %111 : vector<5x128xf32>
      %114 = arith.maximumf %112, %113 : vector<5x128xf32>
      %c0_i32_109 = arith.constant 0 : i32
      %115 = arith.addi %70, %c0_i32_109 : i32
      %116 = arith.index_cast %115 : i32 to index
      %c10_110 = arith.constant 10 : index
      %c0_111 = arith.constant 0 : index
      %117 = vector.load %arg12[%116, %c10_110, %c0_111] : memref<18x25x128xf32, #tpu.memory_space<vmem>>, vector<1x5x128xf32>
      %118 = vector.shape_cast %117 : vector<1x5x128xf32> to vector<5x128xf32>
      %119 = vector.shape_cast %114 : vector<5x128xf32> to vector<1x5x128xf32>
      tpu.vector_store %arg12[%116, %c10_110, %c0_111], %119 {strides = array<i32>} : memref<18x25x128xf32, #tpu.memory_space<vmem>>, vector<1x5x128xf32>,
      %cst_112 = arith.constant 0.000000e+00 : f32
      %120 = vector.broadcast %cst_112 : f32 to vector<75x128xf32>
      %121 = arith.maximumf %80#1, %120 : vector<75x128xf32>
      %c0_113 = arith.constant 0 : index
      %c0_114 = arith.constant 0 : index
      %122 = vector.load %arg14[%c0_113, %c0_114] : memref<80x128xf32, #tpu.memory_space<vmem>>, vector<75x128xf32>
      tpu.vector_store %arg14[%c0_113, %c0_114], %121 {strides = array<i32>} : memref<80x128xf32, #tpu.memory_space<vmem>>, vector<75x128xf32>,
      %c0_115 = arith.constant 0 : index
      %c0_116 = arith.constant 0 : index
      %123 = tpu.strided_load %arg14[%c0_115, %c0_116] {strides = array<i32: 2, 1>} : memref<80x128xf32, #tpu.memory_space<vmem>>, vector<5x128xf32>
      %c1_117 = arith.constant 1 : index
      %c0_118 = arith.constant 0 : index
      %124 = tpu.strided_load %arg14[%c1_117, %c0_118] {strides = array<i32: 2, 1>} : memref<80x128xf32, #tpu.memory_space<vmem>>, vector<5x128xf32>
      %c13_119 = arith.constant 13 : index
      %c0_120 = arith.constant 0 : index
      %125 = tpu.strided_load %arg14[%c13_119, %c0_120] {strides = array<i32: 2, 1>} : memref<80x128xf32, #tpu.memory_space<vmem>>, vector<5x128xf32>
      %c14_121 = arith.constant 14 : index
      %c0_122 = arith.constant 0 : index
      %126 = tpu.strided_load %arg14[%c14_121, %c0_122] {strides = array<i32: 2, 1>} : memref<80x128xf32, #tpu.memory_space<vmem>>, vector<5x128xf32>
      %127 = arith.maximumf %123, %124 : vector<5x128xf32>
      %128 = arith.maximumf %125, %126 : vector<5x128xf32>
      %129 = arith.maximumf %127, %128 : vector<5x128xf32>
      %c1_i32_123 = arith.constant 1 : i32
      %130 = arith.addi %70, %c1_i32_123 : i32
      %131 = arith.index_cast %130 : i32 to index
      %c0_124 = arith.constant 0 : index
      %c0_125 = arith.constant 0 : index
      %132 = vector.load %arg12[%131, %c0_124, %c0_125] : memref<18x25x128xf32, #tpu.memory_space<vmem>>, vector<1x5x128xf32>
      %133 = vector.shape_cast %132 : vector<1x5x128xf32> to vector<5x128xf32>
      %134 = vector.shape_cast %129 : vector<5x128xf32> to vector<1x5x128xf32>
      tpu.vector_store %arg12[%131, %c0_124, %c0_125], %134 {strides = array<i32>} : memref<18x25x128xf32, #tpu.memory_space<vmem>>, vector<1x5x128xf32>,
      %c26_126 = arith.constant 26 : index
      %c0_127 = arith.constant 0 : index
      %135 = tpu.strided_load %arg14[%c26_126, %c0_127] {strides = array<i32: 2, 1>} : memref<80x128xf32, #tpu.memory_space<vmem>>, vector<5x128xf32>
      %c27_128 = arith.constant 27 : index
      %c0_129 = arith.constant 0 : index
      %136 = tpu.strided_load %arg14[%c27_128, %c0_129] {strides = array<i32: 2, 1>} : memref<80x128xf32, #tpu.memory_space<vmem>>, vector<5x128xf32>
      %c39_130 = arith.constant 39 : index
      %c0_131 = arith.constant 0 : index
      %137 = tpu.strided_load %arg14[%c39_130, %c0_131] {strides = array<i32: 2, 1>} : memref<80x128xf32, #tpu.memory_space<vmem>>, vector<5x128xf32>
      %c40_132 = arith.constant 40 : index
      %c0_133 = arith.constant 0 : index
      %138 = tpu.strided_load %arg14[%c40_132, %c0_133] {strides = array<i32: 2, 1>} : memref<80x128xf32, #tpu.memory_space<vmem>>, vector<5x128xf32>
      %139 = arith.maximumf %135, %136 : vector<5x128xf32>
      %140 = arith.maximumf %137, %138 : vector<5x128xf32>
      %141 = arith.maximumf %139, %140 : vector<5x128xf32>
      %c1_i32_134 = arith.constant 1 : i32
      %142 = arith.addi %70, %c1_i32_134 : i32
      %143 = arith.index_cast %142 : i32 to index
      %c5_135 = arith.constant 5 : index
      %c0_136 = arith.constant 0 : index
      %144 = vector.load %arg12[%143, %c5_135, %c0_136] : memref<18x25x128xf32, #tpu.memory_space<vmem>>, vector<1x5x128xf32>
      %145 = vector.shape_cast %144 : vector<1x5x128xf32> to vector<5x128xf32>
      %146 = vector.shape_cast %141 : vector<5x128xf32> to vector<1x5x128xf32>
      tpu.vector_store %arg12[%143, %c5_135, %c0_136], %146 {strides = array<i32>} : memref<18x25x128xf32, #tpu.memory_space<vmem>>, vector<1x5x128xf32>,
      %c52_137 = arith.constant 52 : index
      %c0_138 = arith.constant 0 : index
      %147 = tpu.strided_load %arg14[%c52_137, %c0_138] {strides = array<i32: 2, 1>} : memref<80x128xf32, #tpu.memory_space<vmem>>, vector<5x128xf32>
      %c53_139 = arith.constant 53 : index
      %c0_140 = arith.constant 0 : index
      %148 = tpu.strided_load %arg14[%c53_139, %c0_140] {strides = array<i32: 2, 1>} : memref<80x128xf32, #tpu.memory_space<vmem>>, vector<5x128xf32>
      %c65_141 = arith.constant 65 : index
      %c0_142 = arith.constant 0 : index
      %149 = tpu.strided_load %arg14[%c65_141, %c0_142] {strides = array<i32: 2, 1>} : memref<80x128xf32, #tpu.memory_space<vmem>>, vector<5x128xf32>
      %c66_143 = arith.constant 66 : index
      %c0_144 = arith.constant 0 : index
      %150 = tpu.strided_load %arg14[%c66_143, %c0_144] {strides = array<i32: 2, 1>} : memref<80x128xf32, #tpu.memory_space<vmem>>, vector<5x128xf32>
      %151 = arith.maximumf %147, %148 : vector<5x128xf32>
      %152 = arith.maximumf %149, %150 : vector<5x128xf32>
      %153 = arith.maximumf %151, %152 : vector<5x128xf32>
      %c1_i32_145 = arith.constant 1 : i32
      %154 = arith.addi %70, %c1_i32_145 : i32
      %155 = arith.index_cast %154 : i32 to index
      %c10_146 = arith.constant 10 : index
      %c0_147 = arith.constant 0 : index
      %156 = vector.load %arg12[%155, %c10_146, %c0_147] : memref<18x25x128xf32, #tpu.memory_space<vmem>>, vector<1x5x128xf32>
      %157 = vector.shape_cast %156 : vector<1x5x128xf32> to vector<5x128xf32>
      %158 = vector.shape_cast %153 : vector<5x128xf32> to vector<1x5x128xf32>
      tpu.vector_store %arg12[%155, %c10_146, %c0_147], %158 {strides = array<i32>} : memref<18x25x128xf32, #tpu.memory_space<vmem>>, vector<1x5x128xf32>,
    }
    %c9_i32_6 = arith.constant 9 : i32
    %c0_i32_7 = arith.constant 0 : i32
    %c9_i32_8 = arith.constant 9 : i32
    %3 = arith.addi %c0_i32_7, %c9_i32_8 : i32
    %c1_i32_9 = arith.constant 1 : i32
    scf.for %arg15 = %c0_i32_7 to %3 step %c1_i32_9  : i32 {
      %c1_i32_75 = arith.constant 1 : i32
      %68 = arith.muli %arg15, %c1_i32_75 : i32
      %c0_i32_76 = arith.constant 0 : i32
      %69 = arith.addi %c0_i32_76, %68 : i32
      %c2_i32 = arith.constant 2 : i32
      %70 = arith.muli %69, %c2_i32 : i32
      %c0_i32_77 = arith.constant 0 : i32
      %71 = arith.addi %70, %c0_i32_77 : i32
      %72 = arith.index_cast %71 : i32 to index
      %73 = memref.load %arg5[%72] : memref<18xf32, #tpu.memory_space<smem>>
      %74 = vector.broadcast %73 : f32 to vector<49x128xf32>
      %c1_i32_78 = arith.constant 1 : i32
      %75 = arith.addi %70, %c1_i32_78 : i32
      %76 = arith.index_cast %75 : i32 to index
      %77 = memref.load %arg5[%76] : memref<18xf32, #tpu.memory_space<smem>>
      %78 = vector.broadcast %77 : f32 to vector<49x128xf32>
      %c0_i32_79 = arith.constant 0 : i32
      %c10_i32_80 = arith.constant 10 : i32
      %79 = arith.addi %c0_i32_79, %c10_i32_80 : i32
      %c1_i32_81 = arith.constant 1 : i32
      %80:2 = scf.for %arg16 = %c0_i32_79 to %79 step %c1_i32_81 iter_args(%arg17 = %74, %arg18 = %78) -> (vector<49x128xf32>, vector<49x128xf32>)  : i32 {
        %135 = arith.index_cast %arg16 : i32 to index
        %c78 = arith.constant 78 : index
        %c0_130 = arith.constant 0 : index
        %136 = vector.load %arg11[%135, %c78, %c0_130] : memref<10x169x128xf32, #tpu.memory_space<vmem>>, vector<1x49x128xf32>
        %137 = vector.shape_cast %136 : vector<1x49x128xf32> to vector<49x128xf32>
        %c18_i32 = arith.constant 18 : i32
        %138 = arith.muli %arg16, %c18_i32 : i32
        %c0_i32_131 = arith.constant 0 : i32
        %139 = arith.addi %c0_i32_131, %138 : i32
        %140 = arith.addi %139, %70 : i32
        %c0_i32_132 = arith.constant 0 : i32
        %141 = arith.addi %140, %c0_i32_132 : i32
        %142 = arith.index_cast %141 : i32 to index
        %143 = memref.load %arg4[%142] : memref<1620xf32, #tpu.memory_space<smem>>
        %144 = vector.broadcast %143 : f32 to vector<49x128xf32>
        %145 = arith.mulf %137, %144 : vector<49x128xf32>
        %146 = arith.addf %arg17, %145 : vector<49x128xf32>
        %c1_i32_133 = arith.constant 1 : i32
        %147 = arith.addi %140, %c1_i32_133 : i32
        %148 = arith.index_cast %147 : i32 to index
        %149 = memref.load %arg4[%148] : memref<1620xf32, #tpu.memory_space<smem>>
        %150 = vector.broadcast %149 : f32 to vector<49x128xf32>
        %151 = arith.mulf %137, %150 : vector<49x128xf32>
        %152 = arith.addf %arg18, %151 : vector<49x128xf32>
        %153 = arith.index_cast %arg16 : i32 to index
        %c79 = arith.constant 79 : index
        %c0_134 = arith.constant 0 : index
        %154 = vector.load %arg11[%153, %c79, %c0_134] : memref<10x169x128xf32, #tpu.memory_space<vmem>>, vector<1x49x128xf32>
        %155 = vector.shape_cast %154 : vector<1x49x128xf32> to vector<49x128xf32>
        %c18_i32_135 = arith.constant 18 : i32
        %156 = arith.muli %arg16, %c18_i32_135 : i32
        %c180_i32 = arith.constant 180 : i32
        %157 = arith.addi %c180_i32, %156 : i32
        %158 = arith.addi %157, %70 : i32
        %c0_i32_136 = arith.constant 0 : i32
        %159 = arith.addi %158, %c0_i32_136 : i32
        %160 = arith.index_cast %159 : i32 to index
        %161 = memref.load %arg4[%160] : memref<1620xf32, #tpu.memory_space<smem>>
        %162 = vector.broadcast %161 : f32 to vector<49x128xf32>
        %163 = arith.mulf %155, %162 : vector<49x128xf32>
        %164 = arith.addf %146, %163 : vector<49x128xf32>
        %c1_i32_137 = arith.constant 1 : i32
        %165 = arith.addi %158, %c1_i32_137 : i32
        %166 = arith.index_cast %165 : i32 to index
        %167 = memref.load %arg4[%166] : memref<1620xf32, #tpu.memory_space<smem>>
        %168 = vector.broadcast %167 : f32 to vector<49x128xf32>
        %169 = arith.mulf %155, %168 : vector<49x128xf32>
        %170 = arith.addf %152, %169 : vector<49x128xf32>
        %171 = arith.index_cast %arg16 : i32 to index
        %c80 = arith.constant 80 : index
        %c0_138 = arith.constant 0 : index
        %172 = vector.load %arg11[%171, %c80, %c0_138] : memref<10x169x128xf32, #tpu.memory_space<vmem>>, vector<1x49x128xf32>
        %173 = vector.shape_cast %172 : vector<1x49x128xf32> to vector<49x128xf32>
        %c18_i32_139 = arith.constant 18 : i32
        %174 = arith.muli %arg16, %c18_i32_139 : i32
        %c360_i32 = arith.constant 360 : i32
        %175 = arith.addi %c360_i32, %174 : i32
        %176 = arith.addi %175, %70 : i32
        %c0_i32_140 = arith.constant 0 : i32
        %177 = arith.addi %176, %c0_i32_140 : i32
        %178 = arith.index_cast %177 : i32 to index
        %179 = memref.load %arg4[%178] : memref<1620xf32, #tpu.memory_space<smem>>
        %180 = vector.broadcast %179 : f32 to vector<49x128xf32>
        %181 = arith.mulf %173, %180 : vector<49x128xf32>
        %182 = arith.addf %164, %181 : vector<49x128xf32>
        %c1_i32_141 = arith.constant 1 : i32
        %183 = arith.addi %176, %c1_i32_141 : i32
        %184 = arith.index_cast %183 : i32 to index
        %185 = memref.load %arg4[%184] : memref<1620xf32, #tpu.memory_space<smem>>
        %186 = vector.broadcast %185 : f32 to vector<49x128xf32>
        %187 = arith.mulf %173, %186 : vector<49x128xf32>
        %188 = arith.addf %170, %187 : vector<49x128xf32>
        %189 = arith.index_cast %arg16 : i32 to index
        %c91 = arith.constant 91 : index
        %c0_142 = arith.constant 0 : index
        %190 = vector.load %arg11[%189, %c91, %c0_142] : memref<10x169x128xf32, #tpu.memory_space<vmem>>, vector<1x49x128xf32>
        %191 = vector.shape_cast %190 : vector<1x49x128xf32> to vector<49x128xf32>
        %c18_i32_143 = arith.constant 18 : i32
        %192 = arith.muli %arg16, %c18_i32_143 : i32
        %c540_i32 = arith.constant 540 : i32
        %193 = arith.addi %c540_i32, %192 : i32
        %194 = arith.addi %193, %70 : i32
        %c0_i32_144 = arith.constant 0 : i32
        %195 = arith.addi %194, %c0_i32_144 : i32
        %196 = arith.index_cast %195 : i32 to index
        %197 = memref.load %arg4[%196] : memref<1620xf32, #tpu.memory_space<smem>>
        %198 = vector.broadcast %197 : f32 to vector<49x128xf32>
        %199 = arith.mulf %191, %198 : vector<49x128xf32>
        %200 = arith.addf %182, %199 : vector<49x128xf32>
        %c1_i32_145 = arith.constant 1 : i32
        %201 = arith.addi %194, %c1_i32_145 : i32
        %202 = arith.index_cast %201 : i32 to index
        %203 = memref.load %arg4[%202] : memref<1620xf32, #tpu.memory_space<smem>>
        %204 = vector.broadcast %203 : f32 to vector<49x128xf32>
        %205 = arith.mulf %191, %204 : vector<49x128xf32>
        %206 = arith.addf %188, %205 : vector<49x128xf32>
        %207 = arith.index_cast %arg16 : i32 to index
        %c92 = arith.constant 92 : index
        %c0_146 = arith.constant 0 : index
        %208 = vector.load %arg11[%207, %c92, %c0_146] : memref<10x169x128xf32, #tpu.memory_space<vmem>>, vector<1x49x128xf32>
        %209 = vector.shape_cast %208 : vector<1x49x128xf32> to vector<49x128xf32>
        %c18_i32_147 = arith.constant 18 : i32
        %210 = arith.muli %arg16, %c18_i32_147 : i32
        %c720_i32 = arith.constant 720 : i32
        %211 = arith.addi %c720_i32, %210 : i32
        %212 = arith.addi %211, %70 : i32
        %c0_i32_148 = arith.constant 0 : i32
        %213 = arith.addi %212, %c0_i32_148 : i32
        %214 = arith.index_cast %213 : i32 to index
        %215 = memref.load %arg4[%214] : memref<1620xf32, #tpu.memory_space<smem>>
        %216 = vector.broadcast %215 : f32 to vector<49x128xf32>
        %217 = arith.mulf %209, %216 : vector<49x128xf32>
        %218 = arith.addf %200, %217 : vector<49x128xf32>
        %c1_i32_149 = arith.constant 1 : i32
        %219 = arith.addi %212, %c1_i32_149 : i32
        %220 = arith.index_cast %219 : i32 to index
        %221 = memref.load %arg4[%220] : memref<1620xf32, #tpu.memory_space<smem>>
        %222 = vector.broadcast %221 : f32 to vector<49x128xf32>
        %223 = arith.mulf %209, %222 : vector<49x128xf32>
        %224 = arith.addf %206, %223 : vector<49x128xf32>
        %225 = arith.index_cast %arg16 : i32 to index
        %c93 = arith.constant 93 : index
        %c0_150 = arith.constant 0 : index
        %226 = vector.load %arg11[%225, %c93, %c0_150] : memref<10x169x128xf32, #tpu.memory_space<vmem>>, vector<1x49x128xf32>
        %227 = vector.shape_cast %226 : vector<1x49x128xf32> to vector<49x128xf32>
        %c18_i32_151 = arith.constant 18 : i32
        %228 = arith.muli %arg16, %c18_i32_151 : i32
        %c900_i32 = arith.constant 900 : i32
        %229 = arith.addi %c900_i32, %228 : i32
        %230 = arith.addi %229, %70 : i32
        %c0_i32_152 = arith.constant 0 : i32
        %231 = arith.addi %230, %c0_i32_152 : i32
        %232 = arith.index_cast %231 : i32 to index
        %233 = memref.load %arg4[%232] : memref<1620xf32, #tpu.memory_space<smem>>
        %234 = vector.broadcast %233 : f32 to vector<49x128xf32>
        %235 = arith.mulf %227, %234 : vector<49x128xf32>
        %236 = arith.addf %218, %235 : vector<49x128xf32>
        %c1_i32_153 = arith.constant 1 : i32
        %237 = arith.addi %230, %c1_i32_153 : i32
        %238 = arith.index_cast %237 : i32 to index
        %239 = memref.load %arg4[%238] : memref<1620xf32, #tpu.memory_space<smem>>
        %240 = vector.broadcast %239 : f32 to vector<49x128xf32>
        %241 = arith.mulf %227, %240 : vector<49x128xf32>
        %242 = arith.addf %224, %241 : vector<49x128xf32>
        %243 = arith.index_cast %arg16 : i32 to index
        %c104 = arith.constant 104 : index
        %c0_154 = arith.constant 0 : index
        %244 = vector.load %arg11[%243, %c104, %c0_154] : memref<10x169x128xf32, #tpu.memory_space<vmem>>, vector<1x49x128xf32>
        %245 = vector.shape_cast %244 : vector<1x49x128xf32> to vector<49x128xf32>
        %c18_i32_155 = arith.constant 18 : i32
        %246 = arith.muli %arg16, %c18_i32_155 : i32
        %c1080_i32 = arith.constant 1080 : i32
        %247 = arith.addi %c1080_i32, %246 : i32
        %248 = arith.addi %247, %70 : i32
        %c0_i32_156 = arith.constant 0 : i32
        %249 = arith.addi %248, %c0_i32_156 : i32
        %250 = arith.index_cast %249 : i32 to index
        %251 = memref.load %arg4[%250] : memref<1620xf32, #tpu.memory_space<smem>>
        %252 = vector.broadcast %251 : f32 to vector<49x128xf32>
        %253 = arith.mulf %245, %252 : vector<49x128xf32>
        %254 = arith.addf %236, %253 : vector<49x128xf32>
        %c1_i32_157 = arith.constant 1 : i32
        %255 = arith.addi %248, %c1_i32_157 : i32
        %256 = arith.index_cast %255 : i32 to index
        %257 = memref.load %arg4[%256] : memref<1620xf32, #tpu.memory_space<smem>>
        %258 = vector.broadcast %257 : f32 to vector<49x128xf32>
        %259 = arith.mulf %245, %258 : vector<49x128xf32>
        %260 = arith.addf %242, %259 : vector<49x128xf32>
        %261 = arith.index_cast %arg16 : i32 to index
        %c105 = arith.constant 105 : index
        %c0_158 = arith.constant 0 : index
        %262 = vector.load %arg11[%261, %c105, %c0_158] : memref<10x169x128xf32, #tpu.memory_space<vmem>>, vector<1x49x128xf32>
        %263 = vector.shape_cast %262 : vector<1x49x128xf32> to vector<49x128xf32>
        %c18_i32_159 = arith.constant 18 : i32
        %264 = arith.muli %arg16, %c18_i32_159 : i32
        %c1260_i32 = arith.constant 1260 : i32
        %265 = arith.addi %c1260_i32, %264 : i32
        %266 = arith.addi %265, %70 : i32
        %c0_i32_160 = arith.constant 0 : i32
        %267 = arith.addi %266, %c0_i32_160 : i32
        %268 = arith.index_cast %267 : i32 to index
        %269 = memref.load %arg4[%268] : memref<1620xf32, #tpu.memory_space<smem>>
        %270 = vector.broadcast %269 : f32 to vector<49x128xf32>
        %271 = arith.mulf %263, %270 : vector<49x128xf32>
        %272 = arith.addf %254, %271 : vector<49x128xf32>
        %c1_i32_161 = arith.constant 1 : i32
        %273 = arith.addi %266, %c1_i32_161 : i32
        %274 = arith.index_cast %273 : i32 to index
        %275 = memref.load %arg4[%274] : memref<1620xf32, #tpu.memory_space<smem>>
        %276 = vector.broadcast %275 : f32 to vector<49x128xf32>
        %277 = arith.mulf %263, %276 : vector<49x128xf32>
        %278 = arith.addf %260, %277 : vector<49x128xf32>
        %279 = arith.index_cast %arg16 : i32 to index
        %c106 = arith.constant 106 : index
        %c0_162 = arith.constant 0 : index
        %280 = vector.load %arg11[%279, %c106, %c0_162] : memref<10x169x128xf32, #tpu.memory_space<vmem>>, vector<1x49x128xf32>
        %281 = vector.shape_cast %280 : vector<1x49x128xf32> to vector<49x128xf32>
        %c18_i32_163 = arith.constant 18 : i32
        %282 = arith.muli %arg16, %c18_i32_163 : i32
        %c1440_i32 = arith.constant 1440 : i32
        %283 = arith.addi %c1440_i32, %282 : i32
        %284 = arith.addi %283, %70 : i32
        %c0_i32_164 = arith.constant 0 : i32
        %285 = arith.addi %284, %c0_i32_164 : i32
        %286 = arith.index_cast %285 : i32 to index
        %287 = memref.load %arg4[%286] : memref<1620xf32, #tpu.memory_space<smem>>
        %288 = vector.broadcast %287 : f32 to vector<49x128xf32>
        %289 = arith.mulf %281, %288 : vector<49x128xf32>
        %290 = arith.addf %272, %289 : vector<49x128xf32>
        %c1_i32_165 = arith.constant 1 : i32
        %291 = arith.addi %284, %c1_i32_165 : i32
        %292 = arith.index_cast %291 : i32 to index
        %293 = memref.load %arg4[%292] : memref<1620xf32, #tpu.memory_space<smem>>
        %294 = vector.broadcast %293 : f32 to vector<49x128xf32>
        %295 = arith.mulf %281, %294 : vector<49x128xf32>
        %296 = arith.addf %278, %295 : vector<49x128xf32>
        scf.yield %290, %296 : vector<49x128xf32>, vector<49x128xf32>
      }
      %c10_i32_82 = arith.constant 10 : i32
      %cst_83 = arith.constant 0.000000e+00 : f32
      %81 = vector.broadcast %cst_83 : f32 to vector<49x128xf32>
      %82 = arith.maximumf %80#0, %81 : vector<49x128xf32>
      %c0_84 = arith.constant 0 : index
      %c0_85 = arith.constant 0 : index
      %83 = vector.load %arg14[%c0_84, %c0_85] : memref<80x128xf32, #tpu.memory_space<vmem>>, vector<49x128xf32>
      tpu.vector_store %arg14[%c0_84, %c0_85], %82 {strides = array<i32>} : memref<80x128xf32, #tpu.memory_space<vmem>>, vector<49x128xf32>,
      %c0_86 = arith.constant 0 : index
      %c0_87 = arith.constant 0 : index
      %84 = tpu.strided_load %arg14[%c0_86, %c0_87] {strides = array<i32: 2, 1>} : memref<80x128xf32, #tpu.memory_space<vmem>>, vector<5x128xf32>
      %c1_88 = arith.constant 1 : index
      %c0_89 = arith.constant 0 : index
      %85 = tpu.strided_load %arg14[%c1_88, %c0_89] {strides = array<i32: 2, 1>} : memref<80x128xf32, #tpu.memory_space<vmem>>, vector<5x128xf32>
      %c13_90 = arith.constant 13 : index
      %c0_91 = arith.constant 0 : index
      %86 = tpu.strided_load %arg14[%c13_90, %c0_91] {strides = array<i32: 2, 1>} : memref<80x128xf32, #tpu.memory_space<vmem>>, vector<5x128xf32>
      %c14_92 = arith.constant 14 : index
      %c0_93 = arith.constant 0 : index
      %87 = tpu.strided_load %arg14[%c14_92, %c0_93] {strides = array<i32: 2, 1>} : memref<80x128xf32, #tpu.memory_space<vmem>>, vector<5x128xf32>
      %88 = arith.maximumf %84, %85 : vector<5x128xf32>
      %89 = arith.maximumf %86, %87 : vector<5x128xf32>
      %90 = arith.maximumf %88, %89 : vector<5x128xf32>
      %c0_i32_94 = arith.constant 0 : i32
      %91 = arith.addi %70, %c0_i32_94 : i32
      %92 = arith.index_cast %91 : i32 to index
      %c15_95 = arith.constant 15 : index
      %c0_96 = arith.constant 0 : index
      %93 = vector.load %arg12[%92, %c15_95, %c0_96] : memref<18x25x128xf32, #tpu.memory_space<vmem>>, vector<1x5x128xf32>
      %94 = vector.shape_cast %93 : vector<1x5x128xf32> to vector<5x128xf32>
      %95 = vector.shape_cast %90 : vector<5x128xf32> to vector<1x5x128xf32>
      tpu.vector_store %arg12[%92, %c15_95, %c0_96], %95 {strides = array<i32>} : memref<18x25x128xf32, #tpu.memory_space<vmem>>, vector<1x5x128xf32>,
      %c26_97 = arith.constant 26 : index
      %c0_98 = arith.constant 0 : index
      %96 = tpu.strided_load %arg14[%c26_97, %c0_98] {strides = array<i32: 2, 1>} : memref<80x128xf32, #tpu.memory_space<vmem>>, vector<5x128xf32>
      %c27 = arith.constant 27 : index
      %c0_99 = arith.constant 0 : index
      %97 = tpu.strided_load %arg14[%c27, %c0_99] {strides = array<i32: 2, 1>} : memref<80x128xf32, #tpu.memory_space<vmem>>, vector<5x128xf32>
      %c39 = arith.constant 39 : index
      %c0_100 = arith.constant 0 : index
      %98 = tpu.strided_load %arg14[%c39, %c0_100] {strides = array<i32: 2, 1>} : memref<80x128xf32, #tpu.memory_space<vmem>>, vector<5x128xf32>
      %c40 = arith.constant 40 : index
      %c0_101 = arith.constant 0 : index
      %99 = tpu.strided_load %arg14[%c40, %c0_101] {strides = array<i32: 2, 1>} : memref<80x128xf32, #tpu.memory_space<vmem>>, vector<5x128xf32>
      %100 = arith.maximumf %96, %97 : vector<5x128xf32>
      %101 = arith.maximumf %98, %99 : vector<5x128xf32>
      %102 = arith.maximumf %100, %101 : vector<5x128xf32>
      %c0_i32_102 = arith.constant 0 : i32
      %103 = arith.addi %70, %c0_i32_102 : i32
      %104 = arith.index_cast %103 : i32 to index
      %c20_103 = arith.constant 20 : index
      %c0_104 = arith.constant 0 : index
      %105 = vector.load %arg12[%104, %c20_103, %c0_104] : memref<18x25x128xf32, #tpu.memory_space<vmem>>, vector<1x5x128xf32>
      %106 = vector.shape_cast %105 : vector<1x5x128xf32> to vector<5x128xf32>
      %107 = vector.shape_cast %102 : vector<5x128xf32> to vector<1x5x128xf32>
      tpu.vector_store %arg12[%104, %c20_103, %c0_104], %107 {strides = array<i32>} : memref<18x25x128xf32, #tpu.memory_space<vmem>>, vector<1x5x128xf32>,
      %cst_105 = arith.constant 0.000000e+00 : f32
      %108 = vector.broadcast %cst_105 : f32 to vector<49x128xf32>
      %109 = arith.maximumf %80#1, %108 : vector<49x128xf32>
      %c0_106 = arith.constant 0 : index
      %c0_107 = arith.constant 0 : index
      %110 = vector.load %arg14[%c0_106, %c0_107] : memref<80x128xf32, #tpu.memory_space<vmem>>, vector<49x128xf32>
      tpu.vector_store %arg14[%c0_106, %c0_107], %109 {strides = array<i32>} : memref<80x128xf32, #tpu.memory_space<vmem>>, vector<49x128xf32>,
      %c0_108 = arith.constant 0 : index
      %c0_109 = arith.constant 0 : index
      %111 = tpu.strided_load %arg14[%c0_108, %c0_109] {strides = array<i32: 2, 1>} : memref<80x128xf32, #tpu.memory_space<vmem>>, vector<5x128xf32>
      %c1_110 = arith.constant 1 : index
      %c0_111 = arith.constant 0 : index
      %112 = tpu.strided_load %arg14[%c1_110, %c0_111] {strides = array<i32: 2, 1>} : memref<80x128xf32, #tpu.memory_space<vmem>>, vector<5x128xf32>
      %c13_112 = arith.constant 13 : index
      %c0_113 = arith.constant 0 : index
      %113 = tpu.strided_load %arg14[%c13_112, %c0_113] {strides = array<i32: 2, 1>} : memref<80x128xf32, #tpu.memory_space<vmem>>, vector<5x128xf32>
      %c14_114 = arith.constant 14 : index
      %c0_115 = arith.constant 0 : index
      %114 = tpu.strided_load %arg14[%c14_114, %c0_115] {strides = array<i32: 2, 1>} : memref<80x128xf32, #tpu.memory_space<vmem>>, vector<5x128xf32>
      %115 = arith.maximumf %111, %112 : vector<5x128xf32>
      %116 = arith.maximumf %113, %114 : vector<5x128xf32>
      %117 = arith.maximumf %115, %116 : vector<5x128xf32>
      %c1_i32_116 = arith.constant 1 : i32
      %118 = arith.addi %70, %c1_i32_116 : i32
      %119 = arith.index_cast %118 : i32 to index
      %c15_117 = arith.constant 15 : index
      %c0_118 = arith.constant 0 : index
      %120 = vector.load %arg12[%119, %c15_117, %c0_118] : memref<18x25x128xf32, #tpu.memory_space<vmem>>, vector<1x5x128xf32>
      %121 = vector.shape_cast %120 : vector<1x5x128xf32> to vector<5x128xf32>
      %122 = vector.shape_cast %117 : vector<5x128xf32> to vector<1x5x128xf32>
      tpu.vector_store %arg12[%119, %c15_117, %c0_118], %122 {strides = array<i32>} : memref<18x25x128xf32, #tpu.memory_space<vmem>>, vector<1x5x128xf32>,
      %c26_119 = arith.constant 26 : index
      %c0_120 = arith.constant 0 : index
      %123 = tpu.strided_load %arg14[%c26_119, %c0_120] {strides = array<i32: 2, 1>} : memref<80x128xf32, #tpu.memory_space<vmem>>, vector<5x128xf32>
      %c27_121 = arith.constant 27 : index
      %c0_122 = arith.constant 0 : index
      %124 = tpu.strided_load %arg14[%c27_121, %c0_122] {strides = array<i32: 2, 1>} : memref<80x128xf32, #tpu.memory_space<vmem>>, vector<5x128xf32>
      %c39_123 = arith.constant 39 : index
      %c0_124 = arith.constant 0 : index
      %125 = tpu.strided_load %arg14[%c39_123, %c0_124] {strides = array<i32: 2, 1>} : memref<80x128xf32, #tpu.memory_space<vmem>>, vector<5x128xf32>
      %c40_125 = arith.constant 40 : index
      %c0_126 = arith.constant 0 : index
      %126 = tpu.strided_load %arg14[%c40_125, %c0_126] {strides = array<i32: 2, 1>} : memref<80x128xf32, #tpu.memory_space<vmem>>, vector<5x128xf32>
      %127 = arith.maximumf %123, %124 : vector<5x128xf32>
      %128 = arith.maximumf %125, %126 : vector<5x128xf32>
      %129 = arith.maximumf %127, %128 : vector<5x128xf32>
      %c1_i32_127 = arith.constant 1 : i32
      %130 = arith.addi %70, %c1_i32_127 : i32
      %131 = arith.index_cast %130 : i32 to index
      %c20_128 = arith.constant 20 : index
      %c0_129 = arith.constant 0 : index
      %132 = vector.load %arg12[%131, %c20_128, %c0_129] : memref<18x25x128xf32, #tpu.memory_space<vmem>>, vector<1x5x128xf32>
      %133 = vector.shape_cast %132 : vector<1x5x128xf32> to vector<5x128xf32>
      %134 = vector.shape_cast %129 : vector<5x128xf32> to vector<1x5x128xf32>
      tpu.vector_store %arg12[%131, %c20_128, %c0_129], %134 {strides = array<i32>} : memref<18x25x128xf32, #tpu.memory_space<vmem>>, vector<1x5x128xf32>,
    }
    %c9_i32_10 = arith.constant 9 : i32
    %c0_i32_11 = arith.constant 0 : i32
    %c9_i32_12 = arith.constant 9 : i32
    %4 = arith.addi %c0_i32_11, %c9_i32_12 : i32
    %c1_i32_13 = arith.constant 1 : i32
    scf.for %arg15 = %c0_i32_11 to %4 step %c1_i32_13  : i32 {
      %c1_i32_75 = arith.constant 1 : i32
      %68 = arith.muli %arg15, %c1_i32_75 : i32
      %c0_i32_76 = arith.constant 0 : i32
      %69 = arith.addi %c0_i32_76, %68 : i32
      %c3_i32 = arith.constant 3 : i32
      %70 = arith.muli %69, %c3_i32 : i32
      %c0_i32_77 = arith.constant 0 : i32
      %71 = arith.addi %70, %c0_i32_77 : i32
      %72 = arith.index_cast %71 : i32 to index
      %73 = memref.load %arg7[%72] : memref<27xf32, #tpu.memory_space<smem>>
      %74 = vector.broadcast %73 : f32 to vector<7x128xf32>
      %c1_i32_78 = arith.constant 1 : i32
      %75 = arith.addi %70, %c1_i32_78 : i32
      %76 = arith.index_cast %75 : i32 to index
      %77 = memref.load %arg7[%76] : memref<27xf32, #tpu.memory_space<smem>>
      %78 = vector.broadcast %77 : f32 to vector<7x128xf32>
      %c2_i32 = arith.constant 2 : i32
      %79 = arith.addi %70, %c2_i32 : i32
      %80 = arith.index_cast %79 : i32 to index
      %81 = memref.load %arg7[%80] : memref<27xf32, #tpu.memory_space<smem>>
      %82 = vector.broadcast %81 : f32 to vector<7x128xf32>
      %c0_i32_79 = arith.constant 0 : i32
      %c18_i32 = arith.constant 18 : i32
      %83 = arith.addi %c0_i32_79, %c18_i32 : i32
      %c1_i32_80 = arith.constant 1 : i32
      %84:3 = scf.for %arg16 = %c0_i32_79 to %83 step %c1_i32_80 iter_args(%arg17 = %74, %arg18 = %78, %arg19 = %82) -> (vector<7x128xf32>, vector<7x128xf32>, vector<7x128xf32>)  : i32 {
        %130 = arith.index_cast %arg16 : i32 to index
        %c0_124 = arith.constant 0 : index
        %c0_125 = arith.constant 0 : index
        %131 = vector.load %arg12[%130, %c0_124, %c0_125] : memref<18x25x128xf32, #tpu.memory_space<vmem>>, vector<1x7x128xf32>
        %132 = vector.shape_cast %131 : vector<1x7x128xf32> to vector<7x128xf32>
        %c27_i32 = arith.constant 27 : i32
        %133 = arith.muli %arg16, %c27_i32 : i32
        %c0_i32_126 = arith.constant 0 : i32
        %134 = arith.addi %c0_i32_126, %133 : i32
        %135 = arith.addi %134, %70 : i32
        %c0_i32_127 = arith.constant 0 : i32
        %136 = arith.addi %135, %c0_i32_127 : i32
        %137 = arith.index_cast %136 : i32 to index
        %138 = memref.load %arg6[%137] : memref<4374xf32, #tpu.memory_space<smem>>
        %139 = vector.broadcast %138 : f32 to vector<7x128xf32>
        %140 = arith.mulf %132, %139 : vector<7x128xf32>
        %141 = arith.addf %arg17, %140 : vector<7x128xf32>
        %c1_i32_128 = arith.constant 1 : i32
        %142 = arith.addi %135, %c1_i32_128 : i32
        %143 = arith.index_cast %142 : i32 to index
        %144 = memref.load %arg6[%143] : memref<4374xf32, #tpu.memory_space<smem>>
        %145 = vector.broadcast %144 : f32 to vector<7x128xf32>
        %146 = arith.mulf %132, %145 : vector<7x128xf32>
        %147 = arith.addf %arg18, %146 : vector<7x128xf32>
        %c2_i32_129 = arith.constant 2 : i32
        %148 = arith.addi %135, %c2_i32_129 : i32
        %149 = arith.index_cast %148 : i32 to index
        %150 = memref.load %arg6[%149] : memref<4374xf32, #tpu.memory_space<smem>>
        %151 = vector.broadcast %150 : f32 to vector<7x128xf32>
        %152 = arith.mulf %132, %151 : vector<7x128xf32>
        %153 = arith.addf %arg19, %152 : vector<7x128xf32>
        %154 = arith.index_cast %arg16 : i32 to index
        %c1_130 = arith.constant 1 : index
        %c0_131 = arith.constant 0 : index
        %155 = vector.load %arg12[%154, %c1_130, %c0_131] : memref<18x25x128xf32, #tpu.memory_space<vmem>>, vector<1x7x128xf32>
        %156 = vector.shape_cast %155 : vector<1x7x128xf32> to vector<7x128xf32>
        %c27_i32_132 = arith.constant 27 : i32
        %157 = arith.muli %arg16, %c27_i32_132 : i32
        %c486_i32 = arith.constant 486 : i32
        %158 = arith.addi %c486_i32, %157 : i32
        %159 = arith.addi %158, %70 : i32
        %c0_i32_133 = arith.constant 0 : i32
        %160 = arith.addi %159, %c0_i32_133 : i32
        %161 = arith.index_cast %160 : i32 to index
        %162 = memref.load %arg6[%161] : memref<4374xf32, #tpu.memory_space<smem>>
        %163 = vector.broadcast %162 : f32 to vector<7x128xf32>
        %164 = arith.mulf %156, %163 : vector<7x128xf32>
        %165 = arith.addf %141, %164 : vector<7x128xf32>
        %c1_i32_134 = arith.constant 1 : i32
        %166 = arith.addi %159, %c1_i32_134 : i32
        %167 = arith.index_cast %166 : i32 to index
        %168 = memref.load %arg6[%167] : memref<4374xf32, #tpu.memory_space<smem>>
        %169 = vector.broadcast %168 : f32 to vector<7x128xf32>
        %170 = arith.mulf %156, %169 : vector<7x128xf32>
        %171 = arith.addf %147, %170 : vector<7x128xf32>
        %c2_i32_135 = arith.constant 2 : i32
        %172 = arith.addi %159, %c2_i32_135 : i32
        %173 = arith.index_cast %172 : i32 to index
        %174 = memref.load %arg6[%173] : memref<4374xf32, #tpu.memory_space<smem>>
        %175 = vector.broadcast %174 : f32 to vector<7x128xf32>
        %176 = arith.mulf %156, %175 : vector<7x128xf32>
        %177 = arith.addf %153, %176 : vector<7x128xf32>
        %178 = arith.index_cast %arg16 : i32 to index
        %c2_136 = arith.constant 2 : index
        %c0_137 = arith.constant 0 : index
        %179 = vector.load %arg12[%178, %c2_136, %c0_137] : memref<18x25x128xf32, #tpu.memory_space<vmem>>, vector<1x7x128xf32>
        %180 = vector.shape_cast %179 : vector<1x7x128xf32> to vector<7x128xf32>
        %c27_i32_138 = arith.constant 27 : i32
        %181 = arith.muli %arg16, %c27_i32_138 : i32
        %c972_i32 = arith.constant 972 : i32
        %182 = arith.addi %c972_i32, %181 : i32
        %183 = arith.addi %182, %70 : i32
        %c0_i32_139 = arith.constant 0 : i32
        %184 = arith.addi %183, %c0_i32_139 : i32
        %185 = arith.index_cast %184 : i32 to index
        %186 = memref.load %arg6[%185] : memref<4374xf32, #tpu.memory_space<smem>>
        %187 = vector.broadcast %186 : f32 to vector<7x128xf32>
        %188 = arith.mulf %180, %187 : vector<7x128xf32>
        %189 = arith.addf %165, %188 : vector<7x128xf32>
        %c1_i32_140 = arith.constant 1 : i32
        %190 = arith.addi %183, %c1_i32_140 : i32
        %191 = arith.index_cast %190 : i32 to index
        %192 = memref.load %arg6[%191] : memref<4374xf32, #tpu.memory_space<smem>>
        %193 = vector.broadcast %192 : f32 to vector<7x128xf32>
        %194 = arith.mulf %180, %193 : vector<7x128xf32>
        %195 = arith.addf %171, %194 : vector<7x128xf32>
        %c2_i32_141 = arith.constant 2 : i32
        %196 = arith.addi %183, %c2_i32_141 : i32
        %197 = arith.index_cast %196 : i32 to index
        %198 = memref.load %arg6[%197] : memref<4374xf32, #tpu.memory_space<smem>>
        %199 = vector.broadcast %198 : f32 to vector<7x128xf32>
        %200 = arith.mulf %180, %199 : vector<7x128xf32>
        %201 = arith.addf %177, %200 : vector<7x128xf32>
        %202 = arith.index_cast %arg16 : i32 to index
        %c5_142 = arith.constant 5 : index
        %c0_143 = arith.constant 0 : index
        %203 = vector.load %arg12[%202, %c5_142, %c0_143] : memref<18x25x128xf32, #tpu.memory_space<vmem>>, vector<1x7x128xf32>
        %204 = vector.shape_cast %203 : vector<1x7x128xf32> to vector<7x128xf32>
        %c27_i32_144 = arith.constant 27 : i32
        %205 = arith.muli %arg16, %c27_i32_144 : i32
        %c1458_i32 = arith.constant 1458 : i32
        %206 = arith.addi %c1458_i32, %205 : i32
        %207 = arith.addi %206, %70 : i32
        %c0_i32_145 = arith.constant 0 : i32
        %208 = arith.addi %207, %c0_i32_145 : i32
        %209 = arith.index_cast %208 : i32 to index
        %210 = memref.load %arg6[%209] : memref<4374xf32, #tpu.memory_space<smem>>
        %211 = vector.broadcast %210 : f32 to vector<7x128xf32>
        %212 = arith.mulf %204, %211 : vector<7x128xf32>
        %213 = arith.addf %189, %212 : vector<7x128xf32>
        %c1_i32_146 = arith.constant 1 : i32
        %214 = arith.addi %207, %c1_i32_146 : i32
        %215 = arith.index_cast %214 : i32 to index
        %216 = memref.load %arg6[%215] : memref<4374xf32, #tpu.memory_space<smem>>
        %217 = vector.broadcast %216 : f32 to vector<7x128xf32>
        %218 = arith.mulf %204, %217 : vector<7x128xf32>
        %219 = arith.addf %195, %218 : vector<7x128xf32>
        %c2_i32_147 = arith.constant 2 : i32
        %220 = arith.addi %207, %c2_i32_147 : i32
        %221 = arith.index_cast %220 : i32 to index
        %222 = memref.load %arg6[%221] : memref<4374xf32, #tpu.memory_space<smem>>
        %223 = vector.broadcast %222 : f32 to vector<7x128xf32>
        %224 = arith.mulf %204, %223 : vector<7x128xf32>
        %225 = arith.addf %201, %224 : vector<7x128xf32>
        %226 = arith.index_cast %arg16 : i32 to index
        %c6_148 = arith.constant 6 : index
        %c0_149 = arith.constant 0 : index
        %227 = vector.load %arg12[%226, %c6_148, %c0_149] : memref<18x25x128xf32, #tpu.memory_space<vmem>>, vector<1x7x128xf32>
        %228 = vector.shape_cast %227 : vector<1x7x128xf32> to vector<7x128xf32>
        %c27_i32_150 = arith.constant 27 : i32
        %229 = arith.muli %arg16, %c27_i32_150 : i32
        %c1944_i32 = arith.constant 1944 : i32
        %230 = arith.addi %c1944_i32, %229 : i32
        %231 = arith.addi %230, %70 : i32
        %c0_i32_151 = arith.constant 0 : i32
        %232 = arith.addi %231, %c0_i32_151 : i32
        %233 = arith.index_cast %232 : i32 to index
        %234 = memref.load %arg6[%233] : memref<4374xf32, #tpu.memory_space<smem>>
        %235 = vector.broadcast %234 : f32 to vector<7x128xf32>
        %236 = arith.mulf %228, %235 : vector<7x128xf32>
        %237 = arith.addf %213, %236 : vector<7x128xf32>
        %c1_i32_152 = arith.constant 1 : i32
        %238 = arith.addi %231, %c1_i32_152 : i32
        %239 = arith.index_cast %238 : i32 to index
        %240 = memref.load %arg6[%239] : memref<4374xf32, #tpu.memory_space<smem>>
        %241 = vector.broadcast %240 : f32 to vector<7x128xf32>
        %242 = arith.mulf %228, %241 : vector<7x128xf32>
        %243 = arith.addf %219, %242 : vector<7x128xf32>
        %c2_i32_153 = arith.constant 2 : i32
        %244 = arith.addi %231, %c2_i32_153 : i32
        %245 = arith.index_cast %244 : i32 to index
        %246 = memref.load %arg6[%245] : memref<4374xf32, #tpu.memory_space<smem>>
        %247 = vector.broadcast %246 : f32 to vector<7x128xf32>
        %248 = arith.mulf %228, %247 : vector<7x128xf32>
        %249 = arith.addf %225, %248 : vector<7x128xf32>
        %250 = arith.index_cast %arg16 : i32 to index
        %c7_154 = arith.constant 7 : index
        %c0_155 = arith.constant 0 : index
        %251 = vector.load %arg12[%250, %c7_154, %c0_155] : memref<18x25x128xf32, #tpu.memory_space<vmem>>, vector<1x7x128xf32>
        %252 = vector.shape_cast %251 : vector<1x7x128xf32> to vector<7x128xf32>
        %c27_i32_156 = arith.constant 27 : i32
        %253 = arith.muli %arg16, %c27_i32_156 : i32
        %c2430_i32 = arith.constant 2430 : i32
        %254 = arith.addi %c2430_i32, %253 : i32
        %255 = arith.addi %254, %70 : i32
        %c0_i32_157 = arith.constant 0 : i32
        %256 = arith.addi %255, %c0_i32_157 : i32
        %257 = arith.index_cast %256 : i32 to index
        %258 = memref.load %arg6[%257] : memref<4374xf32, #tpu.memory_space<smem>>
        %259 = vector.broadcast %258 : f32 to vector<7x128xf32>
        %260 = arith.mulf %252, %259 : vector<7x128xf32>
        %261 = arith.addf %237, %260 : vector<7x128xf32>
        %c1_i32_158 = arith.constant 1 : i32
        %262 = arith.addi %255, %c1_i32_158 : i32
        %263 = arith.index_cast %262 : i32 to index
        %264 = memref.load %arg6[%263] : memref<4374xf32, #tpu.memory_space<smem>>
        %265 = vector.broadcast %264 : f32 to vector<7x128xf32>
        %266 = arith.mulf %252, %265 : vector<7x128xf32>
        %267 = arith.addf %243, %266 : vector<7x128xf32>
        %c2_i32_159 = arith.constant 2 : i32
        %268 = arith.addi %255, %c2_i32_159 : i32
        %269 = arith.index_cast %268 : i32 to index
        %270 = memref.load %arg6[%269] : memref<4374xf32, #tpu.memory_space<smem>>
        %271 = vector.broadcast %270 : f32 to vector<7x128xf32>
        %272 = arith.mulf %252, %271 : vector<7x128xf32>
        %273 = arith.addf %249, %272 : vector<7x128xf32>
        %274 = arith.index_cast %arg16 : i32 to index
        %c10_160 = arith.constant 10 : index
        %c0_161 = arith.constant 0 : index
        %275 = vector.load %arg12[%274, %c10_160, %c0_161] : memref<18x25x128xf32, #tpu.memory_space<vmem>>, vector<1x7x128xf32>
        %276 = vector.shape_cast %275 : vector<1x7x128xf32> to vector<7x128xf32>
        %c27_i32_162 = arith.constant 27 : i32
        %277 = arith.muli %arg16, %c27_i32_162 : i32
        %c2916_i32 = arith.constant 2916 : i32
        %278 = arith.addi %c2916_i32, %277 : i32
        %279 = arith.addi %278, %70 : i32
        %c0_i32_163 = arith.constant 0 : i32
        %280 = arith.addi %279, %c0_i32_163 : i32
        %281 = arith.index_cast %280 : i32 to index
        %282 = memref.load %arg6[%281] : memref<4374xf32, #tpu.memory_space<smem>>
        %283 = vector.broadcast %282 : f32 to vector<7x128xf32>
        %284 = arith.mulf %276, %283 : vector<7x128xf32>
        %285 = arith.addf %261, %284 : vector<7x128xf32>
        %c1_i32_164 = arith.constant 1 : i32
        %286 = arith.addi %279, %c1_i32_164 : i32
        %287 = arith.index_cast %286 : i32 to index
        %288 = memref.load %arg6[%287] : memref<4374xf32, #tpu.memory_space<smem>>
        %289 = vector.broadcast %288 : f32 to vector<7x128xf32>
        %290 = arith.mulf %276, %289 : vector<7x128xf32>
        %291 = arith.addf %267, %290 : vector<7x128xf32>
        %c2_i32_165 = arith.constant 2 : i32
        %292 = arith.addi %279, %c2_i32_165 : i32
        %293 = arith.index_cast %292 : i32 to index
        %294 = memref.load %arg6[%293] : memref<4374xf32, #tpu.memory_space<smem>>
        %295 = vector.broadcast %294 : f32 to vector<7x128xf32>
        %296 = arith.mulf %276, %295 : vector<7x128xf32>
        %297 = arith.addf %273, %296 : vector<7x128xf32>
        %298 = arith.index_cast %arg16 : i32 to index
        %c11_166 = arith.constant 11 : index
        %c0_167 = arith.constant 0 : index
        %299 = vector.load %arg12[%298, %c11_166, %c0_167] : memref<18x25x128xf32, #tpu.memory_space<vmem>>, vector<1x7x128xf32>
        %300 = vector.shape_cast %299 : vector<1x7x128xf32> to vector<7x128xf32>
        %c27_i32_168 = arith.constant 27 : i32
        %301 = arith.muli %arg16, %c27_i32_168 : i32
        %c3402_i32 = arith.constant 3402 : i32
        %302 = arith.addi %c3402_i32, %301 : i32
        %303 = arith.addi %302, %70 : i32
        %c0_i32_169 = arith.constant 0 : i32
        %304 = arith.addi %303, %c0_i32_169 : i32
        %305 = arith.index_cast %304 : i32 to index
        %306 = memref.load %arg6[%305] : memref<4374xf32, #tpu.memory_space<smem>>
        %307 = vector.broadcast %306 : f32 to vector<7x128xf32>
        %308 = arith.mulf %300, %307 : vector<7x128xf32>
        %309 = arith.addf %285, %308 : vector<7x128xf32>
        %c1_i32_170 = arith.constant 1 : i32
        %310 = arith.addi %303, %c1_i32_170 : i32
        %311 = arith.index_cast %310 : i32 to index
        %312 = memref.load %arg6[%311] : memref<4374xf32, #tpu.memory_space<smem>>
        %313 = vector.broadcast %312 : f32 to vector<7x128xf32>
        %314 = arith.mulf %300, %313 : vector<7x128xf32>
        %315 = arith.addf %291, %314 : vector<7x128xf32>
        %c2_i32_171 = arith.constant 2 : i32
        %316 = arith.addi %303, %c2_i32_171 : i32
        %317 = arith.index_cast %316 : i32 to index
        %318 = memref.load %arg6[%317] : memref<4374xf32, #tpu.memory_space<smem>>
        %319 = vector.broadcast %318 : f32 to vector<7x128xf32>
        %320 = arith.mulf %300, %319 : vector<7x128xf32>
        %321 = arith.addf %297, %320 : vector<7x128xf32>
        %322 = arith.index_cast %arg16 : i32 to index
        %c12_172 = arith.constant 12 : index
        %c0_173 = arith.constant 0 : index
        %323 = vector.load %arg12[%322, %c12_172, %c0_173] : memref<18x25x128xf32, #tpu.memory_space<vmem>>, vector<1x7x128xf32>
        %324 = vector.shape_cast %323 : vector<1x7x128xf32> to vector<7x128xf32>
        %c27_i32_174 = arith.constant 27 : i32
        %325 = arith.muli %arg16, %c27_i32_174 : i32
        %c3888_i32 = arith.constant 3888 : i32
        %326 = arith.addi %c3888_i32, %325 : i32
        %327 = arith.addi %326, %70 : i32
        %c0_i32_175 = arith.constant 0 : i32
        %328 = arith.addi %327, %c0_i32_175 : i32
        %329 = arith.index_cast %328 : i32 to index
        %330 = memref.load %arg6[%329] : memref<4374xf32, #tpu.memory_space<smem>>
        %331 = vector.broadcast %330 : f32 to vector<7x128xf32>
        %332 = arith.mulf %324, %331 : vector<7x128xf32>
        %333 = arith.addf %309, %332 : vector<7x128xf32>
        %c1_i32_176 = arith.constant 1 : i32
        %334 = arith.addi %327, %c1_i32_176 : i32
        %335 = arith.index_cast %334 : i32 to index
        %336 = memref.load %arg6[%335] : memref<4374xf32, #tpu.memory_space<smem>>
        %337 = vector.broadcast %336 : f32 to vector<7x128xf32>
        %338 = arith.mulf %324, %337 : vector<7x128xf32>
        %339 = arith.addf %315, %338 : vector<7x128xf32>
        %c2_i32_177 = arith.constant 2 : i32
        %340 = arith.addi %327, %c2_i32_177 : i32
        %341 = arith.index_cast %340 : i32 to index
        %342 = memref.load %arg6[%341] : memref<4374xf32, #tpu.memory_space<smem>>
        %343 = vector.broadcast %342 : f32 to vector<7x128xf32>
        %344 = arith.mulf %324, %343 : vector<7x128xf32>
        %345 = arith.addf %321, %344 : vector<7x128xf32>
        scf.yield %333, %339, %345 : vector<7x128xf32>, vector<7x128xf32>, vector<7x128xf32>
      }
      %c18_i32_81 = arith.constant 18 : i32
      %cst_82 = arith.constant 0.000000e+00 : f32
      %85 = vector.broadcast %cst_82 : f32 to vector<7x128xf32>
      %86 = arith.maximumf %84#0, %85 : vector<7x128xf32>
      %c0_83 = arith.constant 0 : index
      %c0_84 = arith.constant 0 : index
      %87 = vector.load %arg14[%c0_83, %c0_84] : memref<80x128xf32, #tpu.memory_space<vmem>>, vector<7x128xf32>
      tpu.vector_store %arg14[%c0_83, %c0_84], %86 {strides = array<i32>} : memref<80x128xf32, #tpu.memory_space<vmem>>, vector<7x128xf32>,
      %c0_85 = arith.constant 0 : index
      %c0_86 = arith.constant 0 : index
      %88 = vector.load %arg14[%c0_85, %c0_86] : memref<80x128xf32, #tpu.memory_space<vmem>>, vector<1x128xf32>
      %c1_87 = arith.constant 1 : index
      %c0_88 = arith.constant 0 : index
      %89 = vector.load %arg14[%c1_87, %c0_88] : memref<80x128xf32, #tpu.memory_space<vmem>>, vector<1x128xf32>
      %c5_89 = arith.constant 5 : index
      %c0_90 = arith.constant 0 : index
      %90 = vector.load %arg14[%c5_89, %c0_90] : memref<80x128xf32, #tpu.memory_space<vmem>>, vector<1x128xf32>
      %c6_91 = arith.constant 6 : index
      %c0_92 = arith.constant 0 : index
      %91 = vector.load %arg14[%c6_91, %c0_92] : memref<80x128xf32, #tpu.memory_space<vmem>>, vector<1x128xf32>
      %92 = arith.maximumf %88, %89 : vector<1x128xf32>
      %93 = arith.maximumf %90, %91 : vector<1x128xf32>
      %94 = arith.maximumf %92, %93 : vector<1x128xf32>
      %c0_i32_93 = arith.constant 0 : i32
      %95 = arith.addi %70, %c0_i32_93 : i32
      %96 = arith.index_cast %95 : i32 to index
      %c0_94 = arith.constant 0 : index
      %c0_95 = arith.constant 0 : index
      %97 = vector.load %arg13[%96, %c0_94, %c0_95] : memref<27x1x128xf32, #tpu.memory_space<vmem>>, vector<1x1x128xf32>
      %98 = vector.shape_cast %97 : vector<1x1x128xf32> to vector<1x128xf32>
      %99 = vector.shape_cast %94 : vector<1x128xf32> to vector<1x1x128xf32>
      tpu.vector_store %arg13[%96, %c0_94, %c0_95], %99 {strides = array<i32>} : memref<27x1x128xf32, #tpu.memory_space<vmem>>, vector<1x1x128xf32>,
      %cst_96 = arith.constant 0.000000e+00 : f32
      %100 = vector.broadcast %cst_96 : f32 to vector<7x128xf32>
      %101 = arith.maximumf %84#1, %100 : vector<7x128xf32>
      %c0_97 = arith.constant 0 : index
      %c0_98 = arith.constant 0 : index
      %102 = vector.load %arg14[%c0_97, %c0_98] : memref<80x128xf32, #tpu.memory_space<vmem>>, vector<7x128xf32>
      tpu.vector_store %arg14[%c0_97, %c0_98], %101 {strides = array<i32>} : memref<80x128xf32, #tpu.memory_space<vmem>>, vector<7x128xf32>,
      %c0_99 = arith.constant 0 : index
      %c0_100 = arith.constant 0 : index
      %103 = vector.load %arg14[%c0_99, %c0_100] : memref<80x128xf32, #tpu.memory_space<vmem>>, vector<1x128xf32>
      %c1_101 = arith.constant 1 : index
      %c0_102 = arith.constant 0 : index
      %104 = vector.load %arg14[%c1_101, %c0_102] : memref<80x128xf32, #tpu.memory_space<vmem>>, vector<1x128xf32>
      %c5_103 = arith.constant 5 : index
      %c0_104 = arith.constant 0 : index
      %105 = vector.load %arg14[%c5_103, %c0_104] : memref<80x128xf32, #tpu.memory_space<vmem>>, vector<1x128xf32>
      %c6_105 = arith.constant 6 : index
      %c0_106 = arith.constant 0 : index
      %106 = vector.load %arg14[%c6_105, %c0_106] : memref<80x128xf32, #tpu.memory_space<vmem>>, vector<1x128xf32>
      %107 = arith.maximumf %103, %104 : vector<1x128xf32>
      %108 = arith.maximumf %105, %106 : vector<1x128xf32>
      %109 = arith.maximumf %107, %108 : vector<1x128xf32>
      %c1_i32_107 = arith.constant 1 : i32
      %110 = arith.addi %70, %c1_i32_107 : i32
      %111 = arith.index_cast %110 : i32 to index
      %c0_108 = arith.constant 0 : index
      %c0_109 = arith.constant 0 : index
      %112 = vector.load %arg13[%111, %c0_108, %c0_109] : memref<27x1x128xf32, #tpu.memory_space<vmem>>, vector<1x1x128xf32>
      %113 = vector.shape_cast %112 : vector<1x1x128xf32> to vector<1x128xf32>
      %114 = vector.shape_cast %109 : vector<1x128xf32> to vector<1x1x128xf32>
      tpu.vector_store %arg13[%111, %c0_108, %c0_109], %114 {strides = array<i32>} : memref<27x1x128xf32, #tpu.memory_space<vmem>>, vector<1x1x128xf32>,
      %cst_110 = arith.constant 0.000000e+00 : f32
      %115 = vector.broadcast %cst_110 : f32 to vector<7x128xf32>
      %116 = arith.maximumf %84#2, %115 : vector<7x128xf32>
      %c0_111 = arith.constant 0 : index
      %c0_112 = arith.constant 0 : index
      %117 = vector.load %arg14[%c0_111, %c0_112] : memref<80x128xf32, #tpu.memory_space<vmem>>, vector<7x128xf32>
      tpu.vector_store %arg14[%c0_111, %c0_112], %116 {strides = array<i32>} : memref<80x128xf32, #tpu.memory_space<vmem>>, vector<7x128xf32>,
      %c0_113 = arith.constant 0 : index
      %c0_114 = arith.constant 0 : index
      %118 = vector.load %arg14[%c0_113, %c0_114] : memref<80x128xf32, #tpu.memory_space<vmem>>, vector<1x128xf32>
      %c1_115 = arith.constant 1 : index
      %c0_116 = arith.constant 0 : index
      %119 = vector.load %arg14[%c1_115, %c0_116] : memref<80x128xf32, #tpu.memory_space<vmem>>, vector<1x128xf32>
      %c5_117 = arith.constant 5 : index
      %c0_118 = arith.constant 0 : index
      %120 = vector.load %arg14[%c5_117, %c0_118] : memref<80x128xf32, #tpu.memory_space<vmem>>, vector<1x128xf32>
      %c6_119 = arith.constant 6 : index
      %c0_120 = arith.constant 0 : index
      %121 = vector.load %arg14[%c6_119, %c0_120] : memref<80x128xf32, #tpu.memory_space<vmem>>, vector<1x128xf32>
      %122 = arith.maximumf %118, %119 : vector<1x128xf32>
      %123 = arith.maximumf %120, %121 : vector<1x128xf32>
      %124 = arith.maximumf %122, %123 : vector<1x128xf32>
      %c2_i32_121 = arith.constant 2 : i32
      %125 = arith.addi %70, %c2_i32_121 : i32
      %126 = arith.index_cast %125 : i32 to index
      %c0_122 = arith.constant 0 : index
      %c0_123 = arith.constant 0 : index
      %127 = vector.load %arg13[%126, %c0_122, %c0_123] : memref<27x1x128xf32, #tpu.memory_space<vmem>>, vector<1x1x128xf32>
      %128 = vector.shape_cast %127 : vector<1x1x128xf32> to vector<1x128xf32>
      %129 = vector.shape_cast %124 : vector<1x128xf32> to vector<1x1x128xf32>
      tpu.vector_store %arg13[%126, %c0_122, %c0_123], %129 {strides = array<i32>} : memref<27x1x128xf32, #tpu.memory_space<vmem>>, vector<1x1x128xf32>,
    }
    %c9_i32_14 = arith.constant 9 : i32
    %c0 = arith.constant 0 : index
    %c0_15 = arith.constant 0 : index
    %c0_16 = arith.constant 0 : index
    %5 = vector.load %arg13[%c0, %c0_15, %c0_16] : memref<27x1x128xf32, #tpu.memory_space<vmem>>, vector<1x1x128xf32>
    %6 = vector.shape_cast %5 : vector<1x1x128xf32> to vector<1x128xf32>
    %c1 = arith.constant 1 : index
    %c0_17 = arith.constant 0 : index
    %c0_18 = arith.constant 0 : index
    %7 = vector.load %arg13[%c1, %c0_17, %c0_18] : memref<27x1x128xf32, #tpu.memory_space<vmem>>, vector<1x1x128xf32>
    %8 = vector.shape_cast %7 : vector<1x1x128xf32> to vector<1x128xf32>
    %c2 = arith.constant 2 : index
    %c0_19 = arith.constant 0 : index
    %c0_20 = arith.constant 0 : index
    %9 = vector.load %arg13[%c2, %c0_19, %c0_20] : memref<27x1x128xf32, #tpu.memory_space<vmem>>, vector<1x1x128xf32>
    %10 = vector.shape_cast %9 : vector<1x1x128xf32> to vector<1x128xf32>
    %c3 = arith.constant 3 : index
    %c0_21 = arith.constant 0 : index
    %c0_22 = arith.constant 0 : index
    %11 = vector.load %arg13[%c3, %c0_21, %c0_22] : memref<27x1x128xf32, #tpu.memory_space<vmem>>, vector<1x1x128xf32>
    %12 = vector.shape_cast %11 : vector<1x1x128xf32> to vector<1x128xf32>
    %c4 = arith.constant 4 : index
    %c0_23 = arith.constant 0 : index
    %c0_24 = arith.constant 0 : index
    %13 = vector.load %arg13[%c4, %c0_23, %c0_24] : memref<27x1x128xf32, #tpu.memory_space<vmem>>, vector<1x1x128xf32>
    %14 = vector.shape_cast %13 : vector<1x1x128xf32> to vector<1x128xf32>
    %c5 = arith.constant 5 : index
    %c0_25 = arith.constant 0 : index
    %c0_26 = arith.constant 0 : index
    %15 = vector.load %arg13[%c5, %c0_25, %c0_26] : memref<27x1x128xf32, #tpu.memory_space<vmem>>, vector<1x1x128xf32>
    %16 = vector.shape_cast %15 : vector<1x1x128xf32> to vector<1x128xf32>
    %c6 = arith.constant 6 : index
    %c0_27 = arith.constant 0 : index
    %c0_28 = arith.constant 0 : index
    %17 = vector.load %arg13[%c6, %c0_27, %c0_28] : memref<27x1x128xf32, #tpu.memory_space<vmem>>, vector<1x1x128xf32>
    %18 = vector.shape_cast %17 : vector<1x1x128xf32> to vector<1x128xf32>
    %c7 = arith.constant 7 : index
    %c0_29 = arith.constant 0 : index
    %c0_30 = arith.constant 0 : index
    %19 = vector.load %arg13[%c7, %c0_29, %c0_30] : memref<27x1x128xf32, #tpu.memory_space<vmem>>, vector<1x1x128xf32>
    %20 = vector.shape_cast %19 : vector<1x1x128xf32> to vector<1x128xf32>
    %c8 = arith.constant 8 : index
    %c0_31 = arith.constant 0 : index
    %c0_32 = arith.constant 0 : index
    %21 = vector.load %arg13[%c8, %c0_31, %c0_32] : memref<27x1x128xf32, #tpu.memory_space<vmem>>, vector<1x1x128xf32>
    %22 = vector.shape_cast %21 : vector<1x1x128xf32> to vector<1x128xf32>
    %c9 = arith.constant 9 : index
    %c0_33 = arith.constant 0 : index
    %c0_34 = arith.constant 0 : index
    %23 = vector.load %arg13[%c9, %c0_33, %c0_34] : memref<27x1x128xf32, #tpu.memory_space<vmem>>, vector<1x1x128xf32>
    %24 = vector.shape_cast %23 : vector<1x1x128xf32> to vector<1x128xf32>
    %c10 = arith.constant 10 : index
    %c0_35 = arith.constant 0 : index
    %c0_36 = arith.constant 0 : index
    %25 = vector.load %arg13[%c10, %c0_35, %c0_36] : memref<27x1x128xf32, #tpu.memory_space<vmem>>, vector<1x1x128xf32>
    %26 = vector.shape_cast %25 : vector<1x1x128xf32> to vector<1x128xf32>
    %c11 = arith.constant 11 : index
    %c0_37 = arith.constant 0 : index
    %c0_38 = arith.constant 0 : index
    %27 = vector.load %arg13[%c11, %c0_37, %c0_38] : memref<27x1x128xf32, #tpu.memory_space<vmem>>, vector<1x1x128xf32>
    %28 = vector.shape_cast %27 : vector<1x1x128xf32> to vector<1x128xf32>
    %c12 = arith.constant 12 : index
    %c0_39 = arith.constant 0 : index
    %c0_40 = arith.constant 0 : index
    %29 = vector.load %arg13[%c12, %c0_39, %c0_40] : memref<27x1x128xf32, #tpu.memory_space<vmem>>, vector<1x1x128xf32>
    %30 = vector.shape_cast %29 : vector<1x1x128xf32> to vector<1x128xf32>
    %c13 = arith.constant 13 : index
    %c0_41 = arith.constant 0 : index
    %c0_42 = arith.constant 0 : index
    %31 = vector.load %arg13[%c13, %c0_41, %c0_42] : memref<27x1x128xf32, #tpu.memory_space<vmem>>, vector<1x1x128xf32>
    %32 = vector.shape_cast %31 : vector<1x1x128xf32> to vector<1x128xf32>
    %c14 = arith.constant 14 : index
    %c0_43 = arith.constant 0 : index
    %c0_44 = arith.constant 0 : index
    %33 = vector.load %arg13[%c14, %c0_43, %c0_44] : memref<27x1x128xf32, #tpu.memory_space<vmem>>, vector<1x1x128xf32>
    %34 = vector.shape_cast %33 : vector<1x1x128xf32> to vector<1x128xf32>
    %c15 = arith.constant 15 : index
    %c0_45 = arith.constant 0 : index
    %c0_46 = arith.constant 0 : index
    %35 = vector.load %arg13[%c15, %c0_45, %c0_46] : memref<27x1x128xf32, #tpu.memory_space<vmem>>, vector<1x1x128xf32>
    %36 = vector.shape_cast %35 : vector<1x1x128xf32> to vector<1x128xf32>
    %c16 = arith.constant 16 : index
    %c0_47 = arith.constant 0 : index
    %c0_48 = arith.constant 0 : index
    %37 = vector.load %arg13[%c16, %c0_47, %c0_48] : memref<27x1x128xf32, #tpu.memory_space<vmem>>, vector<1x1x128xf32>
    %38 = vector.shape_cast %37 : vector<1x1x128xf32> to vector<1x128xf32>
    %c17 = arith.constant 17 : index
    %c0_49 = arith.constant 0 : index
    %c0_50 = arith.constant 0 : index
    %39 = vector.load %arg13[%c17, %c0_49, %c0_50] : memref<27x1x128xf32, #tpu.memory_space<vmem>>, vector<1x1x128xf32>
    %40 = vector.shape_cast %39 : vector<1x1x128xf32> to vector<1x128xf32>
    %c18 = arith.constant 18 : index
    %c0_51 = arith.constant 0 : index
    %c0_52 = arith.constant 0 : index
    %41 = vector.load %arg13[%c18, %c0_51, %c0_52] : memref<27x1x128xf32, #tpu.memory_space<vmem>>, vector<1x1x128xf32>
    %42 = vector.shape_cast %41 : vector<1x1x128xf32> to vector<1x128xf32>
    %c19 = arith.constant 19 : index
    %c0_53 = arith.constant 0 : index
    %c0_54 = arith.constant 0 : index
    %43 = vector.load %arg13[%c19, %c0_53, %c0_54] : memref<27x1x128xf32, #tpu.memory_space<vmem>>, vector<1x1x128xf32>
    %44 = vector.shape_cast %43 : vector<1x1x128xf32> to vector<1x128xf32>
    %c20 = arith.constant 20 : index
    %c0_55 = arith.constant 0 : index
    %c0_56 = arith.constant 0 : index
    %45 = vector.load %arg13[%c20, %c0_55, %c0_56] : memref<27x1x128xf32, #tpu.memory_space<vmem>>, vector<1x1x128xf32>
    %46 = vector.shape_cast %45 : vector<1x1x128xf32> to vector<1x128xf32>
    %c21 = arith.constant 21 : index
    %c0_57 = arith.constant 0 : index
    %c0_58 = arith.constant 0 : index
    %47 = vector.load %arg13[%c21, %c0_57, %c0_58] : memref<27x1x128xf32, #tpu.memory_space<vmem>>, vector<1x1x128xf32>
    %48 = vector.shape_cast %47 : vector<1x1x128xf32> to vector<1x128xf32>
    %c22 = arith.constant 22 : index
    %c0_59 = arith.constant 0 : index
    %c0_60 = arith.constant 0 : index
    %49 = vector.load %arg13[%c22, %c0_59, %c0_60] : memref<27x1x128xf32, #tpu.memory_space<vmem>>, vector<1x1x128xf32>
    %50 = vector.shape_cast %49 : vector<1x1x128xf32> to vector<1x128xf32>
    %c23 = arith.constant 23 : index
    %c0_61 = arith.constant 0 : index
    %c0_62 = arith.constant 0 : index
    %51 = vector.load %arg13[%c23, %c0_61, %c0_62] : memref<27x1x128xf32, #tpu.memory_space<vmem>>, vector<1x1x128xf32>
    %52 = vector.shape_cast %51 : vector<1x1x128xf32> to vector<1x128xf32>
    %c24 = arith.constant 24 : index
    %c0_63 = arith.constant 0 : index
    %c0_64 = arith.constant 0 : index
    %53 = vector.load %arg13[%c24, %c0_63, %c0_64] : memref<27x1x128xf32, #tpu.memory_space<vmem>>, vector<1x1x128xf32>
    %54 = vector.shape_cast %53 : vector<1x1x128xf32> to vector<1x128xf32>
    %c25 = arith.constant 25 : index
    %c0_65 = arith.constant 0 : index
    %c0_66 = arith.constant 0 : index
    %55 = vector.load %arg13[%c25, %c0_65, %c0_66] : memref<27x1x128xf32, #tpu.memory_space<vmem>>, vector<1x1x128xf32>
    %56 = vector.shape_cast %55 : vector<1x1x128xf32> to vector<1x128xf32>
    %c26 = arith.constant 26 : index
    %c0_67 = arith.constant 0 : index
    %c0_68 = arith.constant 0 : index
    %57 = vector.load %arg13[%c26, %c0_67, %c0_68] : memref<27x1x128xf32, #tpu.memory_space<vmem>>, vector<1x1x128xf32>
    %58 = vector.shape_cast %57 : vector<1x1x128xf32> to vector<1x128xf32>
    %cst = arith.constant 1.000000e+00 : f32
    %59 = vector.broadcast %cst : f32 to vector<1x128xf32>
    %60 = tpu.concatenate %6, %8, %10, %12, %14, %16, %18, %20, %22, %24, %26, %28, %30, %32, %34, %36 in 0 : vector<1x128xf32>, vector<1x128xf32>, vector<1x128xf32>, vector<1x128xf32>, vector<1x128xf32>, vector<1x128xf32>, vector<1x128xf32>, vector<1x128xf32>, vector<1x128xf32>, vector<1x128xf32>, vector<1x128xf32>, vector<1x128xf32>, vector<1x128xf32>, vector<1x128xf32>, vector<1x128xf32>, vector<1x128xf32> -> vector<16x128xf32>
    %61 = tpu.concatenate %38, %40, %42, %44, %46, %48, %50, %52, %54, %56, %58, %59 in 0 : vector<1x128xf32>, vector<1x128xf32>, vector<1x128xf32>, vector<1x128xf32>, vector<1x128xf32>, vector<1x128xf32>, vector<1x128xf32>, vector<1x128xf32>, vector<1x128xf32>, vector<1x128xf32>, vector<1x128xf32>, vector<1x128xf32> -> vector<12x128xf32>
    %62 = tpu.concatenate %60, %61 in 0 : vector<16x128xf32>, vector<12x128xf32> -> vector<28x128xf32>
    %c0_69 = arith.constant 0 : index
    %c0_70 = arith.constant 0 : index
    %63 = vector.load %arg8[%c0_69, %c0_70] : memref<10x28xf32, #tpu.memory_space<vmem>>, vector<10x28xf32>
    %cst_71 = arith.constant dense<0.000000e+00> : vector<10x128xf32>
    %64 = tpu.matmul %63, %62, %cst_71 {dimension_numbers = #tpu.dot_dimension_numbers<[1], [0], [0], [1], [0, 0, 1, 1], [], []>} : vector<10x28xf32>, vector<28x128xf32>, vector<10x128xf32> -> vector<10x128xf32>
    %c0_72 = arith.constant 0 : index
    %c0_73 = arith.constant 0 : index
    %c0_74 = arith.constant 0 : index
    %65 = vector.load %arg9[%c0_72, %c0_73, %c0_74] : memref<1x10x128xf32, #tpu.memory_space<vmem>>, vector<1x10x128xf32>
    %66 = vector.shape_cast %65 : vector<1x10x128xf32> to vector<10x128xf32>
    %67 = vector.shape_cast %64 : vector<10x128xf32> to vector<1x10x128xf32>
    tpu.vector_store %arg9[%c0_72, %c0_73, %c0_74], %67 {strides = array<i32>} : memref<1x10x128xf32, #tpu.memory_space<vmem>>, vector<1x10x128xf32>,
    return
  }
  func.func @transform_0(%arg0: i32) -> (i32, i32, i32, i32, i32) {
    %c0_i32 = arith.constant 0 : i32
    %c0_i32_0 = arith.constant 0 : i32
    %c0_i32_1 = arith.constant 0 : i32
    %c0_i32_2 = arith.constant 0 : i32
    %c0_i32_3 = arith.constant 0 : i32
    return %arg0, %c0_i32, %c0_i32_0, %c0_i32_1, %c0_i32_2 : i32, i32, i32, i32, i32
  }
  func.func @transform_1(%arg0: i32) -> i32 {
    %c0_i32 = arith.constant 0 : i32
    %c0_i32_0 = arith.constant 0 : i32
    return %c0_i32 : i32
  }
  func.func @transform_2(%arg0: i32) -> i32 {
    %c0_i32 = arith.constant 0 : i32
    %c0_i32_0 = arith.constant 0 : i32
    return %c0_i32 : i32
  }
  func.func @transform_3(%arg0: i32) -> i32 {
    %c0_i32 = arith.constant 0 : i32
    %c0_i32_0 = arith.constant 0 : i32
    return %c0_i32 : i32
  }
  func.func @transform_4(%arg0: i32) -> i32 {
    %c0_i32 = arith.constant 0 : i32
    %c0_i32_0 = arith.constant 0 : i32
    return %c0_i32 : i32
  }
  func.func @transform_5(%arg0: i32) -> i32 {
    %c0_i32 = arith.constant 0 : i32
    %c0_i32_0 = arith.constant 0 : i32
    return %c0_i32 : i32
  }
  func.func @transform_6(%arg0: i32) -> i32 {
    %c0_i32 = arith.constant 0 : i32
    %c0_i32_0 = arith.constant 0 : i32
    return %c0_i32 : i32
  }
  func.func @transform_7(%arg0: i32) -> (i32, i32) {
    %c0_i32 = arith.constant 0 : i32
    %c0_i32_0 = arith.constant 0 : i32
    %c0_i32_1 = arith.constant 0 : i32
    return %c0_i32, %c0_i32_0 : i32, i32
  }
  func.func @transform_8(%arg0: i32) -> (i32, i32, i32) {
    %c0_i32 = arith.constant 0 : i32
    %c0_i32_0 = arith.constant 0 : i32
    %c0_i32_1 = arith.constant 0 : i32
    return %arg0, %c0_i32, %c0_i32_0 : i32, i32, i32
  }
}

</mosaic_0001>

<bundles_post_ra>
// kernel: tpu_custom_call.1
= control target key start
LH: loop header
LB: loop body
LE: loop exit
PB: predicated region body
PF: predicated region fallthrough
CT: control target
= control target key end

     0   :  { %13 = vsyncpa [#allocation8], 0  ;;  %s5153_s0 = inlined_call_operand.vmem [shape: f32[1,1,28,28,128], index: 0, kind: input, shape index: {}]   ;;  %s5154_s1 = inlined_call_operand.vmem [shape: f32[90], index: 1, kind: input, shape index: {}]   ;;  %s5155_s2 = inlined_call_operand.vmem [shape: f32[10], index: 2, kind: input, shape index: {}]   ;;  %s5156_s3 = inlined_call_operand.vmem [shape: f32[1620], index: 3, kind: input, shape index: {}]   ;;  %s5157_s4 = inlined_call_operand.vmem [shape: f32[18], index: 4, kind: input, shape index: {}]   ;;  %s5158_s5 = inlined_call_operand.vmem [shape: f32[4374], index: 5, kind: input, shape index: {}]   ;;  %s5159_s6 = inlined_call_operand.vmem [shape: f32[27], index: 6, kind: input, shape index: {}]   ;;  %s5160_s7 = inlined_call_operand.vmem [shape: f32[10,28], index: 7, kind: input, shape index: {}]   ;;  %s5161_s8 = inlined_call_operand.vmem [shape: f32[1,10,128], index: 8, kind: output, shape index: {}]  }
   0x1   :  { %14 = vsyncpa [#allocation10], 0 }
   0x2   :  { %15 = vsyncpa [#allocation13], 0  ;;  %s35_s29 = sshll.u32 %s5155_s2, 4  ;;  %s36_s29 = int_to_ptr.vmem [resolvable:$true] %s35_s29 }
   0x3   :  { %16 = vsyncpa [#allocation16], 0  ;;  %s55_s10 = sshll.u32 %s5157_s4, 4  ;;  %s3132_s11 = scalar_lea.vmem %s36_s29, 16  ;;  %s56_s10 = int_to_ptr.vmem [resolvable:$true] %s55_s10 }
   0x4   :  { %p3133_p0 = scmp.ne.s32.totalorder %s36_s29, %s3132_s11  ;;  %p3137_p1 = scmp.lt.s32.totalorder %s36_s29, %s36_s29 }
   0x5   :  { %p3138_p2 = scmp.lt.s32.totalorder %s3132_s11, %s3132_s11 }
   0x7   :  { %p3139_p3 = por %p3138_p2, %p3137_p1 }
   0x9   :  { %p3140_p4 = pnand %p3139_p3, %p3133_p0 }
   0xb   :  { %3143 = shalt.err (!%p3140_p4)
}
   0xc   :  { %s3580_s12 = smov [#allocation9]   ;;  %s3144_s13 = scalar_lea.vmem %s56_s10, 16 }
   0xd   :  { %38 = dma.vmem_to_smem %s36_s29, 16, %s3580_s12, [#allocation10]  }
   0xe   :  { %p3145_p5 = scmp.ne.s32.totalorder %s56_s10, %s3144_s13  ;;  %p3149_p6 = scmp.lt.s32.totalorder %s56_s10, %s56_s10 }
   0xf   :  { %p3150_p7 = scmp.lt.s32.totalorder %s3144_s13, %s3144_s13 }
  0x11   :  { %p3151_p8 = por %p3150_p7, %p3149_p6 }
  0x13   :  { %p3152_p9 = pnand %p3151_p8, %p3145_p5 }
  0x15   :  { %3155 = shalt.err (!%p3152_p9)
}
  0x16   :  { %s3581_s2 = smov [#allocation12]   ;;  %s25_s15 = sshll.u32 %s5154_s1, 4  ;;  %s26_s15 = int_to_ptr.vmem [resolvable:$true] %s25_s15 }
  0x17   :  { %58 = dma.vmem_to_smem %s56_s10, 16, %s3581_s2, [#allocation13]  }
  0x18   :  { %s45_s18 = sshll.u32 %s5156_s3, 4  ;;  %s3156_s19 = scalar_lea.vmem %s26_s15, 16  ;;  %s46_s18 = int_to_ptr.vmem [resolvable:$true] %s45_s18 }
  0x19   :  { %p3157_p10 = scmp.ne.s32.totalorder %s26_s15, %s3156_s19  ;;  %p3161_p11 = scmp.lt.s32.totalorder %s26_s15, %s26_s15 }
  0x1a   :  { %p3162_p12 = scmp.lt.s32.totalorder %s3156_s19, %s3156_s19 }
  0x1c   :  { %p3163_p13 = por %p3162_p12, %p3161_p11 }
  0x1e   :  { %p3164_p0 = pnand %p3163_p13, %p3157_p10 }
  0x20   :  { %3167 = shalt.err (!%p3164_p0)
}
  0x21   :  { %s3582_s20 = smov [#allocation7]   ;;  %s3168_s21 = scalar_lea.vmem %s46_s18, 208 }
  0x22   :  { %28 = dma.vmem_to_smem %s26_s15, 16, %s3582_s20, [#allocation8]  }
  0x23   :  { %p3169_p1 = scmp.ne.s32.totalorder %s46_s18, %s3168_s21  ;;  %s3172_s22 = scalar_lea.vmem %s46_s18, 256 }
  0x24   :  { %p3173_p2 = scmp.lt.s32.totalorder %s46_s18, %s46_s18  ;;  %p3174_p3 = scmp.lt.s32.totalorder %s3172_s22, %s3168_s21 }
  0x26   :  { %p3175_p4 = por %p3174_p3, %p3173_p2 }
  0x28   :  { %p3176_p5 = pnand %p3175_p4, %p3169_p1 }
  0x2a   :  { %3179 = shalt.err (!%p3176_p5)
}
  0x2b   :  { %s3583_s1 = smov [#allocation11]   ;;  %s65_s24 = sshll.u32 %s5158_s5, 4  ;;  %s66_s24 = int_to_ptr.vmem [resolvable:$true] %s65_s24 }
  0x2c   :  { %48 = dma.vmem_to_smem %s46_s18, 208, %s3583_s1, [#allocation10]  }
  0x2d   :  { %s75_s27 = sshll.u32 %s5159_s6, 4  ;;  %s3180_s28 = scalar_lea.vmem %s66_s24, 560  ;;  %s76_s27 = int_to_ptr.vmem [resolvable:$true] %s75_s27 }
  0x2e   :  { %p3181_p6 = scmp.ne.s32.totalorder %s66_s24, %s3180_s28  ;;  %s3184_s29 = scalar_lea.vmem %s66_s24, 640 }
  0x2f   :  { %p3185_p7 = scmp.lt.s32.totalorder %s66_s24, %s66_s24  ;;  %p3186_p8 = scmp.lt.s32.totalorder %s3184_s29, %s3180_s28 }
  0x31   :  { %p3187_p9 = por %p3186_p8, %p3185_p7 }
  0x33   :  { %p3188_p10 = pnand %p3187_p9, %p3181_p6 }
  0x35   :  { %3191 = shalt.err (!%p3188_p10)
}
  0x36   :  { %s3584_s30 = smov [#allocation14]   ;;  %s3192_s9 = scalar_lea.vmem %s76_s27, 16 }
  0x37   :  { %68 = dma.vmem_to_smem %s66_s24, 560, %s3584_s30, [#allocation13]  }
  0x38   :  { %p3193_p11 = scmp.ne.s32.totalorder %s76_s27, %s3192_s9  ;;  %p3197_p12 = scmp.lt.s32.totalorder %s76_s27, %s76_s27 }
  0x39   :  { %p3198_p13 = scmp.lt.s32.totalorder %s3192_s9, %s3192_s9 }
  0x3b   :  { %p3199_p0 = por %p3198_p13, %p3197_p12 }
  0x3d   :  { %p3200_p1 = pnand %p3199_p0, %p3193_p11 }
  0x3f   :  { %3203 = shalt.err (!%p3200_p1)
}
  0x40   :  { %s3585_s5 = smov [#allocation15]  }
  0x41   :  { %78 = dma.vmem_to_smem %s76_s27, 16, %s3585_s5, [#allocation16]  }
  0x42   :  { %3388 = dma.done.wait [#allocation8], 16  }
  0x43   :  { %3389 = vsyncadd [#allocation8], 4294967280 }
  0x44   :  { %3390 = dma.done.wait [#allocation10], 224  }
  0x45   :  { %3391 = vsyncadd [#allocation10], 4294967072 }
  0x46   :  { %3392 = dma.done.wait [#allocation13], 576  }
  0x47   :  { %3393 = vsyncadd [#allocation13], 4294966720 }
  0x48   :  { %3394 = dma.done.wait [#allocation16], 16  }
  0x49   :  { %3395 = vsyncadd [#allocation16], 4294967280 }
  0x4a   :  { %99 = sfence }
  0x4b   :  { %s3650_s6 = smov 0  }
  0x4c LB: > { %s3655_s10 = smov 0   ;;  %s3398_s6 = sphi %s3650_s6, %s105_s6  }
  0x4d LB: >> { %s2723_s11 = sshll.u32 %s3398_s6, 6  ;;  %s3662_s12 = sshll.u32 %s3402_s10, 1  ;;  %s3402_s10 = sphi %s3655_s10, %s111_s10  }
  0x4e   : >> { %s3667_s4 = scalar_lea.vmem %s5153_s0, %s2723_s11  ;;  %s113_s14 = sld [smem:[#allocation9 + %s3662_s12]] }
  0x4f   : >> { %s115_s15 = sadd.s32 1, %s3662_s12  ;;  %s129_s17 = sld [smem:[#allocation7 + %s3662_s12]]  ;;  %v121_v0 = vld [vmem:[%s3667_s4] sm:$0xff]  ;;  %v3685_v2 = vld [vmem:[%s3667_s4 + $0x8] sm:$0xff] }
  0x50   : >> { %s116_s16 = sld [smem:[#allocation9 + %s115_s15]]  ;;  %s173_s19 = sadd.s32 10, %s3662_s12  ;;  %v3679_v1 = vld [vmem:[%s3667_s4 + $0x20] sm:$0xff]  ;;  %v3692_v4 = vld [vmem:[%s3667_s4 + $0x28] sm:$0xff] }
  0x51   : >> { %s147_s18 = sld [smem:[#allocation7 + %s115_s15]]  ;;  %s192_s21 = sadd.s32 11, %s3662_s12  ;;  %v165_v3 = vld [vmem:[%s3667_s4 + $0x1] sm:$0xff] }
  0x52   : >> { %s174_s20 = sld [smem:[#allocation7 + %s173_s19]]  ;;  %s219_s1 = sadd.s32 20, %s3662_s12  ;;  %v3701_v8 = vld [vmem:[%s3667_s4 + $0x21] sm:$0xff] }
  0x53   : >> { %s3674_s22 = sld [smem:[#allocation7 + %s192_s21]]  ;;  %s238_s23 = sadd.s32 21, %s3662_s12  ;;  %v211_v21 = vld [vmem:[%s3667_s4 + $0x2] sm:$0xff] }
  0x54   : >> { %s3681_s3 = sld [smem:[#allocation7 + %s219_s1]]  ;;  %s268_s25 = sadd.s32 30, %s3662_s12  ;;  %v3694_v5 = vstv %s113_s14  ;;  %v3737_v22 = vld [vmem:[%s3667_s4 + $0x22] sm:$0xff] }
  0x55   : >> { %s3688_s24 = sld [smem:[#allocation7 + %s238_s23]]  ;;  %v3698_v7 = vstv %s129_s17  ;;  %s287_s27 = sadd.s32 31, %s3662_s12  ;;  %v3757_v31 = vld [vmem:[%s3667_s4 + $0x40] sm:$0xff] }
  0x56   : >> { %v3696_v6 = vstv %s116_s16  ;;  %s3703_s26 = sld [smem:[#allocation7 + %s268_s25]]  ;;  %v131_v9 = vmul.f32 %v3698_v7, %v121_v0  ;;  %v135_v10 = vmul.f32 %v3698_v7, %v3679_v1  ;;  %s314_s29 = sadd.s32 40, %s3662_s12  ;;  %v3716_v12 = vmul.f32 %v3698_v7, %v3685_v2  ;;  %v2612_v44 = vld [vmem:[%s3667_s4 + $0x41] sm:$0xff] }
  0x57   : >> { %v3709_v11 = vstv %s147_s18  ;;  %s3711_s28 = sld [smem:[#allocation7 + %s287_s27]]  ;;  %s333_s9 = sadd.s32 41, %s3662_s12  ;;  %v3728_v16 = vmul.f32 %v3698_v7, %v3692_v4  ;;  %v3800_v53 = vld [vmem:[%s3667_s4 + $0x42] sm:$0xff] }
  0x58   : >> { %v149_v13 = vmul.f32 %v3709_v11, %v121_v0  ;;  %v153_v14 = vmul.f32 %v3709_v11, %v3679_v1  ;;  %v3721_v15 = vstv %s174_s20  ;;  %s3723_s30 = sld [smem:[#allocation7 + %s314_s29]]  ;;  %v139_v17 = vadd.f32 %v131_v9, %v3694_v5  ;;  %s360_s11 = sadd.s32 50, %s3662_s12 }
  0x59   : >> { %v143_v18 = vadd.f32 %v135_v10, %v3694_v5  ;;  %v176_v19 = vmul.f32 %v3721_v15, %v165_v3  ;;  %v180_v20 = vmul.f32 %v3721_v15, %v3701_v8  ;;  %s3739_s5 = sld [smem:[#allocation7 + %s333_s9]]  ;;  %v3745_v25 = vstv %s3674_s22  ;;  %s379_s2 = sadd.s32 51, %s3662_s12 }
  0x5a   : >> { %v157_v23 = vadd.f32 %v149_v13, %v3696_v6  ;;  %v161_v24 = vadd.f32 %v153_v14, %v3696_v6  ;;  %v3748_v26 = vstv %s3681_s3  ;;  %s3750_s13 = sld [smem:[#allocation7 + %s360_s11]]  ;;  %v195_v29 = vmul.f32 %v3745_v25, %v165_v3  ;;  %s409_s15 = sadd.s32 60, %s3662_s12  ;;  %v2630_v3 = vld [vmem:[%s3667_s4 + $0x60] sm:$0xff] }
  0x5b   : >> { %v184_v27 = vadd.f32 %v176_v19, %v139_v17  ;;  %v188_v28 = vadd.f32 %v180_v20, %v143_v18  ;;  %v199_v30 = vmul.f32 %v3745_v25, %v3701_v8  ;;  %s3759_s14 = sld [smem:[#allocation7 + %s379_s2]]  ;;  %v222_v32 = vmul.f32 %v3748_v26, %v211_v21  ;;  %s428_s17 = sadd.s32 61, %s3662_s12  ;;  %v2638_v20 = vld [vmem:[%s3667_s4 + $0x61] sm:$0xff] }
  0x5c   : >> { %v226_v33 = vmul.f32 %v3748_v26, %v3737_v22  ;;  %v3766_v34 = vstv %s3688_s24  ;;  %v3769_v35 = vstv %s3703_s26  ;;  %s3771_s16 = sld [smem:[#allocation7 + %s409_s15]]  ;;  %v203_v36 = vadd.f32 %v195_v29, %v157_v23  ;;  %s455_s19 = sadd.s32 70, %s3662_s12 }
  0x5d   : >> { %v207_v37 = vadd.f32 %v199_v30, %v161_v24  ;;  %v241_v38 = vmul.f32 %v3766_v34, %v211_v21  ;;  %v245_v39 = vmul.f32 %v3766_v34, %v3737_v22  ;;  %s3777_s18 = sld [smem:[#allocation7 + %s428_s17]]  ;;  %v230_v40 = vadd.f32 %v222_v32, %v184_v27  ;;  %s474_s21 = sadd.s32 71, %s3662_s12 }
  0x5e   : >> { %v234_v41 = vadd.f32 %v226_v33, %v188_v28  ;;  %v271_v42 = vmul.f32 %v3769_v35, %v3679_v1  ;;  %v275_v43 = vmul.f32 %v3757_v31, %v3769_v35  ;;  %s3785_s20 = sld [smem:[#allocation7 + %s455_s19]]  ;;  %v3789_v47 = vstv %s3711_s28  ;;  %s501_s22 = sadd.s32 80, %s3662_s12 }
  0x5f   : >> { %v249_v45 = vadd.f32 %v241_v38, %v203_v36  ;;  %v253_v46 = vadd.f32 %v245_v39, %v207_v37  ;;  %v3792_v48 = vstv %s3723_s30  ;;  %v290_v51 = vmul.f32 %v3789_v47, %v3679_v1  ;;  %s3802_s1 = sld [smem:[#allocation7 + %s474_s21]]  ;;  %s520_s23 = sadd.s32 81, %s3662_s12  ;;  %v2646_v38 = vld [vmem:[%s3667_s4 + $0x62] sm:$0xff] }
  0x60   : >> { %v279_v49 = vadd.f32 %v271_v42, %v230_v40  ;;  %v283_v50 = vadd.f32 %v275_v43, %v234_v41  ;;  %v294_v52 = vmul.f32 %v3757_v31, %v3789_v47  ;;  %v317_v54 = vmul.f32 %v3792_v48, %v3701_v8  ;;  %s3813_s3 = sld [smem:[#allocation7 + %s501_s22]]  ;;  %s2651_s24 = smul.u32 416, %s3402_s10 }
  0x61   : >> { %v321_v55 = vmul.f32 %v2612_v44, %v3792_v48  ;;  %v3808_v56 = vstv %s3739_s5  ;;  %v3811_v57 = vstv %s3750_s13  ;;  %v298_v58 = vadd.f32 %v290_v51, %v249_v45  ;;  %s3830_s12 = sld [smem:[#allocation7 + %s520_s23]]  ;;  %v166_v51 = vld [vmem:[%s3667_s4 + $0x9] sm:$0xff]  ;;  %s2650_s25 = sshll.u32 %s3398_s6, 4 }
  0x62   : >> { %v302_v59 = vadd.f32 %v294_v52, %v253_v46  ;;  %v336_v60 = vmul.f32 %v3808_v56, %v3701_v8  ;;  %v340_v61 = vmul.f32 %v2612_v44, %v3808_v56  ;;  %v325_v62 = vadd.f32 %v317_v54, %v279_v49  ;;  %s566_s26 = sadd.s32 %s2651_s24, %s2650_s25  ;;  %s111_s10 = sadd.s32 1, %s3402_s10  }
  0x63   : >> { %v329_v63 = vadd.f32 %v321_v55, %v283_v50  ;;  %v363_v0 = vmul.f32 %v3811_v57, %v3737_v22  ;;  %v367_v1 = vmul.f32 %v3800_v53, %v3811_v57  ;;  %v3825_v13 = vstv %s3759_s14  ;;  %v170_v55 = vld [vmem:[%s3667_s4 + $0x29] sm:$0xff]  ;;  %p108_p2 = scmp.ge.s32.totalorder %s111_s10, 5  }
  0x64   : >> { %v344_v9 = vadd.f32 %v336_v60, %v298_v58  ;;  %v348_v10 = vadd.f32 %v340_v61, %v302_v59  ;;  %v3828_v14 = vstv %s3771_s16  ;;  %v382_v18 = vmul.f32 %v3825_v13, %v3737_v22  ;;  %s105_s6 = sadd.s32 (%p108_p2), 1, %s3398_s6  }
  0x65   : >> { %v371_v8 = vadd.f32 %v363_v0, %v325_v62  ;;  %v375_v17 = vadd.f32 %v367_v1, %v329_v63  ;;  %v386_v19 = vmul.f32 %v3800_v53, %v3825_v13  ;;  %v412_v21 = vmul.f32 %v3757_v31, %v3828_v14  ;;  %p102_p3 = scmp.ge.s32.totalorder (%p108_p2), %s105_s6, 13  }
  0x66   : >> { %v416_v23 = vmul.f32 %v2630_v3, %v3828_v14  ;;  %v3841_v24 = vstv %s3777_s18  ;;  %v3844_v27 = vstv %s3785_s20  ;;  %v390_v28 = vadd.f32 %v382_v18, %v344_v9 }
  0x67   : >> { %v394_v29 = vadd.f32 %v386_v19, %v348_v10  ;;  %v431_v22 = vmul.f32 %v3757_v31, %v3841_v24  ;;  %v435_v30 = vmul.f32 %v2630_v3, %v3841_v24  ;;  %v420_v32 = vadd.f32 %v412_v21, %v371_v8  ;;  %v216_v10 = vld [vmem:[%s3667_s4 + $0x2a] sm:$0xff] }
  0x68   : >> { %v424_v33 = vadd.f32 %v416_v23, %v375_v17  ;;  %v458_v36 = vmul.f32 %v2612_v44, %v3844_v27  ;;  %v462_v37 = vmul.f32 %v2638_v20, %v3844_v27  ;;  %v3853_v41 = vstv %s3802_s1  ;;  %v2605_v19 = vld [vmem:[%s3667_s4 + $0x48] sm:$0xff] }
  0x69   : >> { %v439_v39 = vadd.f32 %v431_v22, %v390_v28  ;;  %v443_v40 = vadd.f32 %v435_v30, %v394_v29  ;;  %v3856_v42 = vstv %s3813_s3  ;;  %v477_v45 = vmul.f32 %v2612_v44, %v3853_v41 }
  0x6a   : >> { %v466_v43 = vadd.f32 %v458_v36, %v420_v32  ;;  %v470_v31 = vadd.f32 %v462_v37, %v424_v33  ;;  %v481_v46 = vmul.f32 %v2638_v20, %v3853_v41  ;;  %v504_v49 = vmul.f32 %v3800_v53, %v3856_v42  ;;  %v2613_v32 = vld [vmem:[%s3667_s4 + $0x49] sm:$0xff] }
  0x6b   : >> { %v508_v50 = vmul.f32 %v2646_v38, %v3856_v42  ;;  %v3865_v52 = vstv %s3830_s12  ;;  %v140_v54 = vadd.f32 %v3716_v12, %v3694_v5  ;;  %v144_v44 = vadd.f32 %v3728_v16, %v3694_v5  ;;  %v212_v16 = vld [vmem:[%s3667_s4 + $0xa] sm:$0xff] }
  0x6c   : >> { %v512_v58 = vadd.f32 %v504_v49, %v466_v43  ;;  %v150_v60 = vmul.f32 %v3709_v11, %v3685_v2  ;;  %v3874_v61 = vadd.f32 %v477_v45, %v439_v39  ;;  %v3876_v62 = vadd.f32 %v481_v46, %v443_v40  ;;  %v2621_v45 = vld [vmem:[%s3667_s4 + $0x4a] sm:$0xff] }
  0x6d   : >> { %v516_v59 = vadd.f32 %v508_v50, %v470_v31  ;;  %v154_v63 = vmul.f32 %v3709_v11, %v3692_v4  ;;  %v177_v0 = vmul.f32 %v3721_v15, %v166_v51  ;;  %v181_v9 = vmul.f32 %v3721_v15, %v170_v55 }
  0x6e   : >> { %v539_v12 = vmax.f32 %v512_v58, 0.0  ;;  %v158_v3 = vadd.f32 %v150_v60, %v3696_v6  ;;  %v3887_v2 = vmul.f32 %v3800_v53, %v3865_v52  ;;  %v3890_v8 = vmul.f32 %v2646_v38, %v3865_v52  ;;  %v2631_v60 = vld [vmem:[%s3667_s4 + $0x68] sm:$0xff] }
  0x6f   : >> { %v543_v1 = vmax.f32 %v516_v59, 0.0  ;;  %v162_v17 = vadd.f32 %v154_v63, %v3696_v6  ;;  %v185_v18 = vadd.f32 %v177_v0, %v140_v54  ;;  %v189_v21 = vadd.f32 %v181_v9, %v144_v44 }
  0x70   : >> { %v196_v23 = vmul.f32 %v3745_v25, %v166_v51  ;;  %v200_v28 = vmul.f32 %v3745_v25, %v170_v55  ;;  %v223_v29 = vmul.f32 %v3748_v26, %v212_v16  ;;  %v227_v22 = vmul.f32 %v3748_v26, %v216_v10 }
  0x71   : >> { %v547_v20 = vmax.f32 %v539_v12, %v543_v1  ;;  %v242_v53 = vmul.f32 %v3766_v34, %v212_v16  ;;  %v246_v30 = vmul.f32 %v3766_v34, %v216_v10  ;;  %v272_v37 = vmul.f32 %v3769_v35, %v3692_v4 }
  0x72   : >> { %v204_v33 = vadd.f32 %v196_v23, %v158_v3  ;;  %v208_v36 = vadd.f32 %v200_v28, %v162_v17  ;;  %v276_v38 = vmul.f32 %v2605_v19, %v3769_v35  ;;  %v231_v39 = vadd.f32 %v223_v29, %v185_v18  ;;  %v2639_v17 = vld [vmem:[%s3667_s4 + $0x69] sm:$0xff] }
  0x73   : >> { %551 = vst [vmem:[#allocation6] sm:$0xff] %v547_v20  ;;  %v235_v40 = vadd.f32 %v227_v22, %v189_v21  ;;  %v291_v43 = vmul.f32 %v3789_v47, %v3692_v4  ;;  %v295_v31 = vmul.f32 %v2605_v19, %v3789_v47  ;;  %v318_v50 = vmul.f32 %v3792_v48, %v170_v55 }
  0x74   : >> { %v250_v46 = vadd.f32 %v242_v53, %v204_v33  ;;  %v254_v49 = vadd.f32 %v246_v30, %v208_v36  ;;  %v322_v51 = vmul.f32 %v2613_v32, %v3792_v48  ;;  %v280_v54 = vadd.f32 %v272_v37, %v231_v39  ;;  %v2647_v53 = vld [vmem:[%s3667_s4 + $0x6a] sm:$0xff] }
  0x75   : >> { %v284_v58 = vadd.f32 %v276_v38, %v235_v40  ;;  %v337_v59 = vmul.f32 %v3808_v56, %v170_v55  ;;  %v341_v44 = vmul.f32 %v2613_v32, %v3808_v56  ;;  %v364_v4 = vmul.f32 %v3811_v57, %v216_v10 }
  0x76   : >> { %v299_v63 = vadd.f32 %v291_v43, %v250_v46  ;;  %v303_v0 = vadd.f32 %v295_v31, %v254_v49  ;;  %v368_v12 = vmul.f32 %v2621_v45, %v3811_v57  ;;  %v326_v1 = vadd.f32 %v318_v50, %v280_v54  ;;  %v123_v43 = vld [vmem:[%s3667_s4 + $0x10] sm:$0xff] }
  0x77   : >> { %v330_v3 = vadd.f32 %v322_v51, %v284_v58  ;;  %v383_v9 = vmul.f32 %v3825_v13, %v216_v10  ;;  %v387_v16 = vmul.f32 %v2621_v45, %v3825_v13  ;;  %v413_v55 = vmul.f32 %v2605_v19, %v3828_v14  ;;  %v127_v31 = vld [vmem:[%s3667_s4 + $0x30] sm:$0xff] }
  0x78   : >> { %v345_v18 = vadd.f32 %v337_v59, %v299_v63  ;;  %v349_v20 = vadd.f32 %v341_v44, %v303_v0  ;;  %v417_v21 = vmul.f32 %v2631_v60, %v3828_v14  ;;  %v372_v23 = vadd.f32 %v364_v4, %v326_v1 }
  0x79   : >> { %v376_v28 = vadd.f32 %v368_v12, %v330_v3  ;;  %v432_v29 = vmul.f32 %v2605_v19, %v3841_v24  ;;  %v436_v22 = vmul.f32 %v2631_v60, %v3841_v24  ;;  %v459_v33 = vmul.f32 %v2613_v32, %v3844_v27  ;;  %v167_v3 = vld [vmem:[%s3667_s4 + $0x11] sm:$0xff] }
  0x7a   : >> { %v391_v30 = vadd.f32 %v383_v9, %v345_v18  ;;  %v395_v10 = vadd.f32 %v387_v16, %v349_v20  ;;  %v463_v36 = vmul.f32 %v2639_v17, %v3844_v27  ;;  %v421_v37 = vadd.f32 %v413_v55, %v372_v23  ;;  %v171_v9 = vld [vmem:[%s3667_s4 + $0x31] sm:$0xff] }
  0x7b   : >> { %v425_v38 = vadd.f32 %v417_v21, %v376_v28  ;;  %v478_v39 = vmul.f32 %v2613_v32, %v3853_v41  ;;  %v482_v40 = vmul.f32 %v2639_v17, %v3853_v41  ;;  %v505_v49 = vmul.f32 %v2621_v45, %v3856_v42  ;;  %v213_v20 = vld [vmem:[%s3667_s4 + $0x12] sm:$0xff] }
  0x7c   : >> { %v440_v46 = vadd.f32 %v432_v29, %v391_v30  ;;  %v444_v19 = vadd.f32 %v436_v22, %v395_v10  ;;  %v509_v50 = vmul.f32 %v2647_v53, %v3856_v42  ;;  %v467_v51 = vadd.f32 %v459_v33, %v421_v37  ;;  %v217_v29 = vld [vmem:[%s3667_s4 + $0x32] sm:$0xff] }
  0x7d   : >> { %v471_v54 = vadd.f32 %v463_v36, %v425_v38  ;;  %v524_v58 = vmul.f32 %v2621_v45, %v3865_v52  ;;  %v528_v59 = vmul.f32 %v2647_v53, %v3865_v52  ;;  %v133_v60 = vmul.f32 %v3698_v7, %v123_v43  ;;  %v2606_v33 = vld [vmem:[%s3667_s4 + $0x50] sm:$0xff] }
  0x7e   : >> { %v486_v32 = vadd.f32 %v478_v39, %v440_v46  ;;  %v490_v44 = vadd.f32 %v482_v40, %v444_v19  ;;  %v137_v63 = vmul.f32 %v3698_v7, %v127_v31  ;;  %v513_v0 = vadd.f32 %v505_v49, %v467_v51  ;;  %v2614_v49 = vld [vmem:[%s3667_s4 + $0x51] sm:$0xff] }
  0x7f   : >> { %v517_v4 = vadd.f32 %v509_v50, %v471_v54  ;;  %v151_v12 = vmul.f32 %v3709_v11, %v123_v43  ;;  %v155_v1 = vmul.f32 %v3709_v11, %v127_v31  ;;  %v3941_v45 = vadd.f32 %v3887_v2, %v3874_v61 }
  0x80   : >> { %v3945_v16 = vadd.f32 %v3890_v8, %v3876_v62  ;;  %v141_v17 = vadd.f32 %v133_v60, %v3694_v5  ;;  %v145_v18 = vadd.f32 %v137_v63, %v3694_v5  ;;  %v540_v55 = vmax.f32 %v513_v0, 0.0  ;;  %v2622_v63 = vld [vmem:[%s3667_s4 + $0x52] sm:$0xff] }
  0x81   : >> { %v544_v21 = vmax.f32 %v517_v4, 0.0  ;;  %v159_v23 = vadd.f32 %v151_v12, %v3696_v6  ;;  %v163_v28 = vadd.f32 %v155_v1, %v3696_v6  ;;  %v3953_v22 = vadd.f32 %v524_v58, %v486_v32 }
  0x82   : >> { %v3955_v61 = vadd.f32 %v528_v59, %v490_v44  ;;  %v178_v62 = vmul.f32 %v3721_v15, %v167_v3  ;;  %v182_v2 = vmul.f32 %v3721_v15, %v171_v9  ;;  %v197_v53 = vmul.f32 %v3745_v25, %v167_v3 }
  0x83   : >> { %v548_v8 = vmax.f32 %v540_v55, %v544_v21  ;;  %v201_v30 = vmul.f32 %v3745_v25, %v171_v9  ;;  %v224_v10 = vmul.f32 %v3748_v26, %v213_v20  ;;  %v228_v38 = vmul.f32 %v3748_v26, %v217_v29 }
  0x84   : >> { %v186_v36 = vadd.f32 %v178_v62, %v141_v17  ;;  %v190_v37 = vadd.f32 %v182_v2, %v145_v18  ;;  %v243_v39 = vmul.f32 %v3766_v34, %v213_v20  ;;  %v205_v40 = vadd.f32 %v197_v53, %v159_v23  ;;  %v2632_v20 = vld [vmem:[%s3667_s4 + $0x70] sm:$0xff] }
  0x85   : >> { %552 = vst [vmem:[#allocation6 + $0x8] sm:$0xff] %v548_v8  ;;  %v209_v43 = vadd.f32 %v201_v30, %v163_v28  ;;  %v247_v46 = vmul.f32 %v3766_v34, %v217_v29  ;;  %v273_v19 = vmul.f32 %v3769_v35, %v127_v31  ;;  %v277_v54 = vmul.f32 %v2606_v33, %v3769_v35  ;;  %v2640_v53 = vld [vmem:[%s3667_s4 + $0x71] sm:$0xff] }
  0x86   : >> { %v232_v50 = vadd.f32 %v224_v10, %v186_v36  ;;  %v236_v51 = vadd.f32 %v228_v38, %v190_v37  ;;  %v292_v58 = vmul.f32 %v3789_v47, %v127_v31  ;;  %v251_v59 = vadd.f32 %v243_v39, %v205_v40 }
  0x87   : >> { %v255_v32 = vadd.f32 %v247_v46, %v209_v43  ;;  %v296_v44 = vmul.f32 %v2606_v33, %v3789_v47  ;;  %v319_v60 = vmul.f32 %v3792_v48, %v171_v9  ;;  %v323_v12 = vmul.f32 %v2614_v49, %v3792_v48  ;;  %v2648_v43 = vld [vmem:[%s3667_s4 + $0x72] sm:$0xff] }
  0x88   : >> { %v281_v0 = vadd.f32 %v273_v19, %v232_v50  ;;  %v285_v4 = vadd.f32 %v277_v54, %v236_v51  ;;  %v338_v1 = vmul.f32 %v3808_v56, %v171_v9  ;;  %v300_v3 = vadd.f32 %v292_v58, %v251_v59  ;;  %v124_v54 = vld [vmem:[%s3667_s4 + $0x18] sm:$0x3] }
  0x89   : >> { %v304_v17 = vadd.f32 %v296_v44, %v255_v32  ;;  %v342_v18 = vmul.f32 %v2614_v49, %v3808_v56  ;;  %v365_v31 = vmul.f32 %v3811_v57, %v217_v29  ;;  %v369_v23 = vmul.f32 %v2622_v63, %v3811_v57  ;;  %v128_v44 = vld [vmem:[%s3667_s4 + $0x38] sm:$0x3] }
  0x8a   : >> { %v327_v55 = vadd.f32 %v319_v60, %v281_v0  ;;  %v331_v21 = vadd.f32 %v323_v12, %v285_v4  ;;  %v384_v28 = vmul.f32 %v3825_v13, %v217_v29  ;;  %v346_v62 = vadd.f32 %v338_v1, %v300_v3 }
  0x8b   : >> { %v350_v2 = vadd.f32 %v342_v18, %v304_v17  ;;  %v388_v8 = vmul.f32 %v2622_v63, %v3825_v13  ;;  %v414_v9 = vmul.f32 %v2606_v33, %v3828_v14  ;;  %v418_v36 = vmul.f32 %v2632_v20, %v3828_v14 }
  0x8c   : >> { %v373_v30 = vadd.f32 %v365_v31, %v327_v55  ;;  %v377_v10 = vadd.f32 %v369_v23, %v331_v21  ;;  %v433_v37 = vmul.f32 %v2606_v33, %v3841_v24  ;;  %v392_v38 = vadd.f32 %v384_v28, %v346_v62  ;;  %v168_v21 = vld [vmem:[%s3667_s4 + $0x19] sm:$0x3] }
  0x8d   : >> { %v396_v39 = vadd.f32 %v388_v8, %v350_v2  ;;  %v437_v40 = vmul.f32 %v2632_v20, %v3841_v24  ;;  %v460_v29 = vmul.f32 %v2614_v49, %v3844_v27  ;;  %v570_v46 = vmax.f32 %v3941_v45, 0.0  ;;  %v172_v8 = vld [vmem:[%s3667_s4 + $0x39] sm:$0x3] }
  0x8e   : >> { %v422_v19 = vadd.f32 %v414_v9, %v373_v30  ;;  %v426_v50 = vadd.f32 %v418_v36, %v377_v10  ;;  %v464_v51 = vmul.f32 %v2640_v53, %v3844_v27  ;;  %v574_v58 = vmax.f32 %v3945_v16, 0.0  ;;  %v214_v10 = vld [vmem:[%s3667_s4 + $0x1a] sm:$0x3] }
  0x8f   : >> { %v441_v59 = vadd.f32 %v433_v37, %v392_v38  ;;  %v479_v33 = vmul.f32 %v2614_v49, %v3853_v41  ;;  %v506_v32 = vmul.f32 %v2622_v63, %v3856_v42  ;;  %v571_v60 = vmax.f32 %v3953_v22, 0.0  ;;  %v218_v36 = vld [vmem:[%s3667_s4 + $0x3a] sm:$0x3] }
  0x90   : >> { %v468_v0 = vadd.f32 %v460_v29, %v422_v19  ;;  %v472_v4 = vadd.f32 %v464_v51, %v426_v50  ;;  %v510_v12 = vmul.f32 %v2648_v43, %v3856_v42  ;;  %v575_v1 = vmax.f32 %v3955_v61, 0.0  ;;  %v2603_v19 = vld [vmem:[%s3667_s4 + $0x38] sm:$0x3] }
  0x91   : >> { %v445_v3 = vadd.f32 %v437_v40, %v396_v39  ;;  %v483_v17 = vmul.f32 %v2640_v53, %v3853_v41  ;;  %v134_v18 = vmul.f32 %v3698_v7, %v124_v54  ;;  %v138_v20 = vmul.f32 %v3698_v7, %v128_v44  ;;  %v2607_v50 = vld [vmem:[%s3667_s4 + $0x58] sm:$0x3] }
  0x92   : >> { %v514_v49 = vadd.f32 %v506_v32, %v468_v0  ;;  %v518_v31 = vadd.f32 %v510_v12, %v472_v4  ;;  %v152_v55 = vmul.f32 %v3709_v11, %v124_v54  ;;  %v4003_v23 = vadd.f32 %v479_v33, %v441_v59  ;;  %v2615_v0 = vld [vmem:[%s3667_s4 + $0x59] sm:$0x3] }
  0x93   : >> { %v4006_v28 = vmul.f32 %v2622_v63, %v3865_v52  ;;  %v142_v62 = vadd.f32 %v134_v18, %v3694_v5  ;;  %v156_v2 = vmul.f32 %v3709_v11, %v128_v44  ;;  %v146_v30 = vadd.f32 %v138_v20, %v3694_v5  ;;  %v2611_v44 = vld [vmem:[%s3667_s4 + $0x39] sm:$0x3] }
  0x94   : >> { %v541_v9 = vmax.f32 %v514_v49, 0.0  ;;  %v545_v53 = vmax.f32 %v518_v31, 0.0  ;;  %v160_v7 = vadd.f32 %v152_v55, %v3696_v6  ;;  %v4015_v37 = vadd.f32 %v483_v17, %v445_v3  ;;  %v2619_v31 = vld [vmem:[%s3667_s4 + $0x3a] sm:$0x3] }
  0x95   : >> { %v4018_v63 = vmul.f32 %v2648_v43, %v3865_v52  ;;  %v164_v38 = vadd.f32 %v156_v2, %v3696_v6  ;;  %v179_v11 = vmul.f32 %v3721_v15, %v168_v21  ;;  %v183_v40 = vmul.f32 %v3721_v15, %v172_v8  ;;  %v2623_v20 = vld [vmem:[%s3667_s4 + $0x5a] sm:$0x3] }
  0x96   : >> { %v549_v39 = vmax.f32 %v541_v9, %v545_v53  ;;  %v198_v5 = vmul.f32 %v3745_v25, %v168_v21  ;;  %v202_v29 = vmul.f32 %v3745_v25, %v172_v8  ;;  %v225_v54 = vmul.f32 %v3748_v26, %v214_v10  ;;  %v2629_v53 = vld [vmem:[%s3667_s4 + $0x58] sm:$0x3] }
  0x97   : >> { %v187_v51 = vadd.f32 %v179_v11, %v142_v62  ;;  %v229_v43 = vmul.f32 %v3748_v26, %v218_v36  ;;  %v244_v6 = vmul.f32 %v3766_v34, %v214_v10  ;;  %v191_v59 = vadd.f32 %v183_v40, %v146_v30  ;;  %v2633_v30 = vld [vmem:[%s3667_s4 + $0x78] sm:$0x3] }
  0x98   : >> { %553 = vst [vmem:[#allocation6 + $0x10] sm:$0xff] %v549_v39  ;;  %v206_v33 = vadd.f32 %v198_v5, %v160_v7  ;;  %v210_v32 = vadd.f32 %v202_v29, %v164_v38  ;;  %v248_v15 = vmul.f32 %v3766_v34, %v218_v36  ;;  %v274_v4 = vmul.f32 %v2603_v19, %v3769_v35  ;;  %v2637_v40 = vld [vmem:[%s3667_s4 + $0x59] sm:$0x3] }
  0x99   : >> { %v233_v25 = vadd.f32 %v225_v54, %v187_v51  ;;  %v278_v12 = vmul.f32 %v2607_v50, %v3769_v35  ;;  %v293_v26 = vmul.f32 %v2603_v19, %v3789_v47  ;;  %v237_v3 = vadd.f32 %v229_v43, %v191_v59  ;;  %v2641_v5 = vld [vmem:[%s3667_s4 + $0x79] sm:$0x3] }
  0x9a   : >> { %v252_v17 = vadd.f32 %v244_v6, %v206_v33  ;;  %v256_v18 = vadd.f32 %v248_v15, %v210_v32  ;;  %v297_v49 = vmul.f32 %v2607_v50, %v3789_v47  ;;  %v320_v34 = vmul.f32 %v2611_v44, %v3792_v48  ;;  %v2645_v6 = vld [vmem:[%s3667_s4 + $0x5a] sm:$0x3] }
  0x9b   : >> { %v282_v55 = vadd.f32 %v274_v4, %v233_v25  ;;  %v324_v21 = vmul.f32 %v2615_v0, %v3792_v48  ;;  %v339_v62 = vmul.f32 %v2611_v44, %v3808_v56  ;;  %v286_v35 = vadd.f32 %v278_v12, %v237_v3  ;;  %v2649_v59 = vld [vmem:[%s3667_s4 + $0x7a] sm:$0x3]  ;;  %s567_s4 = scalar_lea.vmem [#allocation2], %s566_s26 }
  0x9c   : >> { %v301_v2 = vadd.f32 %v293_v26, %v252_v17  ;;  %v305_v8 = vadd.f32 %v297_v49, %v256_v18  ;;  %v343_v9 = vmul.f32 %v2615_v0, %v3808_v56  ;;  %v366_v7 = vmul.f32 %v2619_v31, %v3811_v57  ;;  %v555_v3 = vld [vmem:[#allocation6] ss:$2 sm:$0xff]  ;;  %v559_v17 = vld [vmem:[#allocation6 + $0x1] ss:$2 sm:$0xff] }
  0x9d   : >> { %v328_v47 = vadd.f32 %v320_v34, %v282_v55  ;;  %v370_v10 = vmul.f32 %v2623_v20, %v3811_v57  ;;  %v385_v48 = vmul.f32 %v2619_v31, %v3825_v13  ;;  %v332_v36 = vadd.f32 %v324_v21, %v286_v35 }
  0x9e   : >> { %v347_v38 = vadd.f32 %v339_v62, %v301_v2  ;;  %v351_v11 = vadd.f32 %v343_v9, %v305_v8  ;;  %v389_v39 = vmul.f32 %v2623_v20, %v3825_v13  ;;  %v415_v29 = vmul.f32 %v2629_v53, %v3828_v14 }
  0x9f   : >> { %v374_v56 = vadd.f32 %v366_v7, %v328_v47  ;;  %v419_v19 = vmul.f32 %v2633_v30, %v3828_v14  ;;  %v434_v50 = vmul.f32 %v2629_v53, %v3841_v24  ;;  %v378_v57 = vadd.f32 %v370_v10, %v332_v36 }
  0xa0   : >> { %v393_v51 = vadd.f32 %v385_v48, %v347_v38  ;;  %v397_v54 = vadd.f32 %v389_v39, %v351_v11  ;;  %v438_v43 = vmul.f32 %v2633_v30, %v3841_v24  ;;  %v461_v13 = vmul.f32 %v2637_v40, %v3844_v27 }
  0xa1   : >> { %v423_v33 = vadd.f32 %v415_v29, %v374_v56  ;;  %v465_v32 = vmul.f32 %v2641_v5, %v3844_v27  ;;  %v480_v15 = vmul.f32 %v2637_v40, %v3853_v41  ;;  %v427_v44 = vadd.f32 %v419_v19, %v378_v57 }
  0xa2   : >> { %v442_v0 = vadd.f32 %v434_v50, %v393_v51  ;;  %v446_v14 = vadd.f32 %v438_v43, %v397_v54  ;;  %v484_v25 = vmul.f32 %v2641_v5, %v3853_v41  ;;  %v507_v12 = vmul.f32 %v2645_v6, %v3856_v42 }
  0xa3   : >> { %v469_v4 = vadd.f32 %v461_v13, %v423_v33  ;;  %v511_v24 = vmul.f32 %v2649_v59, %v3856_v42  ;;  %v526_v26 = vmul.f32 %v2645_v6, %v3865_v52  ;;  %v473_v18 = vadd.f32 %v465_v32, %v427_v44 }
  0xa4   : >> { %v488_v49 = vadd.f32 %v480_v15, %v442_v0  ;;  %v492_v27 = vadd.f32 %v484_v25, %v446_v14  ;;  %v530_v31 = vmul.f32 %v2649_v59, %v3865_v52  ;;  %v578_v41 = vmax.f32 %v570_v46, %v574_v58 }
  0xa5   : >> { %v515_v20 = vadd.f32 %v507_v12, %v469_v4  ;;  %v579_v42 = vmax.f32 %v571_v60, %v575_v1  ;;  %v519_v55 = vadd.f32 %v511_v24, %v473_v18  ;;  %v562_v62 = vmax.f32 %v555_v3, %v559_v17 }
  0xa6   : >> { %v534_v34 = vadd.f32 %v526_v26, %v488_v49  ;;  %v538_v21 = vadd.f32 %v530_v31, %v492_v27  ;;  %v533_v35 = vadd.f32 %v4006_v28, %v4003_v23  ;;  %582 = vst [vmem:[#allocation6] sm:$0xff] %v578_v41  ;;  %v537_v52 = vadd.f32 %v4018_v63, %v4015_v37 }
  0xa7   : >> { %v542_v2 = vmax.f32 %v515_v20, 0.0  ;;  %583 = vst [vmem:[#allocation6 + $0x8] sm:$0xff] %v579_v42  ;;  %v546_v45 = vmax.f32 %v519_v55, 0.0  ;;  %568 = vst [vmem:[%s567_s4] sm:$0xff] %v562_v62 }
  0xa8   : >> { %v573_v16 = vmax.f32 %v534_v34, 0.0  ;;  %v577_v46 = vmax.f32 %v538_v21, 0.0  ;;  %v572_v58 = vmax.f32 %v533_v35, 0.0  ;;  %v576_v60 = vmax.f32 %v537_v52, 0.0 }
  0xa9   : >> { %v550_v22 = vmax.f32 %v542_v2, %v546_v45 }
  0xaa   : >> { %v581_v61 = vmax.f32 %v573_v16, %v577_v46  ;;  %v580_v23 = vmax.f32 %v572_v58, %v576_v60 }
  0xab   : >> { %554 = vst [vmem:[#allocation6 + $0x18] sm:$0x3] %v550_v22 }
  0xae   : >> { %v586_v1 = vld [vmem:[#allocation6] ss:$2 sm:$0xff]  ;;  %v588_v8 = vld [vmem:[#allocation6 + $0x1] ss:$2 sm:$0xff] }
  0xaf   : >> { %v590_v9 = vmax.f32 %v586_v1, %v588_v8 }
  0xb1   : >> { %2655 = vst [vmem:[%s567_s4 + $0xd0] sm:$0xff] %v590_v9 }
  0xb2   : >> { %v557_v28 = vld [vmem:[#allocation6 + $0x10] ss:$2 sm:$0x1f]  ;;  %v561_v53 = vld [vmem:[#allocation6 + $0x11] ss:$2 sm:$0x1f] }
  0xb3   : >> { %584 = vst [vmem:[#allocation6 + $0x10] sm:$0xff] %v580_v23  ;;  %585 = vst [vmem:[#allocation6 + $0x18] sm:$0x3] %v581_v61  ;;  %v563_v37 = vmax.f32 %v557_v28, %v561_v53 }
  0xb5   : >> { %569 = vst [vmem:[%s567_s4 + $0x8] sm:$0x1f] %v563_v37 }
  0xb7   : > { %110 = sbr.rel (!%p108_p2) target bundleno = 77 (0x4d), region = 215 }
  0xba   : >> { %v587_v63 = vld [vmem:[#allocation6 + $0x10] ss:$2 sm:$0x1f]  ;;  %v589_v30 = vld [vmem:[#allocation6 + $0x11] ss:$2 sm:$0x1f] }
  0xbb   : >> { %v591_v47 = vmax.f32 %v587_v63, %v589_v30 }
  0xbd   : >> { %2656 = vst [vmem:[%s567_s4 + $0xd8] sm:$0x1f] %v591_v47 }
  0xbe   :  { %104 = sbr.rel (!%p102_p3) target bundleno = 76 (0x4c), region = 226  ;;  %s4085_s27 = smov (%p102_p3), 0  }
  0xc5 LB: > { %s603_s28 = smul.u32 208, %s3406_s27  ;;  %s3406_s27 = sphi %s4085_s27, %s602_s27  }
  0xc6   : > { %s607_s29 = smul.u32 176, %s3406_s27  ;;  %s602_s27 = sadd.s32 1, %s3406_s27  }
  0xc7   : > { %s4092_s30 = scalar_lea.vmem [#allocation2], %s603_s28  ;;  %p599_p4 = scmp.ge.s32.totalorder %s602_s27, 10  }
  0xc8   : > { %v605_v7 = vld [vmem:[%s4092_s30] sm:$0xff]  ;;  %v606_v10 = vld [vmem:[%s4092_s30 + $0x8] sm:$0x1f]  ;;  %v2657_v48 = vld [vmem:[%s4092_s30 + $0x10] sm:$0xff]  ;;  %s4097_s0 = scalar_lea.vmem [#allocation3], %s607_s29  ;;  %s4151_s6 = smov (%p599_p4), 0  }
  0xc9   : > { %609 = vst [vmem:[%s4097_s0] sm:$0xff] %v605_v7  ;;  %610 = vst [vmem:[%s4097_s0 + $0x8] sm:$0x1f] %v606_v10  ;;  %v2658_v36 = vld [vmem:[%s4092_s30 + $0x18] sm:$0x1f]  ;;  %v2659_v38 = vld [vmem:[%s4092_s30 + $0x20] sm:$0xff] }
  0xca   : > { %615 = vst [vmem:[%s4097_s0 + $0xd] sm:$0xff] %v2657_v48  ;;  %v2660_v11 = vld [vmem:[%s4092_s30 + $0x28] sm:$0x1f]  ;;  %616 = vst [vmem:[%s4097_s0 + $0x15] sm:$0x1f] %v2658_v36  ;;  %v2661_v39 = vld [vmem:[%s4092_s30 + $0x30] sm:$0xff] }
  0xcb   : > { %621 = vst [vmem:[%s4097_s0 + $0x1a] sm:$0xff] %v2659_v38  ;;  %622 = vst [vmem:[%s4097_s0 + $0x22] sm:$0x1f] %v2660_v11  ;;  %v2662_v40 = vld [vmem:[%s4092_s30 + $0x38] sm:$0x1f]  ;;  %v2663_v5 = vld [vmem:[%s4092_s30 + $0x40] sm:$0xff] }
  0xcc   : > { %627 = vst [vmem:[%s4097_s0 + $0x27] sm:$0xff] %v2661_v39  ;;  %628 = vst [vmem:[%s4097_s0 + $0x2f] sm:$0x1f] %v2662_v40  ;;  %v2664_v56 = vld [vmem:[%s4092_s30 + $0x48] sm:$0x1f]  ;;  %v2665_v29 = vld [vmem:[%s4092_s30 + $0x50] sm:$0xff] }
  0xcd   : > { %633 = vst [vmem:[%s4097_s0 + $0x34] sm:$0xff] %v2663_v5  ;;  %v2666_v19 = vld [vmem:[%s4092_s30 + $0x58] sm:$0x1f]  ;;  %634 = vst [vmem:[%s4097_s0 + $0x3c] sm:$0x1f] %v2664_v56  ;;  %v2667_v50 = vld [vmem:[%s4092_s30 + $0x60] sm:$0xff] }
  0xce   : > { %639 = vst [vmem:[%s4097_s0 + $0x41] sm:$0xff] %v2665_v29  ;;  %640 = vst [vmem:[%s4097_s0 + $0x49] sm:$0x1f] %v2666_v19  ;;  %v2668_v57 = vld [vmem:[%s4092_s30 + $0x68] sm:$0x1f]  ;;  %v2669_v51 = vld [vmem:[%s4092_s30 + $0x70] sm:$0xff] }
  0xcf   : > { %645 = vst [vmem:[%s4097_s0 + $0x4e] sm:$0xff] %v2667_v50  ;;  %646 = vst [vmem:[%s4097_s0 + $0x56] sm:$0x1f] %v2668_v57  ;;  %v2670_v54 = vld [vmem:[%s4092_s30 + $0x78] sm:$0x1f]  ;;  %v2671_v43 = vld [vmem:[%s4092_s30 + $0x80] sm:$0xff] }
  0xd0   : > { %651 = vst [vmem:[%s4097_s0 + $0x5b] sm:$0xff] %v2669_v51  ;;  %v2672_v6 = vld [vmem:[%s4092_s30 + $0x88] sm:$0x1f]  ;;  %652 = vst [vmem:[%s4097_s0 + $0x63] sm:$0x1f] %v2670_v54  ;;  %v2673_v59 = vld [vmem:[%s4092_s30 + $0x90] sm:$0xff] }
  0xd1   : > { %657 = vst [vmem:[%s4097_s0 + $0x68] sm:$0xff] %v2671_v43  ;;  %658 = vst [vmem:[%s4097_s0 + $0x70] sm:$0x1f] %v2672_v6  ;;  %v2674_v33 = vld [vmem:[%s4092_s30 + $0x98] sm:$0x1f]  ;;  %v2675_v13 = vld [vmem:[%s4092_s30 + $0xa0] sm:$0xff] }
  0xd2   : > { %663 = vst [vmem:[%s4097_s0 + $0x75] sm:$0xff] %v2673_v59  ;;  %664 = vst [vmem:[%s4097_s0 + $0x7d] sm:$0x1f] %v2674_v33  ;;  %v2676_v32 = vld [vmem:[%s4092_s30 + $0xa8] sm:$0x1f]  ;;  %v2677_v15 = vld [vmem:[%s4092_s30 + $0xb0] sm:$0xff] }
  0xd3   : > { %669 = vst [vmem:[%s4097_s0 + $0x82] sm:$0xff] %v2675_v13  ;;  %v2678_v44 = vld [vmem:[%s4092_s30 + $0xb8] sm:$0x1f]  ;;  %670 = vst [vmem:[%s4097_s0 + $0x8a] sm:$0x1f] %v2676_v32  ;;  %v2679_v0 = vld [vmem:[%s4092_s30 + $0xc0] sm:$0xff] }
  0xd4   : > { %675 = vst [vmem:[%s4097_s0 + $0x8f] sm:$0xff] %v2677_v15  ;;  %676 = vst [vmem:[%s4097_s0 + $0x97] sm:$0x1f] %v2678_v44  ;;  %v2680_v14 = vld [vmem:[%s4092_s30 + $0xc8] sm:$0x1f]  ;;  %601 = sbr.rel (!%p599_p4) target bundleno = 197 (0xc5), region = 237 }
  0xd5   : > { %681 = vst [vmem:[%s4097_s0 + $0x9c] sm:$0xff] %v2679_v0  ;;  %682 = vst [vmem:[%s4097_s0 + $0xa4] sm:$0x1f] %v2680_v14 }
  0xdb LB: > { %s4157_s10 = sshll.u32 %s3410_s6, 1  ;;  %s4201_s13 = smov 0   ;;  %s3410_s6 = sphi %s4151_s6, %s688_s6  }
  0xdc   : > { %s690_s9 = sld [smem:[#allocation12 + %s4157_s10]]  ;;  %s692_s5 = sadd.s32 1, %s4157_s10 }
  0xdd   : > { %s693_s11 = sld [smem:[#allocation12 + %s692_s5]] }
  0xe2   : > { %v691_v25 = vstv %s690_s9  }
  0xe3   : > { %v694_v4 = vstv %s693_s11   ;;  %v5171_v20 = vmov %v691_v25  ;;  %v5172_v41 = vmov %v691_v25  ;;  %v5173_v42 = vmov %v691_v25 }
  0xe4   : > { %v5162_v12 = vmov %v694_v4  ;;  %v5163_v24 = vmov %v694_v4  ;;  %v5164_v26 = vmov %v694_v4  ;;  %v5165_v3 = vmov %v694_v4 }
  0xe5   : > { %v5166_v17 = vmov %v694_v4  ;;  %v5167_v18 = vmov %v694_v4  ;;  %v5168_v49 = vmov %v694_v4  ;;  %v5169_v27 = vmov %v694_v4 }
  0xe6   : > { %v5170_v31 = vmov %v694_v4  ;;  %v5174_v55 = vmov %v691_v25  ;;  %v5175_v34 = vmov %v691_v25  ;;  %v5176_v21 = vmov %v691_v25 }
  0xe7   : > { %v5177_v62 = vmov %v691_v25  ;;  %v5178_v35 = vmov %v691_v25  ;;  %v5179_v2 = vmov %v691_v25 }
  0xe8 LB: >> { %s721_s2 = smul.u32 176, %s3494_s13  ;;  %s3494_s13 = sphi %s4201_s13, %s700_s13   ;;  %v3490_v25 = vphi %v691_v25, %v5216_v25   ;;  %v3486_v2 = vphi %v5179_v2, %v5215_v2   ;;  %v3482_v35 = vphi %v5178_v35, %v5214_v35   ;;  %v3478_v62 = vphi %v5177_v62, %v5213_v62   ;;  %v3474_v21 = vphi %v5176_v21, %v5212_v21   ;;  %v3470_v34 = vphi %v5175_v34, %v5211_v34   ;;  %v3466_v55 = vphi %v5174_v55, %v5210_v55   ;;  %v3462_v42 = vphi %v5173_v42, %v5209_v42   ;;  %v3458_v41 = vphi %v5172_v41, %v5208_v41   ;;  %v3454_v20 = vphi %v5171_v20, %v5207_v20   ;;  %v3450_v4 = vphi %v694_v4, %v5206_v4   ;;  %v3446_v31 = vphi %v5170_v31, %v5205_v31   ;;  %v3442_v27 = vphi %v5169_v27, %v5204_v27   ;;  %v3438_v49 = vphi %v5168_v49, %v5203_v49   ;;  %v3434_v18 = vphi %v5167_v18, %v5202_v18   ;;  %v3430_v17 = vphi %v5166_v17, %v5201_v17   ;;  %v3426_v3 = vphi %v5165_v3, %v5200_v3   ;;  %v3422_v26 = vphi %v5164_v26, %v5199_v26   ;;  %v3418_v24 = vphi %v5163_v24, %v5198_v24   ;;  %v3414_v12 = vphi %v5162_v12, %v5197_v12  }
  0xe9   : >> { %s4248_s14 = smul.u32 18, %s3494_s13  ;;  %s700_s13 = sadd.s32 1, %s3494_s13  }
  0xea   : >> { %s4254_s20 = scalar_lea.vmem [#allocation3], %s721_s2  ;;  %p4607_p5 = scmp.ge.s32.totalorder %s700_s13, 10  }
  0xeb   : >> { %s734_s15 = sadd.s32 %s4157_s10, %s4248_s14  ;;  %s790_s16 = sadd.s32 180, %s4248_s14  ;;  %v723_v52 = vld [vmem:[%s4254_s20] sm:$0xff]  ;;  %v724_v45 = vld [vmem:[%s4254_s20 + $0x8] sm:$0xff]  ;;  %v725_v16 = vld [vmem:[%s4254_s20 + $0x10] sm:$0xff] }
  0xec   : >> { %s735_s17 = sld [smem:[#allocation11 + %s734_s15]]  ;;  %s757_s18 = sadd.s32 1, %s734_s15  ;;  %v726_v46 = vld [vmem:[%s4254_s20 + $0x18] sm:$0xff]  ;;  %v727_v22 = vld [vmem:[%s4254_s20 + $0x20] sm:$0xff]  ;;  %v728_v61 = vld [vmem:[%s4254_s20 + $0x28] sm:$0xff] }
  0xed   : >> { %s791_s19 = sadd.s32 %s4157_s10, %s790_s16  ;;  %s4258_s21 = sld [smem:[#allocation11 + %s757_s18]]  ;;  %v729_v58 = vld [vmem:[%s4254_s20 + $0x30] sm:$0xff]  ;;  %v730_v60 = vld [vmem:[%s4254_s20 + $0x38] sm:$0xff]  ;;  %v731_v1 = vld [vmem:[%s4254_s20 + $0x40] sm:$0xff] }
  0xee   : >> { %s847_s22 = sadd.s32 360, %s4248_s14  ;;  %s814_s1 = sadd.s32 1, %s791_s19  ;;  %v732_v8 = vld [vmem:[%s4254_s20 + $0x48] sm:$0x7] }
  0xef   : >> { %s4265_s3 = sadd.s32 %s4157_s10, %s847_s22  ;;  %s4272_s23 = sld [smem:[#allocation11 + %s791_s19]]  ;;  %v780_v32 = vld [vmem:[%s4254_s20 + $0x1] sm:$0xff]  ;;  %v781_v15 = vld [vmem:[%s4254_s20 + $0x9] sm:$0xff] }
  0xf0   : >> { %s4274_s12 = sld [smem:[#allocation11 + %s814_s1]]  ;;  %s904_s25 = sadd.s32 540, %s4248_s14 }
  0xf1   : >> { %s4277_s24 = sld [smem:[#allocation11 + %s4265_s3]]  ;;  %s871_s26 = sadd.s32 1, %s4265_s3 }
  0xf2   : >> { %v736_v9 = vstv %s735_s17  ;;  %s4314_s4 = sadd.s32 %s4157_s10, %s904_s25  ;;  %s961_s27 = sadd.s32 720, %s4248_s14 }
  0xf3   : >> { %v737_v23 = vmul.f32 %v736_v9, %v723_v52  ;;  %v738_v28 = vmul.f32 %v736_v9, %v724_v45  ;;  %v739_v53 = vmul.f32 %v736_v9, %v725_v16  ;;  %v740_v37 = vmul.f32 %v736_v9, %v726_v46  ;;  %s4319_s28 = sld [smem:[#allocation11 + %s871_s26]]  ;;  %s928_s29 = sadd.s32 1, %s4314_s4 }
  0xf4   : >> { %v741_v63 = vmul.f32 %v736_v9, %v727_v22  ;;  %v742_v30 = vmul.f32 %v736_v9, %v728_v61  ;;  %v743_v47 = vmul.f32 %v736_v9, %v729_v58  ;;  %v744_v7 = vmul.f32 %v736_v9, %v730_v60  ;;  %s4332_s30 = sadd.s32 %s4157_s10, %s961_s27  ;;  %s4348_s0 = sld [smem:[#allocation11 + %s4314_s4]] }
  0xf5   : >> { %v745_v10 = vmul.f32 %v736_v9, %v731_v1  ;;  %v746_v48 = vmul.f32 %v736_v9, %v732_v8  ;;  %v747_v36 = vadd.f32 %v3490_v25, %v737_v23  ;;  %v748_v38 = vadd.f32 %v3486_v2, %v738_v28  ;;  %v782_v25 = vld [vmem:[%s4254_s20 + $0x11] sm:$0xff]  ;;  %v785_v2 = vld [vmem:[%s4254_s20 + $0x29] sm:$0xff]  ;;  %s4355_s9 = sld [smem:[#allocation11 + %s928_s29]]  ;;  %s1018_s11 = sadd.s32 900, %s4248_s14 }
  0xf6   : >> { %v749_v11 = vadd.f32 %v3482_v35, %v739_v53  ;;  %v750_v39 = vadd.f32 %v3478_v62, %v740_v37  ;;  %v751_v40 = vadd.f32 %v3474_v21, %v741_v63  ;;  %v752_v5 = vadd.f32 %v3470_v34, %v742_v30  ;;  %v784_v35 = vld [vmem:[%s4254_s20 + $0x21] sm:$0xff]  ;;  %s4358_s5 = sld [smem:[#allocation11 + %s4332_s30]]  ;;  %s985_s2 = sadd.s32 1, %s4332_s30 }
  0xf7   : >> { %v753_v56 = vadd.f32 %v3466_v55, %v743_v47  ;;  %v754_v29 = vadd.f32 %v3462_v42, %v744_v7  ;;  %v4279_v19 = vadd.f32 %v3458_v41, %v745_v10  ;;  %v4281_v50 = vadd.f32 %v3454_v20, %v746_v48  ;;  %v783_v20 = vld [vmem:[%s4254_s20 + $0x19] sm:$0xff]  ;;  %s4403_s15 = sadd.s32 %s4157_s10, %s1018_s11  ;;  %s1075_s16 = sadd.s32 1080, %s4248_s14 }
  0xf8   : >> { %v759_v57 = vstv %s4258_s21  ;;  %v793_v44 = vstv %s4272_s23  ;;  %v816_v41 = vstv %s4274_s12  ;;  %v4291_v42 = vstv %s4277_s24  ;;  %s4408_s17 = sld [smem:[#allocation11 + %s985_s2]]  ;;  %s1042_s18 = sadd.s32 1, %s4403_s15 }
  0xf9   : >> { %v760_v51 = vmul.f32 %v759_v57, %v723_v52  ;;  %v761_v54 = vmul.f32 %v759_v57, %v724_v45  ;;  %v762_v43 = vmul.f32 %v759_v57, %v725_v16  ;;  %v763_v6 = vmul.f32 %v759_v57, %v726_v46  ;;  %v786_v52 = vld [vmem:[%s4254_s20 + $0x31] sm:$0xff]  ;;  %s4417_s19 = sadd.s32 %s4157_s10, %s1075_s16  ;;  %s4425_s21 = sld [smem:[#allocation11 + %s4403_s15]] }
  0xfa   : >> { %v764_v59 = vmul.f32 %v759_v57, %v727_v22  ;;  %v765_v33 = vmul.f32 %v759_v57, %v728_v61  ;;  %v766_v13 = vmul.f32 %v759_v57, %v729_v58  ;;  %v767_v0 = vmul.f32 %v759_v57, %v730_v60  ;;  %v787_v61 = vld [vmem:[%s4254_s20 + $0x39] sm:$0xff]  ;;  %v788_v58 = vld [vmem:[%s4254_s20 + $0x41] sm:$0xff]  ;;  %v789_v60 = vld [vmem:[%s4254_s20 + $0x49] sm:$0x7]  ;;  %s4431_s22 = sld [smem:[#allocation11 + %s1042_s18]]  ;;  %s1132_s3 = sadd.s32 1260, %s4248_s14 }
  0xfb   : >> { %v768_v14 = vmul.f32 %v759_v57, %v731_v1  ;;  %v769_v55 = vmul.f32 %v759_v57, %v732_v8  ;;  %v770_v34 = vadd.f32 %v3450_v4, %v760_v51  ;;  %v771_v21 = vadd.f32 %v3446_v31, %v761_v54  ;;  %s4434_s1 = sld [smem:[#allocation11 + %s4417_s19]]  ;;  %s1099_s23 = sadd.s32 1, %s4417_s19 }
  0xfc   : >> { %v772_v62 = vadd.f32 %v3442_v27, %v762_v43  ;;  %v773_v45 = vadd.f32 %v3438_v49, %v763_v6  ;;  %v774_v16 = vadd.f32 %v3434_v18, %v764_v59  ;;  %v775_v46 = vadd.f32 %v3430_v17, %v765_v33  ;;  %v839_v6 = vld [vmem:[%s4254_s20 + $0x12] sm:$0xff]  ;;  %v4325_v59 = vld [vmem:[%s4254_s20 + $0x1a] sm:$0xff]  ;;  %s4466_s12 = sadd.s32 %s4157_s10, %s1132_s3  ;;  %s1189_s24 = sadd.s32 1440, %s4248_s14 }
  0xfd   : >> { %v776_v22 = vadd.f32 %v3426_v3, %v766_v13  ;;  %v794_v4 = vmul.f32 %v793_v44, %v780_v32  ;;  %v795_v1 = vmul.f32 %v793_v44, %v781_v15  ;;  %v796_v31 = vmul.f32 %v793_v44, %v782_v25  ;;  %s4469_s25 = sld [smem:[#allocation11 + %s1099_s23]]  ;;  %s1156_s14 = sadd.s32 1, %s4466_s12 }
  0xfe   : >> { %v797_v27 = vmul.f32 %v793_v44, %v783_v20  ;;  %v4307_v8 = vadd.f32 %v3422_v26, %v767_v0  ;;  %v798_v9 = vmul.f32 %v793_v44, %v784_v35  ;;  %v799_v23 = vmul.f32 %v793_v44, %v785_v2  ;;  %s4475_s26 = sadd.s32 %s4157_s10, %s1189_s24  ;;  %s4482_s4 = sld [smem:[#allocation11 + %s4466_s12]] }
  0xff   : >> { %v800_v49 = vmul.f32 %v793_v44, %v786_v52  ;;  %v778_v17 = vadd.f32 %v3418_v24, %v768_v14  ;;  %v779_v3 = vadd.f32 %v3414_v12, %v769_v55  ;;  %v801_v18 = vmul.f32 %v793_v44, %v787_v61  ;;  %v4344_v55 = vld [vmem:[%s4254_s20 + $0x42] sm:$0xff]  ;;  %s4492_s27 = sld [smem:[#allocation11 + %s1156_s14]]  ;;  %s1213_s29 = sadd.s32 1, %s4475_s26 }
 0x100   : >> { %v802_v28 = vmul.f32 %v793_v44, %v788_v58  ;;  %v803_v53 = vmul.f32 %v793_v44, %v789_v60  ;;  %v804_v37 = vadd.f32 %v794_v4, %v747_v36  ;;  %v805_v63 = vadd.f32 %v795_v1, %v748_v38  ;;  %v4341_v44 = vld [vmem:[%s4254_s20 + $0x3a] sm:$0xff]  ;;  %s4545_s30 = sld [smem:[#allocation11 + %s1213_s29]]  ;;  %s2726_s10 = sshll.u32 (%p4607_p5), %s3410_s6, 6 }
 0x101   : >> { %v806_v30 = vadd.f32 %v796_v31, %v749_v11  ;;  %v807_v26 = vadd.f32 %v797_v27, %v750_v39  ;;  %v808_v47 = vadd.f32 %v798_v9, %v751_v40  ;;  %v809_v7 = vadd.f32 %v799_v23, %v752_v5  ;;  %v837_v39 = vld [vmem:[%s4254_s20 + $0x2] sm:$0xff]  ;;  %v838_v40 = vld [vmem:[%s4254_s20 + $0xa] sm:$0xff]  ;;  %s1267_s13 = scalar_lea.vmem (%p4607_p5), [#allocation4], %s2726_s10  ;;  %s688_s6 = sadd.s32 (%p4607_p5), 1, %s3410_s6  }
 0x102   : >> { %v810_v10 = vadd.f32 %v800_v49, %v753_v56  ;;  %v817_v24 = vmul.f32 %v816_v41, %v780_v32  ;;  %v818_v12 = vmul.f32 %v816_v41, %v781_v15  ;;  %v819_v48 = vmul.f32 %v816_v41, %v782_v25  ;;  %p685_p6 = scmp.ge.s32.totalorder (%p4607_p5), %s688_s6, 9  }
 0x103   : >> { %v820_v36 = vmul.f32 %v816_v41, %v783_v20  ;;  %v811_v38 = vadd.f32 %v801_v18, %v754_v29  ;;  %v821_v11 = vmul.f32 %v816_v41, %v784_v35  ;;  %v822_v57 = vmul.f32 %v816_v41, %v785_v2  ;;  %v4328_v29 = vld [vmem:[%s4254_s20 + $0x22] sm:$0xff]  ;;  %v846_v35 = vld [vmem:[%s4254_s20 + $0x4a] sm:$0x7] }
 0x104   : >> { %v823_v51 = vmul.f32 %v816_v41, %v786_v52  ;;  %v812_v5 = vadd.f32 %v802_v28, %v4279_v19  ;;  %v813_v56 = vadd.f32 %v803_v53, %v4281_v50  ;;  %v824_v54 = vmul.f32 %v816_v41, %v787_v61  ;;  %v4335_v19 = vld [vmem:[%s4254_s20 + $0x2a] sm:$0xff]  ;;  %v4338_v50 = vld [vmem:[%s4254_s20 + $0x32] sm:$0xff] }
 0x105   : >> { %v825_v43 = vmul.f32 %v816_v41, %v788_v58  ;;  %v826_v33 = vmul.f32 %v816_v41, %v789_v60  ;;  %v827_v13 = vadd.f32 %v817_v24, %v770_v34  ;;  %v828_v32 = vadd.f32 %v818_v12, %v771_v21 }
 0x106   : >> { %v829_v15 = vadd.f32 %v819_v48, %v772_v62  ;;  %v830_v0 = vadd.f32 %v820_v36, %v773_v45  ;;  %v831_v14 = vadd.f32 %v821_v11, %v774_v16  ;;  %v832_v25 = vadd.f32 %v822_v57, %v775_v46  ;;  %v896_v48 = vld [vmem:[%s4254_s20 + $0x1d] sm:$0xff]  ;;  %v897_v36 = vld [vmem:[%s4254_s20 + $0x25] sm:$0xff] }
 0x107   : >> { %v833_v20 = vadd.f32 %v823_v51, %v776_v22  ;;  %v851_v41 = vmul.f32 %v4291_v42, %v837_v39  ;;  %v852_v34 = vmul.f32 %v4291_v42, %v838_v40  ;;  %v853_v21 = vmul.f32 %v4291_v42, %v839_v6 }
 0x108   : >> { %v854_v62 = vmul.f32 %v4291_v42, %v4325_v59  ;;  %v855_v2 = vmul.f32 %v4291_v42, %v4328_v29  ;;  %v856_v52 = vmul.f32 %v4291_v42, %v4335_v19  ;;  %v857_v45 = vmul.f32 %v4291_v42, %v4338_v50 }
 0x109   : >> { %v858_v16 = vmul.f32 %v4291_v42, %v4341_v44  ;;  %v834_v46 = vadd.f32 %v824_v54, %v4307_v8  ;;  %v835_v22 = vadd.f32 %v825_v43, %v778_v17  ;;  %v859_v61 = vmul.f32 %v4291_v42, %v4344_v55  ;;  %v900_v54 = vld [vmem:[%s4254_s20 + $0x3d] sm:$0xff] }
 0x10a   : >> { %v860_v58 = vmul.f32 %v4291_v42, %v846_v35  ;;  %v836_v60 = vadd.f32 %v826_v33, %v779_v3  ;;  %v861_v4 = vadd.f32 %v851_v41, %v804_v37  ;;  %v862_v1 = vadd.f32 %v852_v34, %v805_v63  ;;  %v901_v34 = vld [vmem:[%s4254_s20 + $0x45] sm:$0xff] }
 0x10b   : >> { %v863_v31 = vadd.f32 %v853_v21, %v806_v30  ;;  %v864_v27 = vadd.f32 %v854_v62, %v807_v26  ;;  %v865_v9 = vadd.f32 %v855_v2, %v808_v47  ;;  %v866_v23 = vadd.f32 %v856_v52, %v809_v7  ;;  %v894_v47 = vld [vmem:[%s4254_s20 + $0xd] sm:$0xff]  ;;  %v895_v7 = vld [vmem:[%s4254_s20 + $0x15] sm:$0xff] }
 0x10c   : >> { %v867_v49 = vadd.f32 %v857_v45, %v810_v10  ;;  %v868_v18 = vadd.f32 %v858_v16, %v811_v38  ;;  %v4372_v8 = vadd.f32 %v859_v61, %v812_v5  ;;  %v4374_v17 = vadd.f32 %v860_v58, %v813_v56  ;;  %v898_v5 = vld [vmem:[%s4254_s20 + $0x2d] sm:$0xff]  ;;  %v899_v56 = vld [vmem:[%s4254_s20 + $0x35] sm:$0xff] }
 0x10d   : >> { %v873_v42 = vstv %s4319_s28  ;;  %v907_v10 = vstv %s4348_s0  ;;  %v930_v38 = vstv %s4355_s9  ;;  %v4390_v11 = vstv %s4358_s5  ;;  %s4495_s28 = sld [smem:[#allocation11 + %s4475_s26]] }
 0x10e   : >> { %v874_v3 = vmul.f32 %v873_v42, %v837_v39  ;;  %v875_v28 = vmul.f32 %v873_v42, %v838_v40  ;;  %v876_v53 = vmul.f32 %v873_v42, %v839_v6  ;;  %v877_v37 = vmul.f32 %v873_v42, %v4325_v59  ;;  %v902_v21 = vld [vmem:[%s4254_s20 + $0x4d] sm:$0xff]  ;;  %v903_v62 = vld [vmem:[%s4254_s20 + $0x55] sm:$0x7] }
 0x10f   : >> { %v878_v63 = vmul.f32 %v873_v42, %v4328_v29  ;;  %v879_v30 = vmul.f32 %v873_v42, %v4335_v19  ;;  %v880_v26 = vmul.f32 %v873_v42, %v4338_v50  ;;  %v881_v24 = vmul.f32 %v873_v42, %v4341_v44 }
 0x110   : >> { %v882_v12 = vmul.f32 %v873_v42, %v4344_v55  ;;  %v883_v57 = vmul.f32 %v873_v42, %v846_v35  ;;  %v884_v51 = vadd.f32 %v874_v3, %v827_v13  ;;  %v885_v39 = vadd.f32 %v875_v28, %v828_v32 }
 0x111   : >> { %v886_v40 = vadd.f32 %v876_v53, %v829_v15  ;;  %v887_v43 = vadd.f32 %v877_v37, %v830_v0  ;;  %v888_v6 = vadd.f32 %v878_v63, %v831_v14  ;;  %v889_v33 = vadd.f32 %v879_v30, %v832_v25 }
 0x112   : >> { %v890_v41 = vadd.f32 %v880_v26, %v833_v20  ;;  %v908_v2 = vmul.f32 %v907_v10, %v894_v47  ;;  %v909_v52 = vmul.f32 %v907_v10, %v895_v7  ;;  %v910_v45 = vmul.f32 %v907_v10, %v896_v48 }
 0x113   : >> { %v911_v16 = vmul.f32 %v907_v10, %v897_v36  ;;  %v4398_v35 = vadd.f32 %v881_v24, %v834_v46  ;;  %v912_v13 = vmul.f32 %v907_v10, %v898_v5  ;;  %v913_v32 = vmul.f32 %v907_v10, %v899_v56  ;;  %v954_v24 = vld [vmem:[%s4254_s20 + $0x26] sm:$0xff] }
 0x114   : >> { %v914_v15 = vmul.f32 %v907_v10, %v900_v54  ;;  %v892_v0 = vadd.f32 %v882_v12, %v835_v22  ;;  %v893_v14 = vadd.f32 %v883_v57, %v836_v60  ;;  %v915_v25 = vmul.f32 %v907_v10, %v901_v34 }
 0x115   : >> { %v916_v20 = vmul.f32 %v907_v10, %v902_v21  ;;  %v917_v61 = vmul.f32 %v907_v10, %v903_v62  ;;  %v918_v58 = vadd.f32 %v908_v2, %v861_v4  ;;  %v919_v42 = vadd.f32 %v909_v52, %v862_v1  ;;  %v953_v10 = vld [vmem:[%s4254_s20 + $0x1e] sm:$0xff]  ;;  %v959_v2 = vld [vmem:[%s4254_s20 + $0x4e] sm:$0xff]  ;;  %v960_v52 = vld [vmem:[%s4254_s20 + $0x56] sm:$0x7] }
 0x116   : >> { %v920_v3 = vadd.f32 %v910_v45, %v863_v31  ;;  %v921_v28 = vadd.f32 %v911_v16, %v864_v27  ;;  %v922_v46 = vadd.f32 %v912_v13, %v865_v9  ;;  %v923_v53 = vadd.f32 %v913_v32, %v866_v23  ;;  %v951_v27 = vld [vmem:[%s4254_s20 + $0xe] sm:$0xff]  ;;  %v952_v9 = vld [vmem:[%s4254_s20 + $0x16] sm:$0xff] }
 0x117   : >> { %v924_v37 = vadd.f32 %v914_v15, %v867_v49  ;;  %v931_v63 = vmul.f32 %v930_v38, %v894_v47  ;;  %v932_v22 = vmul.f32 %v930_v38, %v895_v7  ;;  %v933_v60 = vmul.f32 %v930_v38, %v896_v48 }
 0x118   : >> { %v934_v4 = vmul.f32 %v930_v38, %v897_v36  ;;  %v925_v1 = vadd.f32 %v915_v25, %v868_v18  ;;  %v935_v31 = vmul.f32 %v930_v38, %v898_v5  ;;  %v936_v30 = vmul.f32 %v930_v38, %v899_v56  ;;  %v955_v18 = vld [vmem:[%s4254_s20 + $0x2e] sm:$0xff]  ;;  %v956_v5 = vld [vmem:[%s4254_s20 + $0x36] sm:$0xff]  ;;  %v958_v56 = vld [vmem:[%s4254_s20 + $0x46] sm:$0xff] }
 0x119   : >> { %v937_v26 = vmul.f32 %v930_v38, %v900_v54  ;;  %v926_v23 = vadd.f32 %v916_v20, %v4372_v8  ;;  %v927_v49 = vadd.f32 %v917_v61, %v4374_v17  ;;  %v938_v47 = vmul.f32 %v930_v38, %v901_v34  ;;  %v957_v8 = vld [vmem:[%s4254_s20 + $0x3e] sm:$0xff] }
 0x11a   : >> { %v939_v7 = vmul.f32 %v930_v38, %v902_v21  ;;  %v940_v12 = vmul.f32 %v930_v38, %v903_v62  ;;  %v941_v48 = vadd.f32 %v931_v63, %v884_v51  ;;  %v942_v36 = vadd.f32 %v932_v22, %v885_v39 }
 0x11b   : >> { %v943_v57 = vadd.f32 %v933_v60, %v886_v40  ;;  %v944_v17 = vadd.f32 %v934_v4, %v887_v43  ;;  %v945_v54 = vadd.f32 %v935_v31, %v888_v6  ;;  %v946_v34 = vadd.f32 %v936_v30, %v889_v33 }
 0x11c   : >> { %v947_v21 = vadd.f32 %v937_v26, %v890_v41  ;;  %v965_v45 = vmul.f32 %v4390_v11, %v951_v27  ;;  %v966_v16 = vmul.f32 %v4390_v11, %v952_v9  ;;  %v967_v38 = vmul.f32 %v4390_v11, %v953_v10 }
 0x11d   : >> { %v968_v51 = vmul.f32 %v4390_v11, %v954_v24  ;;  %v969_v39 = vmul.f32 %v4390_v11, %v955_v18  ;;  %v970_v40 = vmul.f32 %v4390_v11, %v956_v5  ;;  %v971_v43 = vmul.f32 %v4390_v11, %v957_v8 }
 0x11e   : >> { %v972_v6 = vmul.f32 %v4390_v11, %v958_v56  ;;  %v948_v33 = vadd.f32 %v938_v47, %v4398_v35  ;;  %v949_v41 = vadd.f32 %v939_v7, %v892_v0  ;;  %v973_v62 = vmul.f32 %v4390_v11, %v959_v2 }
 0x11f   : >> { %v974_v13 = vmul.f32 %v4390_v11, %v960_v52  ;;  %v950_v32 = vadd.f32 %v940_v12, %v893_v14  ;;  %v975_v15 = vadd.f32 %v965_v45, %v918_v58  ;;  %v976_v25 = vadd.f32 %v966_v16, %v919_v42  ;;  %v1013_v12 = vld [vmem:[%s4254_s20 + $0x37] sm:$0xff]  ;;  %v1015_v16 = vld [vmem:[%s4254_s20 + $0x47] sm:$0xff] }
 0x120   : >> { %v977_v20 = vadd.f32 %v967_v38, %v920_v3  ;;  %v978_v61 = vadd.f32 %v968_v51, %v921_v28  ;;  %v979_v63 = vadd.f32 %v969_v39, %v922_v46  ;;  %v980_v22 = vadd.f32 %v970_v40, %v923_v53  ;;  %v1008_v53 = vld [vmem:[%s4254_s20 + $0xf] sm:$0xff]  ;;  %v1017_v51 = vld [vmem:[%s4254_s20 + $0x57] sm:$0x7] }
 0x121   : >> { %v981_v60 = vadd.f32 %v971_v43, %v924_v37  ;;  %v982_v4 = vadd.f32 %v972_v6, %v925_v1  ;;  %v4443_v31 = vadd.f32 %v973_v62, %v926_v23  ;;  %v4445_v35 = vadd.f32 %v974_v13, %v927_v49  ;;  %v1009_v37 = vld [vmem:[%s4254_s20 + $0x17] sm:$0xff]  ;;  %v1010_v23 = vld [vmem:[%s4254_s20 + $0x1f] sm:$0xff]  ;;  %v1011_v49 = vld [vmem:[%s4254_s20 + $0x27] sm:$0xff] }
 0x122   : >> { %v987_v11 = vstv %s4408_s17  ;;  %v1021_v1 = vstv %s4425_s21  ;;  %v1016_v38 = vld [vmem:[%s4254_s20 + $0x4f] sm:$0xff] }
 0x123   : >> { %v988_v0 = vmul.f32 %v987_v11, %v951_v27  ;;  %v989_v14 = vmul.f32 %v987_v11, %v952_v9  ;;  %v990_v58 = vmul.f32 %v987_v11, %v953_v10  ;;  %v991_v42 = vmul.f32 %v987_v11, %v954_v24 }
 0x124   : >> { %v992_v3 = vmul.f32 %v987_v11, %v955_v18  ;;  %v993_v28 = vmul.f32 %v987_v11, %v956_v5  ;;  %v994_v46 = vmul.f32 %v987_v11, %v957_v8  ;;  %v995_v30 = vmul.f32 %v987_v11, %v958_v56  ;;  %v1012_v18 = vld [vmem:[%s4254_s20 + $0x2f] sm:$0xff]  ;;  %v1014_v5 = vld [vmem:[%s4254_s20 + $0x3f] sm:$0xff] }
 0x125   : >> { %v996_v26 = vmul.f32 %v987_v11, %v959_v2  ;;  %v1044_v27 = vstv %s4431_s22  ;;  %v4455_v9 = vstv %s4434_s1  ;;  %v997_v47 = vmul.f32 %v987_v11, %v960_v52 }
 0x126   : >> { %v998_v7 = vadd.f32 %v988_v0, %v941_v48  ;;  %v999_v10 = vadd.f32 %v989_v14, %v942_v36  ;;  %v1000_v24 = vadd.f32 %v990_v58, %v943_v57  ;;  %v1001_v8 = vadd.f32 %v991_v42, %v944_v17 }
 0x127   : >> { %v1002_v45 = vadd.f32 %v992_v3, %v945_v54  ;;  %v1003_v56 = vadd.f32 %v993_v28, %v946_v34  ;;  %v1004_v2 = vadd.f32 %v994_v46, %v947_v21  ;;  %v1022_v39 = vmul.f32 %v1021_v1, %v1008_v53 }
 0x128   : >> { %v1023_v40 = vmul.f32 %v1021_v1, %v1009_v37  ;;  %v1024_v43 = vmul.f32 %v1021_v1, %v1010_v23  ;;  %v1025_v6 = vmul.f32 %v1021_v1, %v1011_v49  ;;  %v1005_v52 = vadd.f32 %v995_v30, %v948_v33  ;;  %v1071_v30 = vld [vmem:[%s4254_s20 + $0x4a] sm:$0xff] }
 0x129   : >> { %v1026_v48 = vmul.f32 %v1021_v1, %v1012_v18  ;;  %v1027_v36 = vmul.f32 %v1021_v1, %v1013_v12  ;;  %v1028_v57 = vmul.f32 %v1021_v1, %v1014_v5  ;;  %v1006_v62 = vadd.f32 %v996_v26, %v949_v41  ;;  %v1072_v26 = vld [vmem:[%s4254_s20 + $0x52] sm:$0xff] }
 0x12a   : >> { %v1007_v17 = vadd.f32 %v997_v47, %v950_v32  ;;  %v1029_v54 = vmul.f32 %v1021_v1, %v1015_v16  ;;  %v1030_v34 = vmul.f32 %v1021_v1, %v1016_v38  ;;  %v1031_v21 = vmul.f32 %v1021_v1, %v1017_v51 }
 0x12b   : >> { %v1032_v13 = vadd.f32 %v1022_v39, %v975_v15  ;;  %v1033_v11 = vadd.f32 %v1023_v40, %v976_v25  ;;  %v1034_v0 = vadd.f32 %v1024_v43, %v977_v20  ;;  %v1035_v14 = vadd.f32 %v1025_v6, %v978_v61 }
 0x12c   : >> { %v1036_v58 = vadd.f32 %v1026_v48, %v979_v63  ;;  %v1037_v42 = vadd.f32 %v1027_v36, %v980_v22  ;;  %v1038_v3 = vadd.f32 %v1028_v57, %v981_v60  ;;  %v1045_v33 = vmul.f32 %v1044_v27, %v1008_v53 }
 0x12d   : >> { %v1046_v28 = vmul.f32 %v1044_v27, %v1009_v37  ;;  %v1047_v41 = vmul.f32 %v1044_v27, %v1010_v23  ;;  %v1048_v32 = vmul.f32 %v1044_v27, %v1011_v49  ;;  %v1039_v46 = vadd.f32 %v1029_v54, %v982_v4 }
 0x12e   : >> { %v1049_v15 = vmul.f32 %v1044_v27, %v1012_v18  ;;  %v1050_v25 = vmul.f32 %v1044_v27, %v1013_v12  ;;  %v1051_v20 = vmul.f32 %v1044_v27, %v1014_v5  ;;  %v1040_v61 = vadd.f32 %v1030_v34, %v4443_v31  ;;  %v1073_v18 = vld [vmem:[%s4254_s20 + $0x5a] sm:$0xff] }
 0x12f   : >> { %v1041_v63 = vadd.f32 %v1031_v21, %v4445_v35  ;;  %v1052_v22 = vmul.f32 %v1044_v27, %v1015_v16  ;;  %v1053_v60 = vmul.f32 %v1044_v27, %v1016_v38  ;;  %v1054_v53 = vmul.f32 %v1044_v27, %v1017_v51  ;;  %v1074_v35 = vld [vmem:[%s4254_s20 + $0x62] sm:$0x7] }
 0x130   : >> { %v1055_v4 = vadd.f32 %v1045_v33, %v998_v7  ;;  %v1056_v37 = vadd.f32 %v1046_v28, %v999_v10  ;;  %v1057_v1 = vadd.f32 %v1047_v41, %v1000_v24  ;;  %v1058_v23 = vadd.f32 %v1048_v32, %v1001_v8 }
 0x131   : >> { %v1059_v49 = vadd.f32 %v1049_v15, %v1002_v45  ;;  %v1060_v31 = vadd.f32 %v1050_v25, %v1003_v56  ;;  %v1061_v47 = vadd.f32 %v1051_v20, %v1004_v2  ;;  %v1079_v12 = vmul.f32 %v4455_v9, %v4325_v59  ;;  %v1127_v15 = vld [vmem:[%s4254_s20 + $0x43] sm:$0xff]  ;;  %v1128_v25 = vld [vmem:[%s4254_s20 + $0x4b] sm:$0xff] }
 0x132   : >> { %v1080_v27 = vmul.f32 %v4455_v9, %v4328_v29  ;;  %v1081_v7 = vmul.f32 %v4455_v9, %v4335_v19  ;;  %v1082_v10 = vmul.f32 %v4455_v9, %v4338_v50  ;;  %v1083_v24 = vmul.f32 %v4455_v9, %v4341_v44 }
 0x133   : >> { %v1084_v5 = vmul.f32 %v4455_v9, %v4344_v55  ;;  %v1085_v8 = vmul.f32 %v4455_v9, %v1071_v30  ;;  %v1086_v45 = vmul.f32 %v4455_v9, %v1072_v26  ;;  %v1062_v56 = vadd.f32 %v1052_v22, %v1005_v52 }
 0x134   : >> { %v1063_v2 = vadd.f32 %v1053_v60, %v1006_v62  ;;  %v1087_v16 = vmul.f32 %v4455_v9, %v1073_v18  ;;  %v1088_v38 = vmul.f32 %v4455_v9, %v1074_v35  ;;  %v1064_v51 = vadd.f32 %v1054_v53, %v1007_v17  ;;  %v1129_v60 = vld [vmem:[%s4254_s20 + $0x53] sm:$0xff]  ;;  %v1130_v53 = vld [vmem:[%s4254_s20 + $0x5b] sm:$0xff] }
 0x135   : >> { %v1089_v39 = vadd.f32 %v1079_v12, %v1032_v13  ;;  %v1090_v40 = vadd.f32 %v1080_v27, %v1033_v11  ;;  %v1091_v43 = vadd.f32 %v1081_v7, %v1034_v0  ;;  %v1092_v6 = vadd.f32 %v1082_v10, %v1035_v14 }
 0x136   : >> { %v1093_v48 = vadd.f32 %v1083_v24, %v1036_v58  ;;  %v1094_v36 = vadd.f32 %v1084_v5, %v1037_v42  ;;  %v1095_v57 = vadd.f32 %v1085_v8, %v1038_v3  ;;  %v1096_v54 = vadd.f32 %v1086_v45, %v1039_v46  ;;  %v1122_v58 = vld [vmem:[%s4254_s20 + $0x1b] sm:$0xff]  ;;  %v1123_v42 = vld [vmem:[%s4254_s20 + $0x23] sm:$0xff] }
 0x137   : >> { %v4505_v34 = vadd.f32 %v1087_v16, %v1040_v61  ;;  %v4507_v52 = vadd.f32 %v1088_v38, %v1041_v63  ;;  %v1101_v9 = vstv %s4469_s25  ;;  %v1135_v3 = vstv %s4482_s4  ;;  %v1126_v46 = vld [vmem:[%s4254_s20 + $0x3b] sm:$0xff] }
 0x138   : >> { %v1102_v62 = vmul.f32 %v1101_v9, %v4325_v59  ;;  %v1103_v17 = vmul.f32 %v1101_v9, %v4328_v29  ;;  %v1104_v21 = vmul.f32 %v1101_v9, %v4335_v19  ;;  %v1105_v13 = vmul.f32 %v1101_v9, %v4338_v50  ;;  %v1124_v59 = vld [vmem:[%s4254_s20 + $0x2b] sm:$0xff]  ;;  %v1125_v29 = vld [vmem:[%s4254_s20 + $0x33] sm:$0xff] }
 0x139   : >> { %v1106_v11 = vmul.f32 %v1101_v9, %v4341_v44  ;;  %v1107_v0 = vmul.f32 %v1101_v9, %v4344_v55  ;;  %v1108_v14 = vmul.f32 %v1101_v9, %v1071_v30  ;;  %v1109_v33 = vmul.f32 %v1101_v9, %v1072_v26  ;;  %v1131_v30 = vld [vmem:[%s4254_s20 + $0x63] sm:$0x7] }
 0x13a   : >> { %v1110_v28 = vmul.f32 %v1101_v9, %v1073_v18  ;;  %v1158_v19 = vstv %s4492_s27  ;;  %v4523_v50 = vstv %s4495_s28  ;;  %v1111_v44 = vmul.f32 %v1101_v9, %v1074_v35 }
 0x13b   : >> { %v1112_v41 = vadd.f32 %v1102_v62, %v1055_v4  ;;  %v1113_v32 = vadd.f32 %v1103_v17, %v1056_v37  ;;  %v1114_v55 = vadd.f32 %v1104_v21, %v1057_v1  ;;  %v1115_v20 = vadd.f32 %v1105_v13, %v1058_v23  ;;  %v1181_v13 = vld [vmem:[%s4254_s20 + $0x2c] sm:$0xff] }
 0x13c   : >> { %v1116_v61 = vadd.f32 %v1106_v11, %v1059_v49  ;;  %v1117_v63 = vadd.f32 %v1107_v0, %v1060_v31  ;;  %v1118_v22 = vadd.f32 %v1108_v14, %v1061_v47  ;;  %v1136_v26 = vmul.f32 %v1135_v3, %v1122_v58  ;;  %v1182_v11 = vld [vmem:[%s4254_s20 + $0x34] sm:$0xff]  ;;  %v1183_v0 = vld [vmem:[%s4254_s20 + $0x3c] sm:$0xff] }
 0x13d   : >> { %v1137_v18 = vmul.f32 %v1135_v3, %v1123_v42  ;;  %v1138_v12 = vmul.f32 %v1135_v3, %v1124_v59  ;;  %v1139_v27 = vmul.f32 %v1135_v3, %v1125_v29  ;;  %v4531_v7 = vadd.f32 %v1109_v33, %v1062_v56  ;;  %v1185_v33 = vld [vmem:[%s4254_s20 + $0x4c] sm:$0xff] }
 0x13e   : >> { %v1140_v4 = vmul.f32 %v1135_v3, %v1126_v46  ;;  %v1141_v37 = vmul.f32 %v1135_v3, %v1127_v15  ;;  %v1142_v1 = vmul.f32 %v1135_v3, %v1128_v25  ;;  %v4533_v35 = vadd.f32 %v1110_v28, %v1063_v2  ;;  %v1186_v28 = vld [vmem:[%s4254_s20 + $0x54] sm:$0xff] }
 0x13f   : >> { %v4535_v10 = vadd.f32 %v1111_v44, %v1064_v51  ;;  %v1143_v23 = vmul.f32 %v1135_v3, %v1129_v60  ;;  %v1144_v49 = vmul.f32 %v1135_v3, %v1130_v53  ;;  %v1145_v31 = vmul.f32 %v1135_v3, %v1131_v30  ;;  %v1184_v3 = vld [vmem:[%s4254_s20 + $0x44] sm:$0xff]  ;;  %v1187_v44 = vld [vmem:[%s4254_s20 + $0x5c] sm:$0xff] }
 0x140   : >> { %v1146_v47 = vadd.f32 %v1136_v26, %v1089_v39  ;;  %v1147_v24 = vadd.f32 %v1137_v18, %v1090_v40  ;;  %v1148_v5 = vadd.f32 %v1138_v12, %v1091_v43  ;;  %v1149_v8 = vadd.f32 %v1139_v27, %v1092_v6  ;;  %v1179_v40 = vld [vmem:[%s4254_s20 + $0x1c] sm:$0xff]  ;;  %v1180_v43 = vld [vmem:[%s4254_s20 + $0x24] sm:$0xff] }
 0x141   : >> { %v1150_v45 = vadd.f32 %v1140_v4, %v1093_v48  ;;  %v1151_v56 = vadd.f32 %v1141_v37, %v1094_v36  ;;  %v1152_v16 = vadd.f32 %v1142_v1, %v1095_v57  ;;  %v1159_v38 = vmul.f32 %v1158_v19, %v1122_v58 }
 0x142   : >> { %v1160_v2 = vmul.f32 %v1158_v19, %v1123_v42  ;;  %v1161_v51 = vmul.f32 %v1158_v19, %v1124_v59  ;;  %v1162_v9 = vmul.f32 %v1158_v19, %v1125_v29  ;;  %v1153_v62 = vadd.f32 %v1143_v23, %v1096_v54 }
 0x143   : >> { %v1163_v17 = vmul.f32 %v1158_v19, %v1126_v46  ;;  %v1164_v21 = vmul.f32 %v1158_v19, %v1127_v15  ;;  %v1165_v39 = vmul.f32 %v1158_v19, %v1128_v25  ;;  %v1154_v6 = vadd.f32 %v1144_v49, %v4505_v34  ;;  %v1188_v46 = vld [vmem:[%s4254_s20 + $0x64] sm:$0x7] }
 0x144   : >> { %v1155_v48 = vadd.f32 %v1145_v31, %v4507_v52  ;;  %v1166_v36 = vmul.f32 %v1158_v19, %v1129_v60  ;;  %v1167_v57 = vmul.f32 %v1158_v19, %v1130_v53  ;;  %v1168_v54 = vmul.f32 %v1158_v19, %v1131_v30 }
 0x145   : >> { %v1169_v14 = vadd.f32 %v1159_v38, %v1112_v41  ;;  %v1170_v58 = vadd.f32 %v1160_v2, %v1113_v32  ;;  %v1171_v42 = vadd.f32 %v1161_v51, %v1114_v55  ;;  %v1172_v59 = vadd.f32 %v1162_v9, %v1115_v20 }
 0x146   : >> { %v1173_v34 = vadd.f32 %v1163_v17, %v1116_v61  ;;  %v1174_v29 = vadd.f32 %v1164_v21, %v1117_v63  ;;  %v1175_v52 = vadd.f32 %v1165_v39, %v1118_v22  ;;  %v1193_v15 = vmul.f32 %v4523_v50, %v1179_v40 }
 0x147   : >> { %v1194_v25 = vmul.f32 %v4523_v50, %v1180_v43  ;;  %v1195_v60 = vmul.f32 %v4523_v50, %v1181_v13  ;;  %v1196_v19 = vmul.f32 %v4523_v50, %v1182_v11  ;;  %v1197_v41 = vmul.f32 %v4523_v50, %v1183_v0 }
 0x148   : >> { %v1198_v32 = vmul.f32 %v4523_v50, %v1184_v3  ;;  %v1199_v55 = vmul.f32 %v4523_v50, %v1185_v33  ;;  %v1200_v20 = vmul.f32 %v4523_v50, %v1186_v28  ;;  %v1201_v61 = vmul.f32 %v4523_v50, %v1187_v44 }
 0x149   : >> { %v1202_v63 = vmul.f32 %v4523_v50, %v1188_v46  ;;  %v4562_v22 = vadd.f32 %v1193_v15, %v1146_v47   ;;  %v4564_v2 = vadd.f32 %v1194_v25, %v1147_v24   ;;  %v4566_v30 = vadd.f32 %v1195_v60, %v1148_v5  }
 0x14a   : >> { %v4568_v26 = vadd.f32 %v1196_v19, %v1149_v8   ;;  %v4570_v21 = vadd.f32 %v1197_v41, %v1150_v45   ;;  %v4572_v18 = vadd.f32 %v1198_v32, %v1151_v56   ;;  %v4574_v55 = vadd.f32 %v1199_v55, %v1152_v16  }
 0x14b   : >> { %v5180_v53 = vmov %v4564_v2  ;;  %v4576_v12 = vadd.f32 %v1200_v20, %v1153_v62   ;;  %v4578_v41 = vadd.f32 %v1201_v61, %v1154_v6   ;;  %v4580_v20 = vadd.f32 %v1202_v63, %v1155_v48  }
 0x14c   : >> { %v5181_v37 = vmov %v4568_v26  ;;  %v5182_v1 = vmov %v4570_v21  ;;  %v5183_v23 = vmov %v4572_v18  ;;  %v5184_v38 = vmov %v4574_v55 }
 0x14d   : >> { %v5185_v51 = vmov %v4576_v12  ;;  %v5186_v9 = vmov %v4578_v41  ;;  %v5187_v50 = vmov %v4580_v20  ;;  %v1176_v27 = vadd.f32 %v1166_v36, %v4531_v7 }
 0x14e   : >> { %v1177_v4 = vadd.f32 %v1167_v57, %v4533_v35  ;;  %v1178_v49 = vadd.f32 %v1168_v54, %v4535_v10  ;;  %v1215_v31 = vstv %s4545_s30  ;;  %v5207_v20 = vmov %v5187_v50 }
 0x14f   : >> { %v1216_v47 = vmul.f32 %v1215_v31, %v1179_v40  ;;  %v1217_v24 = vmul.f32 %v1215_v31, %v1180_v43  ;;  %v1218_v5 = vmul.f32 %v1215_v31, %v1181_v13  ;;  %v1219_v8 = vmul.f32 %v1215_v31, %v1182_v11 }
 0x150   : >> { %v1220_v45 = vmul.f32 %v1215_v31, %v1183_v0  ;;  %v1221_v56 = vmul.f32 %v1215_v31, %v1184_v3  ;;  %v1222_v16 = vmul.f32 %v1215_v31, %v1185_v33  ;;  %v1223_v2 = vmul.f32 %v1215_v31, %v1186_v28 }
 0x151   : >> { %v1224_v62 = vmul.f32 %v1215_v31, %v1187_v44  ;;  %v1225_v17 = vmul.f32 %v1215_v31, %v1188_v46  ;;  %v4586_v21 = vadd.f32 %v1216_v47, %v1169_v14   ;;  %v4588_v31 = vadd.f32 %v1217_v24, %v1170_v58  }
 0x152   : >> { %v4590_v7 = vadd.f32 %v1218_v5, %v1171_v42   ;;  %v4592_v35 = vadd.f32 %v1219_v8, %v1172_v59   ;;  %v4594_v18 = vadd.f32 %v1220_v45, %v1173_v34   ;;  %v4596_v40 = vadd.f32 %v1221_v56, %v1174_v29  }
 0x153   : >> { %v5188_v39 = vmov %v4586_v21  ;;  %v5189_v6 = vmov %v4588_v31  ;;  %v4598_v3 = vadd.f32 %v1222_v16, %v1175_v52   ;;  %v4600_v26 = vadd.f32 %v1223_v2, %v1176_v27  }
 0x154   : >> { %v5190_v48 = vmov %v4592_v35  ;;  %v5191_v10 = vmov %v4594_v18  ;;  %v4602_v24 = vadd.f32 %v1224_v62, %v1177_v4   ;;  %v4604_v12 = vadd.f32 %v1225_v17, %v1178_v49   ;;  %699 = sbr.rel (!%p4607_p5) target bundleno = 232 (0xe8), region = 248 }
 0x155   : >> { %v5192_v43 = vmov %v4598_v3  ;;  %v5193_v36 = vmov %v4600_v26  ;;  %v5201_v17 = vmov %v4596_v40  ;;  %v5202_v18 = vmov %v5191_v10 }
 0x156   : >> { %v5194_v57 = vmov %v4602_v24  ;;  %v5195_v13 = vmov %v4604_v12  ;;  %v5199_v26 = vmov %v5193_v36  ;;  %v5200_v3 = vmov %v5192_v43 }
 0x157   : >> { %v5197_v12 = vmov %v5195_v13  ;;  %v5198_v24 = vmov %v5194_v57  ;;  %v5203_v49 = vmov %v5190_v48  ;;  %v5204_v27 = vmov %v4590_v7 }
 0x158   : >> { %v5205_v31 = vmov %v5189_v6  ;;  %v5206_v4 = vmov %v5188_v39  ;;  %v5208_v41 = vmov %v5186_v9  ;;  %v5209_v42 = vmov %v5185_v51 }
 0x159   : >> { %v5210_v55 = vmov %v5184_v38  ;;  %v5211_v34 = vmov %v5183_v23  ;;  %v5212_v21 = vmov %v5182_v1  ;;  %v5213_v62 = vmov %v5181_v37 }
 0x15a   : >> { %v5214_v35 = vmov %v4566_v30  ;;  %v5215_v2 = vmov %v5180_v53  ;;  %v5216_v25 = vmov %v4562_v22  ;;  %v1236_v11 = vmax.f32 (%p4607_p5), %v4562_v22, 0.0 }
 0x15b   : > { %v1237_v0 = vmax.f32 %v5180_v53, 0.0  ;;  %v1238_v54 = vmax.f32 %v4566_v30, 0.0  ;;  %v1239_v14 = vmax.f32 %v5181_v37, 0.0  ;;  %v1240_v58 = vmax.f32 %v5182_v1, 0.0  ;;  %s4701_s0 = smov (%p685_p6), 0  }
 0x15c   : > { %v1241_v33 = vmax.f32 %v5183_v23, 0.0  ;;  %v1242_v28 = vmax.f32 %v5184_v38, 0.0  ;;  %v1243_v59 = vmax.f32 %v5185_v51, 0.0  ;;  %1246 = vst [vmem:[#allocation6] sm:$0xff] %v1236_v11  ;;  %v1244_v42 = vmax.f32 %v5186_v9, 0.0 }
 0x15d   : > { %1247 = vst [vmem:[#allocation6 + $0x8] sm:$0xff] %v1237_v0  ;;  %1248 = vst [vmem:[#allocation6 + $0x10] sm:$0xff] %v1238_v54  ;;  %v1245_v3 = vmax.f32 %v5187_v50, 0.0  ;;  %v1293_v34 = vmax.f32 %v5188_v39, 0.0  ;;  %v1294_v29 = vmax.f32 %v5189_v6, 0.0  ;;  %v1295_v52 = vmax.f32 %v4590_v7, 0.0 }
 0x15e   : > { %1249 = vst [vmem:[#allocation6 + $0x18] sm:$0xff] %v1239_v14  ;;  %1250 = vst [vmem:[#allocation6 + $0x20] sm:$0xff] %v1240_v58  ;;  %v1296_v44 = vmax.f32 %v5190_v48, 0.0  ;;  %v1297_v46 = vmax.f32 %v5191_v10, 0.0  ;;  %v1298_v15 = vmax.f32 %v4596_v40, 0.0  ;;  %v1299_v25 = vmax.f32 %v5192_v43, 0.0 }
 0x15f   : > { %1251 = vst [vmem:[#allocation6 + $0x28] sm:$0xff] %v1241_v33  ;;  %1252 = vst [vmem:[#allocation6 + $0x30] sm:$0xff] %v1242_v28  ;;  %v1300_v60 = vmax.f32 %v5193_v36, 0.0  ;;  %v1301_v19 = vmax.f32 %v5194_v57, 0.0  ;;  %v1302_v41 = vmax.f32 %v5195_v13, 0.0 }
 0x160   : > { %1253 = vst [vmem:[#allocation6 + $0x38] sm:$0xff] %v1243_v59  ;;  %1254 = vst [vmem:[#allocation6 + $0x40] sm:$0xff] %v1244_v42 }
 0x161   : > { %1255 = vst [vmem:[#allocation6 + $0x48] sm:$0x7] %v1245_v3 }
 0x164   : > { %v1256_v32 = vld [vmem:[#allocation6] ss:$2 sm:$0x1f]  ;;  %v1258_v55 = vld [vmem:[#allocation6 + $0x1] ss:$2 sm:$0x1f] }
 0x165   : > { %1303 = vst [vmem:[#allocation6] sm:$0xff] %v1293_v34  ;;  %v1260_v20 = vld [vmem:[#allocation6 + $0xd] ss:$2 sm:$0x1f]  ;;  %v1263_v63 = vmax.f32 %v1256_v32, %v1258_v55 }
 0x166   : > { %v1262_v61 = vld [vmem:[#allocation6 + $0xe] ss:$2 sm:$0x1f]  ;;  %v1270_v22 = vld [vmem:[#allocation6 + $0x1a] ss:$2 sm:$0x1f] }
 0x167   : > { %1304 = vst [vmem:[#allocation6 + $0x8] sm:$0xff] %v1294_v29  ;;  %1305 = vst [vmem:[#allocation6 + $0x10] sm:$0xff] %v1295_v52  ;;  %v1272_v53 = vld [vmem:[#allocation6 + $0x1b] ss:$2 sm:$0x1f]  ;;  %v1264_v30 = vmax.f32 %v1260_v20, %v1262_v61 }
 0x168   : > { %1306 = vst [vmem:[#allocation6 + $0x18] sm:$0xff] %v1296_v44  ;;  %v1274_v26 = vld [vmem:[#allocation6 + $0x27] ss:$2 sm:$0x1f]  ;;  %v1277_v1 = vmax.f32 %v1270_v22, %v1272_v53 }
 0x169   : > { %v1276_v37 = vld [vmem:[#allocation6 + $0x28] ss:$2 sm:$0x1f]  ;;  %1307 = vst [vmem:[#allocation6 + $0x20] sm:$0xff] %v1297_v46  ;;  %v1265_v38 = vmax.f32 %v1263_v63, %v1264_v30 }
 0x16a   : > { %1308 = vst [vmem:[#allocation6 + $0x28] sm:$0xff] %v1298_v15  ;;  %v1282_v18 = vld [vmem:[#allocation6 + $0x34] ss:$2 sm:$0x1f]  ;;  %v1278_v12 = vmax.f32 %v1274_v26, %v1276_v37 }
 0x16b   : > { %v1284_v23 = vld [vmem:[#allocation6 + $0x35] ss:$2 sm:$0x1f]  ;;  %v1286_v51 = vld [vmem:[#allocation6 + $0x41] ss:$2 sm:$0x1f] }
 0x16c   : > { %1309 = vst [vmem:[#allocation6 + $0x30] sm:$0xff] %v1299_v25  ;;  %1310 = vst [vmem:[#allocation6 + $0x38] sm:$0xff] %v1300_v60  ;;  %v1288_v9 = vld [vmem:[#allocation6 + $0x42] ss:$2 sm:$0x1f]  ;;  %v1289_v50 = vmax.f32 %v1282_v18, %v1284_v23  ;;  %v1279_v27 = vmax.f32 %v1277_v1, %v1278_v12 }
 0x16d   : > { %1311 = vst [vmem:[#allocation6 + $0x40] sm:$0xff] %v1301_v19  ;;  %1312 = vst [vmem:[#allocation6 + $0x48] sm:$0x7] %v1302_v41  ;;  %v1290_v4 = vmax.f32 %v1286_v51, %v1288_v9 }
 0x16e   : > { %1268 = vst [vmem:[%s1267_s13] sm:$0x1f] %v1265_v38  ;;  %1280 = vst [vmem:[%s1267_s13 + $0x5] sm:$0x1f] %v1279_v27  ;;  %v1313_v31 = vld [vmem:[#allocation6] ss:$2 sm:$0x1f] }
 0x16f   : > { %v1291_v49 = vmax.f32 %v1289_v50, %v1290_v4  ;;  %v1314_v47 = vld [vmem:[#allocation6 + $0x1] ss:$2 sm:$0x1f]  ;;  %v1315_v24 = vld [vmem:[#allocation6 + $0xd] ss:$2 sm:$0x1f] }
 0x170   : > { %v1316_v5 = vld [vmem:[#allocation6 + $0xe] ss:$2 sm:$0x1f]  ;;  %v1317_v8 = vmax.f32 %v1313_v31, %v1314_v47  ;;  %v1323_v56 = vld [vmem:[#allocation6 + $0x1a] ss:$2 sm:$0x1f] }
 0x171   : > { %1292 = vst [vmem:[%s1267_s13 + $0xa] sm:$0x1f] %v1291_v49  ;;  %v1318_v45 = vmax.f32 %v1315_v24, %v1316_v5  ;;  %v1324_v16 = vld [vmem:[#allocation6 + $0x1b] ss:$2 sm:$0x1f] }
 0x172   : > { %v1325_v2 = vld [vmem:[#allocation6 + $0x27] ss:$2 sm:$0x1f]  ;;  %v1327_v17 = vmax.f32 %v1323_v56, %v1324_v16 }
 0x173   : > { %v1326_v62 = vld [vmem:[#allocation6 + $0x28] ss:$2 sm:$0x1f]  ;;  %v1319_v21 = vmax.f32 %v1317_v8, %v1318_v45  ;;  %v1331_v6 = vld [vmem:[#allocation6 + $0x34] ss:$2 sm:$0x1f] }
 0x174   : > { %v1328_v39 = vmax.f32 %v1325_v2, %v1326_v62  ;;  %v1332_v7 = vld [vmem:[#allocation6 + $0x35] ss:$2 sm:$0x1f]  ;;  %v1333_v35 = vld [vmem:[#allocation6 + $0x41] ss:$2 sm:$0x1f] }
 0x175   : > { %v1334_v48 = vld [vmem:[#allocation6 + $0x42] ss:$2 sm:$0x1f]  ;;  %v1335_v10 = vmax.f32 %v1331_v6, %v1332_v7  ;;  %2685 = vst [vmem:[%s1267_s13 + $0x20] sm:$0x1f] %v1319_v21  ;;  %687 = sbr.rel (!%p685_p6) target bundleno = 219 (0xdb), region = 259 }
 0x176   : > { %v1329_v40 = vmax.f32 %v1327_v17, %v1328_v39  ;;  %v1336_v43 = vmax.f32 %v1333_v35, %v1334_v48 }
 0x178   : > { %2686 = vst [vmem:[%s1267_s13 + $0x25] sm:$0x1f] %v1329_v40  ;;  %v1337_v36 = vmax.f32 %v1335_v10, %v1336_v43 }
 0x17a   : > { %2687 = vst [vmem:[%s1267_s13 + $0x2a] sm:$0x1f] %v1337_v36 }
 0x17c LB: > { %s4707_s9 = sshll.u32 %s3498_s0, 1  ;;  %s4739_s6 = smov 0   ;;  %s3498_s0 = sphi %s4701_s0, %s1344_s0  }
 0x17d   : > { %s1346_s5 = sld [smem:[#allocation12 + %s4707_s9]]  ;;  %s1348_s11 = sadd.s32 1, %s4707_s9 }
 0x17e   : > { %s1349_s2 = sld [smem:[#allocation12 + %s1348_s11]] }
 0x183   : > { %v1347_v57 = vstv %s1346_s5  }
 0x184   : > { %v1350_v13 = vstv %s1349_s2   ;;  %v5223_v28 = vmov %v1347_v57  ;;  %v5224_v59 = vmov %v1347_v57  ;;  %v5225_v42 = vmov %v1347_v57 }
 0x185   : > { %v5217_v11 = vmov %v1350_v13  ;;  %v5218_v0 = vmov %v1350_v13  ;;  %v5219_v54 = vmov %v1350_v13  ;;  %v5220_v14 = vmov %v1350_v13 }
 0x186   : > { %v5221_v58 = vmov %v1350_v13  ;;  %v5222_v33 = vmov %v1350_v13  ;;  %v5226_v3 = vmov %v1347_v57  ;;  %v5227_v34 = vmov %v1347_v57 }
 0x187   : > { %v5228_v29 = vmov %v1347_v57 }
 0x188 LB: >> { %s1371_s15 = smul.u32 176, %s3558_s6  ;;  %s3558_s6 = sphi %s4739_s6, %s1356_s6   ;;  %v3554_v57 = vphi %v1347_v57, %v5243_v57   ;;  %v3550_v29 = vphi %v5228_v29, %v5242_v29   ;;  %v3546_v34 = vphi %v5227_v34, %v5241_v34   ;;  %v3542_v3 = vphi %v5226_v3, %v5240_v3   ;;  %v3538_v42 = vphi %v5225_v42, %v5239_v42   ;;  %v3534_v59 = vphi %v5224_v59, %v5238_v59   ;;  %v3530_v28 = vphi %v5223_v28, %v5237_v28   ;;  %v3526_v13 = vphi %v1350_v13, %v5236_v13   ;;  %v3522_v33 = vphi %v5222_v33, %v5235_v33   ;;  %v3518_v58 = vphi %v5221_v58, %v5234_v58   ;;  %v3514_v14 = vphi %v5220_v14, %v5233_v14   ;;  %v3510_v54 = vphi %v5219_v54, %v5232_v54   ;;  %v3506_v0 = vphi %v5218_v0, %v5231_v0   ;;  %v3502_v11 = vphi %v5217_v11, %v5230_v11  }
 0x189   : >> { %s4772_s16 = smul.u32 18, %s3558_s6  ;;  %s1356_s6 = sadd.s32 1, %s3558_s6  }
 0x18a   : >> { %s4778_s3 = scalar_lea.vmem [#allocation3], %s1371_s15  ;;  %p4955_p7 = scmp.ge.s32.totalorder %s1356_s6, 10  }
 0x18b   : >> { %s1381_s17 = sadd.s32 %s4707_s9, %s4772_s16  ;;  %s1422_s18 = sadd.s32 180, %s4772_s16  ;;  %v1373_v52 = vld [vmem:[%s4778_s3 + $0x4e] sm:$0xff]  ;;  %v1374_v44 = vld [vmem:[%s4778_s3 + $0x56] sm:$0xff]  ;;  %v1375_v46 = vld [vmem:[%s4778_s3 + $0x5e] sm:$0xff] }
 0x18c   : >> { %s1382_s19 = sld [smem:[#allocation11 + %s1381_s17]]  ;;  %s1398_s21 = sadd.s32 1, %s1381_s17  ;;  %v1376_v15 = vld [vmem:[%s4778_s3 + $0x66] sm:$0xff]  ;;  %v1377_v25 = vld [vmem:[%s4778_s3 + $0x6e] sm:$0xff]  ;;  %v1378_v60 = vld [vmem:[%s4778_s3 + $0x76] sm:$0xff] }
 0x18d   : >> { %s1399_s22 = sld [smem:[#allocation11 + %s1398_s21]]  ;;  %s1423_s1 = sadd.s32 %s4707_s9, %s1422_s18  ;;  %v1379_v19 = vld [vmem:[%s4778_s3 + $0x7e] sm:$0x1]  ;;  %v1415_v49 = vld [vmem:[%s4778_s3 + $0x4f] sm:$0xff]  ;;  %v1417_v47 = vld [vmem:[%s4778_s3 + $0x5f] sm:$0xff] }
 0x18e   : >> { %s4784_s23 = sld [smem:[#allocation11 + %s1423_s1]]  ;;  %s1440_s12 = sadd.s32 1, %s1423_s1  ;;  %v1416_v31 = vld [vmem:[%s4778_s3 + $0x57] sm:$0xff]  ;;  %v1418_v45 = vld [vmem:[%s4778_s3 + $0x67] sm:$0xff]  ;;  %v1419_v56 = vld [vmem:[%s4778_s3 + $0x6f] sm:$0xff] }
 0x18f   : >> { %s1464_s24 = sadd.s32 360, %s4772_s16  ;;  %s4790_s25 = sld [smem:[#allocation11 + %s1440_s12]]  ;;  %v1420_v16 = vld [vmem:[%s4778_s3 + $0x77] sm:$0xff]  ;;  %v1421_v6 = vld [vmem:[%s4778_s3 + $0x7f] sm:$0x1] }
 0x190   : >> { %s4793_s14 = sadd.s32 %s4707_s9, %s1464_s24  ;;  %s1506_s27 = sadd.s32 540, %s4772_s16 }
 0x191   : >> { %s4803_s26 = sld [smem:[#allocation11 + %s4793_s14]]  ;;  %s1482_s4 = sadd.s32 1, %s4793_s14 }
 0x192   : >> { %v1383_v41 = vstv %s1382_s19  ;;  %s4814_s28 = sld [smem:[#allocation11 + %s1482_s4]]  ;;  %s4818_s29 = sadd.s32 %s4707_s9, %s1506_s27 }
 0x193   : >> { %v1384_v32 = vmul.f32 %v1383_v41, %v1373_v52  ;;  %v1385_v55 = vmul.f32 %v1383_v41, %v1374_v44  ;;  %v1386_v20 = vmul.f32 %v1383_v41, %v1375_v46  ;;  %v1387_v61 = vmul.f32 %v1383_v41, %v1376_v15  ;;  %s4827_s30 = sld [smem:[#allocation11 + %s4818_s29]]  ;;  %s1524_s20 = sadd.s32 1, %s4818_s29 }
 0x194   : >> { %v1388_v63 = vmul.f32 %v1383_v41, %v1377_v25  ;;  %v1389_v22 = vmul.f32 %v1383_v41, %v1378_v60  ;;  %v1390_v53 = vmul.f32 %v1383_v41, %v1379_v19  ;;  %v1400_v30 = vstv %s1399_s22  ;;  %s1548_s10 = sadd.s32 720, %s4772_s16  ;;  %s4843_s13 = sld [smem:[#allocation11 + %s1524_s20]] }
 0x195   : >> { %v1391_v26 = vadd.f32 %v3554_v57, %v1384_v32  ;;  %v1392_v37 = vadd.f32 %v3550_v29, %v1385_v55  ;;  %v1393_v1 = vadd.f32 %v3546_v34, %v1386_v20  ;;  %v1394_v18 = vadd.f32 %v3542_v3, %v1387_v61  ;;  %v1457_v29 = vld [vmem:[%s4778_s3 + $0x50] sm:$0xff]  ;;  %v4833_v61 = vld [vmem:[%s4778_s3 + $0x78] sm:$0xff]  ;;  %s4846_s5 = sadd.s32 %s4707_s9, %s1548_s10  ;;  %s1590_s15 = sadd.s32 900, %s4772_s16 }
 0x196   : >> { %v1395_v23 = vadd.f32 %v3538_v42, %v1388_v63  ;;  %v1396_v38 = vadd.f32 %v3534_v59, %v1389_v22  ;;  %v1397_v12 = vadd.f32 %v3530_v28, %v1390_v53  ;;  %v1401_v51 = vmul.f32 %v1400_v30, %v1373_v52  ;;  %v4830_v20 = vld [vmem:[%s4778_s3 + $0x70] sm:$0xff]  ;;  %v1463_v63 = vld [vmem:[%s4778_s3 + $0x80] sm:$0x1]  ;;  %s4859_s11 = sld [smem:[#allocation11 + %s4846_s5]]  ;;  %s1566_s2 = sadd.s32 1, %s4846_s5 }
 0x197   : >> { %v1402_v9 = vmul.f32 %v1400_v30, %v1374_v44  ;;  %v1403_v50 = vmul.f32 %v1400_v30, %v1375_v46  ;;  %v1404_v27 = vmul.f32 %v1400_v30, %v1376_v15  ;;  %v1405_v4 = vmul.f32 %v1400_v30, %v1377_v25  ;;  %v1458_v25 = vld [vmem:[%s4778_s3 + $0x58] sm:$0xff]  ;;  %s4864_s17 = sld [smem:[#allocation11 + %s1566_s2]]  ;;  %s4868_s18 = sadd.s32 %s4707_s9, %s1590_s15 }
 0x198   : >> { %v1406_v24 = vmul.f32 %v1400_v30, %v1378_v60  ;;  %v1407_v5 = vmul.f32 %v1400_v30, %v1379_v19  ;;  %v1408_v8 = vadd.f32 %v3526_v13, %v1401_v51  ;;  %v1425_v2 = vstv %s4784_s23  ;;  %v1459_v60 = vld [vmem:[%s4778_s3 + $0x60] sm:$0xff]  ;;  %v4824_v19 = vld [vmem:[%s4778_s3 + $0x68] sm:$0xff]  ;;  %s4875_s19 = sld [smem:[#allocation11 + %s4868_s18]]  ;;  %s1608_s21 = sadd.s32 1, %s4868_s18 }
 0x199   : >> { %v1409_v62 = vadd.f32 %v3522_v33, %v1402_v9  ;;  %v1410_v17 = vadd.f32 %v3518_v58, %v1403_v50  ;;  %v1411_v21 = vadd.f32 %v3514_v14, %v1404_v27  ;;  %v1412_v39 = vadd.f32 %v3510_v54, %v1405_v4  ;;  %s1632_s22 = sadd.s32 1080, %s4772_s16  ;;  %s4884_s1 = sld [smem:[#allocation11 + %s1608_s21]] }
 0x19a   : >> { %v1413_v7 = vadd.f32 %v3506_v0, %v1406_v24  ;;  %v1414_v35 = vadd.f32 %v3502_v11, %v1407_v5  ;;  %v1426_v48 = vmul.f32 %v1425_v2, %v1415_v49  ;;  %v1427_v10 = vmul.f32 %v1425_v2, %v1416_v31  ;;  %s4887_s23 = sadd.s32 %s4707_s9, %s1632_s22 }
 0x19b   : >> { %v1428_v40 = vmul.f32 %v1425_v2, %v1417_v47  ;;  %v1429_v43 = vmul.f32 %v1425_v2, %v1418_v45  ;;  %v1430_v36 = vmul.f32 %v1425_v2, %v1419_v56  ;;  %v1431_v57 = vmul.f32 %v1425_v2, %v1420_v16  ;;  %s4897_s12 = sld [smem:[#allocation11 + %s4887_s23]]  ;;  %s1650_s24 = sadd.s32 1, %s4887_s23 }
 0x19c   : >> { %v1432_v13 = vmul.f32 %v1425_v2, %v1421_v6  ;;  %v1433_v14 = vadd.f32 %v1426_v48, %v1391_v26  ;;  %v1434_v58 = vadd.f32 %v1427_v10, %v1392_v37  ;;  %v1442_v54 = vstv %s4790_s25  ;;  %v1503_v48 = vld [vmem:[%s4778_s3 + $0x7b] sm:$0xff]  ;;  %v1504_v10 = vld [vmem:[%s4778_s3 + $0x83] sm:$0xff]  ;;  %s1674_s25 = sadd.s32 1260, %s4772_s16  ;;  %s4902_s14 = sld [smem:[#allocation11 + %s1650_s24]] }
 0x19d   : >> { %v1435_v0 = vadd.f32 %v1428_v40, %v1393_v1  ;;  %v1436_v11 = vadd.f32 %v1429_v43, %v1394_v18  ;;  %v1437_v33 = vadd.f32 %v1430_v36, %v1395_v23  ;;  %v1438_v28 = vadd.f32 %v1431_v57, %v1396_v38 }
 0x19e   : >> { %v1439_v59 = vadd.f32 %v1432_v13, %v1397_v12  ;;  %v1443_v42 = vmul.f32 %v1442_v54, %v1415_v49  ;;  %v1444_v3 = vmul.f32 %v1442_v54, %v1416_v31  ;;  %v1445_v34 = vmul.f32 %v1442_v54, %v1417_v47 }
 0x19f   : >> { %v1446_v52 = vmul.f32 %v1442_v54, %v1418_v45  ;;  %v1447_v44 = vmul.f32 %v1442_v54, %v1419_v56  ;;  %v1448_v46 = vmul.f32 %v1442_v54, %v1420_v16  ;;  %v1449_v15 = vmul.f32 %v1442_v54, %v1421_v6 }
 0x1a0   : >> { %v1450_v41 = vadd.f32 %v1443_v42, %v1408_v8  ;;  %v1451_v32 = vadd.f32 %v1444_v3, %v1409_v62  ;;  %v1452_v55 = vadd.f32 %v1445_v34, %v1410_v17  ;;  %v1467_v22 = vstv %s4803_s26  ;;  %v1499_v62 = vld [vmem:[%s4778_s3 + $0x5b] sm:$0xff]  ;;  %v1500_v17 = vld [vmem:[%s4778_s3 + $0x63] sm:$0xff]  ;;  %s4906_s26 = sadd.s32 %s4707_s9, %s1674_s25 }
 0x1a1   : >> { %v1453_v53 = vadd.f32 %v1446_v52, %v1411_v21  ;;  %v1454_v30 = vadd.f32 %v1447_v44, %v1412_v39  ;;  %v1455_v26 = vadd.f32 %v1448_v46, %v1413_v7  ;;  %v1456_v37 = vadd.f32 %v1449_v15, %v1414_v35  ;;  %v1501_v21 = vld [vmem:[%s4778_s3 + $0x6b] sm:$0xff]  ;;  %v1502_v35 = vld [vmem:[%s4778_s3 + $0x73] sm:$0xff]  ;;  %s4910_s4 = sld [smem:[#allocation11 + %s4906_s26]]  ;;  %s1692_s27 = sadd.s32 1, %s4906_s26 }
 0x1a2   : >> { %v1468_v1 = vmul.f32 %v1467_v22, %v1457_v29  ;;  %v1469_v18 = vmul.f32 %v1467_v22, %v1458_v25  ;;  %v1470_v23 = vmul.f32 %v1467_v22, %v1459_v60  ;;  %v1471_v38 = vmul.f32 %v1467_v22, %v4824_v19  ;;  %s4922_s29 = sld [smem:[#allocation11 + %s1692_s27]] }
 0x1a3   : >> { %v1472_v12 = vmul.f32 %v1467_v22, %v4830_v20  ;;  %v1473_v51 = vmul.f32 %v1467_v22, %v4833_v61  ;;  %v1474_v9 = vmul.f32 %v1467_v22, %v1463_v63  ;;  %v1484_v50 = vstv %s4814_s28  ;;  %s1716_s28 = sadd.s32 1440, %s4772_s16 }
 0x1a4   : >> { %v1475_v27 = vadd.f32 %v1468_v1, %v1433_v14  ;;  %v1476_v4 = vadd.f32 %v1469_v18, %v1434_v58  ;;  %v1477_v49 = vadd.f32 %v1470_v23, %v1435_v0  ;;  %v1478_v31 = vadd.f32 %v1471_v38, %v1436_v11  ;;  %v1505_v14 = vld [vmem:[%s4778_s3 + $0x8b] sm:$0x1]  ;;  %v1543_v1 = vld [vmem:[%s4778_s3 + $0x6c] sm:$0xff]  ;;  %v1544_v18 = vld [vmem:[%s4778_s3 + $0x74] sm:$0xff]  ;;  %s4925_s16 = sadd.s32 %s4707_s9, %s1716_s28 }
 0x1a5   : >> { %v1479_v47 = vadd.f32 %v1472_v12, %v1437_v33  ;;  %v1480_v24 = vadd.f32 %v1473_v51, %v1438_v28  ;;  %v1481_v5 = vadd.f32 %v1474_v9, %v1439_v59  ;;  %v1485_v8 = vmul.f32 %v1484_v50, %v1457_v29  ;;  %v1545_v51 = vld [vmem:[%s4778_s3 + $0x7c] sm:$0xff]  ;;  %v1546_v9 = vld [vmem:[%s4778_s3 + $0x84] sm:$0xff]  ;;  %s1734_s20 = sadd.s32 1, %s4925_s16 }
 0x1a6   : >> { %v1486_v45 = vmul.f32 %v1484_v50, %v1458_v25  ;;  %v1487_v56 = vmul.f32 %v1484_v50, %v1459_v60  ;;  %v1488_v16 = vmul.f32 %v1484_v50, %v4824_v19  ;;  %v1489_v2 = vmul.f32 %v1484_v50, %v4830_v20  ;;  %s4942_s10 = sld [smem:[#allocation11 + %s1734_s20]] }
 0x1a7   : >> { %v1490_v39 = vmul.f32 %v1484_v50, %v4833_v61  ;;  %v1491_v6 = vmul.f32 %v1484_v50, %v1463_v63  ;;  %v1492_v7 = vadd.f32 %v1485_v8, %v1450_v41  ;;  %v1509_v40 = vstv %s4827_s30  ;;  %v1541_v63 = vld [vmem:[%s4778_s3 + $0x5c] sm:$0xff]  ;;  %v1547_v50 = vld [vmem:[%s4778_s3 + $0x8c] sm:$0x1]  ;;  %s4938_s30 = sld [smem:[#allocation11 + %s4925_s16]] }
 0x1a8   : >> { %v1493_v43 = vadd.f32 %v1486_v45, %v1451_v32  ;;  %v1494_v36 = vadd.f32 %v1487_v56, %v1452_v55  ;;  %v1495_v57 = vadd.f32 %v1488_v16, %v1453_v53  ;;  %v1496_v13 = vadd.f32 %v1489_v2, %v1454_v30 }
 0x1a9   : >> { %v1497_v58 = vadd.f32 %v1490_v39, %v1455_v26  ;;  %v1498_v54 = vadd.f32 %v1491_v6, %v1456_v37  ;;  %v1510_v0 = vmul.f32 %v1509_v40, %v1499_v62  ;;  %v1511_v11 = vmul.f32 %v1509_v40, %v1500_v17  ;;  %v1542_v37 = vld [vmem:[%s4778_s3 + $0x64] sm:$0xff] }
 0x1aa   : >> { %v1512_v33 = vmul.f32 %v1509_v40, %v1501_v21  ;;  %v1513_v28 = vmul.f32 %v1509_v40, %v1502_v35  ;;  %v1514_v59 = vmul.f32 %v1509_v40, %v1503_v48  ;;  %v1515_v42 = vmul.f32 %v1509_v40, %v1504_v10 }
 0x1ab   : >> { %v1516_v3 = vmul.f32 %v1509_v40, %v1505_v14  ;;  %v1517_v34 = vadd.f32 %v1510_v0, %v1475_v27  ;;  %v1518_v29 = vadd.f32 %v1511_v11, %v1476_v4  ;;  %v1526_v52 = vstv %s4843_s13  ;;  %s2728_s13 = sshll.u32 (%p4955_p7), %s3498_s0, 6  ;;  %s1344_s0 = sadd.s32 (%p4955_p7), 1, %s3498_s0  }
 0x1ac   : >> { %v1519_v44 = vadd.f32 %v1512_v33, %v1477_v49  ;;  %v1520_v46 = vadd.f32 %v1513_v28, %v1478_v31  ;;  %v1521_v15 = vadd.f32 %v1514_v59, %v1479_v47  ;;  %v1522_v25 = vadd.f32 %v1515_v42, %v1480_v24  ;;  %v1586_v33 = vld [vmem:[%s4778_s3 + $0x75] sm:$0xff]  ;;  %v1587_v28 = vld [vmem:[%s4778_s3 + $0x7d] sm:$0xff]  ;;  %v1588_v59 = vld [vmem:[%s4778_s3 + $0x85] sm:$0xff]  ;;  %s1776_s9 = scalar_lea.vmem (%p4955_p7), [#allocation4], %s2728_s13  ;;  %p1341_p8 = scmp.ge.s32.totalorder (%p4955_p7), %s1344_s0, 9  }
 0x1ad   : >> { %v1523_v60 = vadd.f32 %v1516_v3, %v1481_v5  ;;  %v1527_v41 = vmul.f32 %v1526_v52, %v1499_v62  ;;  %v1528_v32 = vmul.f32 %v1526_v52, %v1500_v17  ;;  %v1529_v55 = vmul.f32 %v1526_v52, %v1501_v21 }
 0x1ae   : >> { %v1530_v22 = vmul.f32 %v1526_v52, %v1502_v35  ;;  %v1531_v53 = vmul.f32 %v1526_v52, %v1503_v48  ;;  %v1532_v30 = vmul.f32 %v1526_v52, %v1504_v10  ;;  %v1533_v26 = vmul.f32 %v1526_v52, %v1505_v14  ;;  %v1584_v14 = vld [vmem:[%s4778_s3 + $0x65] sm:$0xff] }
 0x1af   : >> { %v1534_v23 = vadd.f32 %v1527_v41, %v1492_v7  ;;  %v1535_v38 = vadd.f32 %v1528_v32, %v1493_v43  ;;  %v1536_v12 = vadd.f32 %v1529_v55, %v1494_v36  ;;  %v1551_v27 = vstv %s4859_s11 }
 0x1b0   : >> { %v1537_v4 = vadd.f32 %v1530_v22, %v1495_v57  ;;  %v1538_v49 = vadd.f32 %v1531_v53, %v1496_v13  ;;  %v1539_v31 = vadd.f32 %v1532_v30, %v1497_v58  ;;  %v1540_v47 = vadd.f32 %v1533_v26, %v1498_v54  ;;  %v1583_v13 = vld [vmem:[%s4778_s3 + $0x5d] sm:$0xff]  ;;  %v1585_v58 = vld [vmem:[%s4778_s3 + $0x6d] sm:$0xff] }
 0x1b1   : >> { %v1552_v24 = vmul.f32 %v1551_v27, %v1541_v63  ;;  %v1553_v5 = vmul.f32 %v1551_v27, %v1542_v37  ;;  %v1554_v8 = vmul.f32 %v1551_v27, %v1543_v1  ;;  %v1555_v45 = vmul.f32 %v1551_v27, %v1544_v18 }
 0x1b2   : >> { %v1556_v56 = vmul.f32 %v1551_v27, %v1545_v51  ;;  %v1557_v16 = vmul.f32 %v1551_v27, %v1546_v9  ;;  %v1558_v2 = vmul.f32 %v1551_v27, %v1547_v50  ;;  %v1568_v62 = vstv %s4864_s17 }
 0x1b3   : >> { %v1559_v17 = vadd.f32 %v1552_v24, %v1517_v34  ;;  %v1560_v21 = vadd.f32 %v1553_v5, %v1518_v29  ;;  %v1561_v39 = vadd.f32 %v1554_v8, %v1519_v44  ;;  %v1562_v6 = vadd.f32 %v1555_v45, %v1520_v46  ;;  %v1589_v44 = vld [vmem:[%s4778_s3 + $0x8d] sm:$0x1]  ;;  %v1630_v45 = vld [vmem:[%s4778_s3 + $0x90] sm:$0xff] }
 0x1b4   : >> { %v1563_v7 = vadd.f32 %v1556_v56, %v1521_v15  ;;  %v1564_v35 = vadd.f32 %v1557_v16, %v1522_v25  ;;  %v1565_v48 = vadd.f32 %v1558_v2, %v1523_v60  ;;  %v1569_v10 = vmul.f32 %v1568_v62, %v1541_v63  ;;  %v1629_v8 = vld [vmem:[%s4778_s3 + $0x88] sm:$0xff]  ;;  %v1631_v56 = vld [vmem:[%s4778_s3 + $0x98] sm:$0x1] }
 0x1b5   : >> { %v1570_v40 = vmul.f32 %v1568_v62, %v1542_v37  ;;  %v1571_v43 = vmul.f32 %v1568_v62, %v1543_v1  ;;  %v1572_v36 = vmul.f32 %v1568_v62, %v1544_v18  ;;  %v1573_v57 = vmul.f32 %v1568_v62, %v1545_v51 }
 0x1b6   : >> { %v1574_v54 = vmul.f32 %v1568_v62, %v1546_v9  ;;  %v1575_v0 = vmul.f32 %v1568_v62, %v1547_v50  ;;  %v1576_v11 = vadd.f32 %v1569_v10, %v1534_v23  ;;  %v1593_v42 = vstv %s4875_s19 }
 0x1b7   : >> { %v1577_v3 = vadd.f32 %v1570_v40, %v1535_v38  ;;  %v1578_v34 = vadd.f32 %v1571_v43, %v1536_v12  ;;  %v1579_v29 = vadd.f32 %v1572_v36, %v1537_v4  ;;  %v1580_v52 = vadd.f32 %v1573_v57, %v1538_v49 }
 0x1b8   : >> { %v1581_v46 = vadd.f32 %v1574_v54, %v1539_v31  ;;  %v1582_v15 = vadd.f32 %v1575_v0, %v1540_v47  ;;  %v1594_v25 = vmul.f32 %v1593_v42, %v1583_v13  ;;  %v1595_v60 = vmul.f32 %v1593_v42, %v1584_v14  ;;  %v1628_v31 = vld [vmem:[%s4778_s3 + $0x80] sm:$0xff] }
 0x1b9   : >> { %v1596_v41 = vmul.f32 %v1593_v42, %v1585_v58  ;;  %v1597_v32 = vmul.f32 %v1593_v42, %v1586_v33  ;;  %v1598_v55 = vmul.f32 %v1593_v42, %v1587_v28  ;;  %v1599_v63 = vmul.f32 %v1593_v42, %v1588_v59 }
 0x1ba   : >> { %v1600_v22 = vmul.f32 %v1593_v42, %v1589_v44  ;;  %v1601_v53 = vadd.f32 %v1594_v25, %v1559_v17  ;;  %v1602_v30 = vadd.f32 %v1595_v60, %v1560_v21  ;;  %v1610_v26 = vstv %s4884_s1  ;;  %v1671_v25 = vld [vmem:[%s4778_s3 + $0x89] sm:$0xff]  ;;  %v1672_v60 = vld [vmem:[%s4778_s3 + $0x91] sm:$0xff] }
 0x1bb   : >> { %v1603_v37 = vadd.f32 %v1596_v41, %v1561_v39  ;;  %v1604_v1 = vadd.f32 %v1597_v32, %v1562_v6  ;;  %v1605_v18 = vadd.f32 %v1598_v55, %v1563_v7  ;;  %v1606_v23 = vadd.f32 %v1599_v63, %v1564_v35  ;;  %v1673_v55 = vld [vmem:[%s4778_s3 + $0x99] sm:$0x1] }
 0x1bc   : >> { %v1607_v38 = vadd.f32 %v1600_v22, %v1565_v48  ;;  %v1611_v12 = vmul.f32 %v1610_v26, %v1583_v13  ;;  %v1612_v51 = vmul.f32 %v1610_v26, %v1584_v14  ;;  %v1613_v9 = vmul.f32 %v1610_v26, %v1585_v58 }
 0x1bd   : >> { %v1614_v50 = vmul.f32 %v1610_v26, %v1586_v33  ;;  %v1615_v27 = vmul.f32 %v1610_v26, %v1587_v28  ;;  %v1616_v4 = vmul.f32 %v1610_v26, %v1588_v59  ;;  %v1617_v49 = vmul.f32 %v1610_v26, %v1589_v44 }
 0x1be   : >> { %v1618_v47 = vadd.f32 %v1611_v12, %v1576_v11  ;;  %v1619_v24 = vadd.f32 %v1612_v51, %v1577_v3  ;;  %v1620_v5 = vadd.f32 %v1613_v9, %v1578_v34  ;;  %v1635_v16 = vstv %s4897_s12  ;;  %v1667_v3 = vld [vmem:[%s4778_s3 + $0x69] sm:$0xff]  ;;  %v1668_v34 = vld [vmem:[%s4778_s3 + $0x71] sm:$0xff] }
 0x1bf   : >> { %v1621_v2 = vadd.f32 %v1614_v50, %v1579_v29  ;;  %v1622_v62 = vadd.f32 %v1615_v27, %v1580_v52  ;;  %v1623_v17 = vadd.f32 %v1616_v4, %v1581_v46  ;;  %v1624_v21 = vadd.f32 %v1617_v49, %v1582_v15  ;;  %v1669_v29 = vld [vmem:[%s4778_s3 + $0x79] sm:$0xff]  ;;  %v1670_v15 = vld [vmem:[%s4778_s3 + $0x81] sm:$0xff] }
 0x1c0   : >> { %v1636_v39 = vmul.f32 %v1635_v16, %v4824_v19  ;;  %v1637_v6 = vmul.f32 %v1635_v16, %v4830_v20  ;;  %v1638_v7 = vmul.f32 %v1635_v16, %v4833_v61  ;;  %v1639_v35 = vmul.f32 %v1635_v16, %v1628_v31 }
 0x1c1   : >> { %v1640_v48 = vmul.f32 %v1635_v16, %v1629_v8  ;;  %v1641_v10 = vmul.f32 %v1635_v16, %v1630_v45  ;;  %v1642_v40 = vmul.f32 %v1635_v16, %v1631_v56  ;;  %v1652_v43 = vstv %s4902_s14 }
 0x1c2   : >> { %v1643_v36 = vadd.f32 %v1636_v39, %v1601_v53  ;;  %v1644_v57 = vadd.f32 %v1637_v6, %v1602_v30  ;;  %v1645_v13 = vadd.f32 %v1638_v7, %v1603_v37  ;;  %v1646_v14 = vadd.f32 %v1639_v35, %v1604_v1  ;;  %v1713_v7 = vld [vmem:[%s4778_s3 + $0x8a] sm:$0xff]  ;;  %v1714_v35 = vld [vmem:[%s4778_s3 + $0x92] sm:$0xff] }
 0x1c3   : >> { %v1647_v58 = vadd.f32 %v1640_v48, %v1605_v18  ;;  %v1648_v54 = vadd.f32 %v1641_v10, %v1606_v23  ;;  %v1649_v0 = vadd.f32 %v1642_v40, %v1607_v38  ;;  %v1653_v11 = vmul.f32 %v1652_v43, %v4824_v19  ;;  %v1715_v48 = vld [vmem:[%s4778_s3 + $0x9a] sm:$0x1] }
 0x1c4   : >> { %v1654_v33 = vmul.f32 %v1652_v43, %v4830_v20  ;;  %v1655_v28 = vmul.f32 %v1652_v43, %v4833_v61  ;;  %v1656_v59 = vmul.f32 %v1652_v43, %v1628_v31  ;;  %v1657_v42 = vmul.f32 %v1652_v43, %v1629_v8 }
 0x1c5   : >> { %v1658_v52 = vmul.f32 %v1652_v43, %v1630_v45  ;;  %v1659_v44 = vmul.f32 %v1652_v43, %v1631_v56  ;;  %v1660_v46 = vadd.f32 %v1653_v11, %v1618_v47  ;;  %v1677_v41 = vstv %s4910_s4 }
 0x1c6   : >> { %v1661_v19 = vadd.f32 %v1654_v33, %v1619_v24  ;;  %v1662_v20 = vadd.f32 %v1655_v28, %v1620_v5  ;;  %v1663_v61 = vadd.f32 %v1656_v59, %v1621_v2  ;;  %v1664_v32 = vadd.f32 %v1657_v42, %v1622_v62  ;;  %v1709_v5 = vld [vmem:[%s4778_s3 + $0x6a] sm:$0xff]  ;;  %v1710_v2 = vld [vmem:[%s4778_s3 + $0x72] sm:$0xff]  ;;  %v1711_v62 = vld [vmem:[%s4778_s3 + $0x7a] sm:$0xff] }
 0x1c7   : >> { %v1665_v63 = vadd.f32 %v1658_v52, %v1623_v17  ;;  %v1666_v22 = vadd.f32 %v1659_v44, %v1624_v21  ;;  %v1678_v53 = vmul.f32 %v1677_v41, %v1667_v3  ;;  %v1679_v30 = vmul.f32 %v1677_v41, %v1668_v34  ;;  %v1712_v17 = vld [vmem:[%s4778_s3 + $0x82] sm:$0xff] }
 0x1c8   : >> { %v1680_v26 = vmul.f32 %v1677_v41, %v1669_v29  ;;  %v1681_v37 = vmul.f32 %v1677_v41, %v1670_v15  ;;  %v1682_v1 = vmul.f32 %v1677_v41, %v1671_v25  ;;  %v1683_v18 = vmul.f32 %v1677_v41, %v1672_v60 }
 0x1c9   : >> { %v1684_v23 = vmul.f32 %v1677_v41, %v1673_v55  ;;  %v1685_v38 = vadd.f32 %v1678_v53, %v1643_v36  ;;  %v1686_v12 = vadd.f32 %v1679_v30, %v1644_v57  ;;  %v1694_v51 = vstv %s4922_s29 }
 0x1ca   : >> { %v1687_v9 = vadd.f32 %v1680_v26, %v1645_v13  ;;  %v1688_v50 = vadd.f32 %v1681_v37, %v1646_v14  ;;  %v1689_v27 = vadd.f32 %v1682_v1, %v1647_v58  ;;  %v1690_v4 = vadd.f32 %v1683_v18, %v1648_v54 }
 0x1cb   : >> { %v1691_v49 = vadd.f32 %v1684_v23, %v1649_v0  ;;  %v1695_v31 = vmul.f32 %v1694_v51, %v1667_v3  ;;  %v1696_v47 = vmul.f32 %v1694_v51, %v1668_v34  ;;  %v1697_v24 = vmul.f32 %v1694_v51, %v1669_v29 }
 0x1cc   : >> { %v1698_v8 = vmul.f32 %v1694_v51, %v1670_v15  ;;  %v1699_v45 = vmul.f32 %v1694_v51, %v1671_v25  ;;  %v1700_v56 = vmul.f32 %v1694_v51, %v1672_v60  ;;  %v1701_v16 = vmul.f32 %v1694_v51, %v1673_v55 }
 0x1cd   : >> { %v1702_v21 = vadd.f32 %v1695_v31, %v1660_v46  ;;  %v1703_v39 = vadd.f32 %v1696_v47, %v1661_v19  ;;  %v1704_v6 = vadd.f32 %v1697_v24, %v1662_v20  ;;  %v1719_v10 = vstv %s4938_s30 }
 0x1ce   : >> { %v1705_v40 = vadd.f32 %v1698_v8, %v1663_v61  ;;  %v1706_v43 = vadd.f32 %v1699_v45, %v1664_v32  ;;  %v1707_v36 = vadd.f32 %v1700_v56, %v1665_v63  ;;  %v1708_v57 = vadd.f32 %v1701_v16, %v1666_v22 }
 0x1cf   : >> { %v1720_v13 = vmul.f32 %v1719_v10, %v1709_v5  ;;  %v1721_v14 = vmul.f32 %v1719_v10, %v1710_v2  ;;  %v1722_v58 = vmul.f32 %v1719_v10, %v1711_v62  ;;  %v1723_v54 = vmul.f32 %v1719_v10, %v1712_v17 }
 0x1d0   : >> { %v1724_v0 = vmul.f32 %v1719_v10, %v1713_v7  ;;  %v1725_v11 = vmul.f32 %v1719_v10, %v1714_v35  ;;  %v1726_v33 = vmul.f32 %v1719_v10, %v1715_v48  ;;  %v1736_v28 = vstv %s4942_s10 }
 0x1d1   : >> { %v1727_v52 = vadd.f32 %v1720_v13, %v1685_v38   ;;  %v1728_v44 = vadd.f32 %v1721_v14, %v1686_v12   ;;  %v1729_v46 = vadd.f32 %v1722_v58, %v1687_v9   ;;  %v1730_v15 = vadd.f32 %v1723_v54, %v1688_v50  }
 0x1d2   : >> { %v1731_v25 = vadd.f32 %v1724_v0, %v1689_v27   ;;  %v1732_v60 = vadd.f32 %v1725_v11, %v1690_v4   ;;  %v1733_v41 = vadd.f32 %v1726_v33, %v1691_v49   ;;  %v1737_v59 = vmul.f32 %v1736_v28, %v1709_v5 }
 0x1d3   : >> { %v1738_v42 = vmul.f32 %v1736_v28, %v1710_v2  ;;  %v1739_v3 = vmul.f32 %v1736_v28, %v1711_v62  ;;  %v1740_v34 = vmul.f32 %v1736_v28, %v1712_v17  ;;  %v1741_v29 = vmul.f32 %v1736_v28, %v1713_v7  ;;  %1355 = sbr.rel (!%p4955_p7) target bundleno = 392 (0x188), region = 270 }
 0x1d4   : >> { %v1742_v19 = vmul.f32 %v1736_v28, %v1714_v35  ;;  %v1743_v20 = vmul.f32 %v1736_v28, %v1715_v48  ;;  %v1744_v61 = vadd.f32 %v1737_v59, %v1702_v21   ;;  %v5237_v28 = vmov %v1733_v41 }
 0x1d5   : >> { %v1745_v32 = vadd.f32 %v1738_v42, %v1703_v39   ;;  %v1746_v55 = vadd.f32 %v1739_v3, %v1704_v6   ;;  %v1747_v63 = vadd.f32 %v1740_v34, %v1705_v40   ;;  %v1748_v22 = vadd.f32 %v1741_v29, %v1706_v43  }
 0x1d6   : >> { %v1749_v53 = vadd.f32 %v1742_v19, %v1707_v36   ;;  %v1750_v30 = vadd.f32 %v1743_v20, %v1708_v57   ;;  %v5236_v13 = vmov %v1744_v61  ;;  %v5238_v59 = vmov %v1732_v60 }
 0x1d7   : >> { %v5232_v54 = vmov %v1748_v22  ;;  %v5233_v14 = vmov %v1747_v63  ;;  %v5234_v58 = vmov %v1746_v55  ;;  %v5235_v33 = vmov %v1745_v32 }
 0x1d8   : >> { %v5230_v11 = vmov %v1750_v30  ;;  %v5231_v0 = vmov %v1749_v53  ;;  %v5239_v42 = vmov %v1731_v25  ;;  %v5240_v3 = vmov %v1730_v15 }
 0x1d9   : >> { %v5241_v34 = vmov %v1729_v46  ;;  %v5242_v29 = vmov %v1728_v44  ;;  %v5243_v57 = vmov %v1727_v52  ;;  %v1751_v26 = vmax.f32 (%p4955_p7), %v1727_v52, 0.0 }
 0x1da   : > { %v1752_v37 = vmax.f32 %v1728_v44, 0.0  ;;  %v1753_v1 = vmax.f32 %v1729_v46, 0.0  ;;  %v1754_v18 = vmax.f32 %v1730_v15, 0.0  ;;  %v1755_v23 = vmax.f32 %v1731_v25, 0.0  ;;  %s4995_s6 = smov (%p1341_p8), 0  }
 0x1db   : > { %v1756_v38 = vmax.f32 %v1732_v60, 0.0  ;;  %v1757_v12 = vmax.f32 %v1733_v41, 0.0  ;;  %1758 = vst [vmem:[#allocation6] sm:$0xff] %v1751_v26  ;;  %v1790_v51 = vmax.f32 %v1744_v61, 0.0  ;;  %v1791_v9 = vmax.f32 %v1745_v32, 0.0 }
 0x1dc   : > { %1759 = vst [vmem:[#allocation6 + $0x8] sm:$0xff] %v1752_v37  ;;  %1760 = vst [vmem:[#allocation6 + $0x10] sm:$0xff] %v1753_v1  ;;  %v1792_v50 = vmax.f32 %v1746_v55, 0.0  ;;  %v1793_v27 = vmax.f32 %v1747_v63, 0.0  ;;  %v1794_v4 = vmax.f32 %v1748_v22, 0.0  ;;  %v1795_v49 = vmax.f32 %v1749_v53, 0.0 }
 0x1dd   : > { %1761 = vst [vmem:[#allocation6 + $0x18] sm:$0xff] %v1754_v18  ;;  %1762 = vst [vmem:[#allocation6 + $0x20] sm:$0xff] %v1755_v23  ;;  %v1796_v31 = vmax.f32 %v1750_v30, 0.0 }
 0x1de   : > { %1763 = vst [vmem:[#allocation6 + $0x28] sm:$0xff] %v1756_v38  ;;  %1764 = vst [vmem:[#allocation6 + $0x30] sm:$0x1] %v1757_v12 }
 0x1e3   : > { %v1765_v47 = vld [vmem:[#allocation6] ss:$2 sm:$0x1f]  ;;  %v1767_v24 = vld [vmem:[#allocation6 + $0x1] ss:$2 sm:$0x1f] }
 0x1e4   : > { %1797 = vst [vmem:[#allocation6] sm:$0xff] %v1790_v51  ;;  %v1769_v5 = vld [vmem:[#allocation6 + $0xd] ss:$2 sm:$0x1f]  ;;  %v1772_v45 = vmax.f32 %v1765_v47, %v1767_v24 }
 0x1e5   : > { %v1771_v8 = vld [vmem:[#allocation6 + $0xe] ss:$2 sm:$0x1f]  ;;  %v1779_v56 = vld [vmem:[#allocation6 + $0x1a] ss:$2 sm:$0x1f] }
 0x1e6   : > { %1798 = vst [vmem:[#allocation6 + $0x8] sm:$0xff] %v1791_v9  ;;  %1799 = vst [vmem:[#allocation6 + $0x10] sm:$0xff] %v1792_v50  ;;  %v1781_v16 = vld [vmem:[#allocation6 + $0x1b] ss:$2 sm:$0x1f]  ;;  %v1773_v2 = vmax.f32 %v1769_v5, %v1771_v8 }
 0x1e7   : > { %1800 = vst [vmem:[#allocation6 + $0x18] sm:$0xff] %v1793_v27  ;;  %v1783_v62 = vld [vmem:[#allocation6 + $0x27] ss:$2 sm:$0x1f]  ;;  %v1786_v21 = vmax.f32 %v1779_v56, %v1781_v16 }
 0x1e8   : > { %v1785_v17 = vld [vmem:[#allocation6 + $0x28] ss:$2 sm:$0x1f]  ;;  %1801 = vst [vmem:[#allocation6 + $0x20] sm:$0xff] %v1794_v4  ;;  %v1774_v39 = vmax.f32 %v1772_v45, %v1773_v2 }
 0x1e9   : > { %1802 = vst [vmem:[#allocation6 + $0x28] sm:$0xff] %v1795_v49  ;;  %1803 = vst [vmem:[#allocation6 + $0x30] sm:$0x1] %v1796_v31  ;;  %v1787_v6 = vmax.f32 %v1783_v62, %v1785_v17 }
 0x1ea   : > { %1777 = vst [vmem:[%s1776_s9 + $0xf] sm:$0x1f] %v1774_v39 }
 0x1eb   : > { %v1788_v7 = vmax.f32 %v1786_v21, %v1787_v6 }
 0x1ed   : > { %1789 = vst [vmem:[%s1776_s9 + $0x14] sm:$0x1f] %v1788_v7  ;;  %v1804_v35 = vld [vmem:[#allocation6] ss:$2 sm:$0x1f] }
 0x1ee   : > { %v1805_v48 = vld [vmem:[#allocation6 + $0x1] ss:$2 sm:$0x1f]  ;;  %v1806_v10 = vld [vmem:[#allocation6 + $0xd] ss:$2 sm:$0x1f] }
 0x1ef   : > { %v1807_v40 = vld [vmem:[#allocation6 + $0xe] ss:$2 sm:$0x1f]  ;;  %v1808_v43 = vmax.f32 %v1804_v35, %v1805_v48  ;;  %v1814_v57 = vld [vmem:[#allocation6 + $0x1a] ss:$2 sm:$0x1f] }
 0x1f0   : > { %v1809_v36 = vmax.f32 %v1806_v10, %v1807_v40  ;;  %v1815_v13 = vld [vmem:[#allocation6 + $0x1b] ss:$2 sm:$0x1f]  ;;  %v1816_v14 = vld [vmem:[#allocation6 + $0x27] ss:$2 sm:$0x1f] }
 0x1f1   : > { %v1817_v58 = vld [vmem:[#allocation6 + $0x28] ss:$2 sm:$0x1f]  ;;  %v1818_v54 = vmax.f32 %v1814_v57, %v1815_v13  ;;  %1343 = sbr.rel (!%p1341_p8) target bundleno = 380 (0x17c), region = 281 }
 0x1f2   : > { %v1810_v0 = vmax.f32 %v1808_v43, %v1809_v36  ;;  %v1819_v11 = vmax.f32 %v1816_v14, %v1817_v58 }
 0x1f4   : > { %2692 = vst [vmem:[%s1776_s9 + $0x2f] sm:$0x1f] %v1810_v0  ;;  %v1820_v33 = vmax.f32 %v1818_v54, %v1819_v11 }
 0x1f6   : > { %2693 = vst [vmem:[%s1776_s9 + $0x34] sm:$0x1f] %v1820_v33 }
 0x1f8 LB: > { %s5001_s5 = smul.u32 3, %s3562_s6  ;;  %s5012_s0 = smov 0   ;;  %s3562_s6 = sphi %s4995_s6, %s1827_s6  }
 0x1fa   : > { %s1829_s11 = sld [smem:[#allocation15 + %s5001_s5]]  ;;  %s1831_s2 = sadd.s32 1, %s5001_s5 }
 0x1fb   : > { %s1832_s15 = sld [smem:[#allocation15 + %s1831_s2]]  ;;  %s1834_s17 = sadd.s32 2, %s5001_s5 }
 0x1fc   : > { %s1835_s18 = sld [smem:[#allocation15 + %s1834_s17]] }
 0x200   : > { %v1830_v28 = vstv %s1829_s11  }
 0x201   : > { %v1833_v52 = vstv %s1832_s15  }
 0x202   : > { %v1836_v44 = vstv %s1835_s18  }
 0x203 LB: >> { %s2694_s19 = sshll.u32 %s3578_s0, 5  ;;  %s5022_s21 = smul.u32 27, %s3578_s0  ;;  %s3578_s0 = sphi %s5012_s0, %s1842_s0   ;;  %v3574_v28 = vphi %v1830_v28, %v5246_v28   ;;  %v3570_v52 = vphi %v1833_v52, %v5245_v52   ;;  %v3566_v44 = vphi %v1836_v44, %v5244_v44  }
 0x204   : >> { %s5028_s28 = scalar_lea.vmem [#allocation4], %s2694_s19  ;;  %s1842_s0 = sadd.s32 1, %s3578_s0  }
 0x205   : >> { %s1850_s22 = sadd.s32 %s5022_s21, %s5001_s5  ;;  %s1866_s1 = sadd.s32 486, %s5022_s21  ;;  %v1848_v46 = vld [vmem:[%s5028_s28] sm:$0x7f]  ;;  %v1933_v39 = vld [vmem:[%s5028_s28 + $0x7] sm:$0x7f] }
 0x206   : >> { %s1851_s23 = sld [smem:[#allocation14 + %s1850_s22]]  ;;  %s1855_s12 = sadd.s32 1, %s1850_s22  ;;  %v1865_v41 = vld [vmem:[%s5028_s28 + $0x1] sm:$0x7f]  ;;  %v1950_v58 = vld [vmem:[%s5028_s28 + $0xa] sm:$0x7f] }
 0x207   : >> { %s1856_s24 = sld [smem:[#allocation14 + %s1855_s12]]  ;;  %s1860_s25 = sadd.s32 2, %s1850_s22  ;;  %v1882_v22 = vld [vmem:[%s5028_s28 + $0x2] sm:$0x7f] }
 0x208   : >> { %s1861_s14 = sld [smem:[#allocation14 + %s1860_s25]]  ;;  %s1867_s26 = sadd.s32 %s1866_s1, %s5001_s5  ;;  %v1899_v38 = vld [vmem:[%s5028_s28 + $0x5] sm:$0x7f] }
 0x209   : >> { %s1868_s4 = sld [smem:[#allocation14 + %s1867_s26]]  ;;  %s1872_s27 = sadd.s32 1, %s1867_s26  ;;  %v1916_v8 = vld [vmem:[%s5028_s28 + $0x6] sm:$0x7f] }
 0x20a   : >> { %s1873_s29 = sld [smem:[#allocation14 + %s1872_s27]]  ;;  %s1877_s16 = sadd.s32 2, %s1867_s26 }
 0x20b   : >> { %s5031_s30 = sld [smem:[#allocation14 + %s1877_s16]]  ;;  %s1883_s20 = sadd.s32 972, %s5022_s21 }
 0x20c   : >> { %v1852_v15 = vstv %s1851_s23  ;;  %s1884_s10 = sadd.s32 %s1883_s20, %s5001_s5  ;;  %s1900_s3 = sadd.s32 1458, %s5022_s21 }
 0x20d   : >> { %v1853_v25 = vmul.f32 %v1852_v15, %v1848_v46  ;;  %v1857_v60 = vstv %s1856_s24  ;;  %s5037_s13 = sld [smem:[#allocation14 + %s1884_s10]]  ;;  %s1889_s9 = sadd.s32 1, %s1884_s10 }
 0x20e   : >> { %v1858_v59 = vmul.f32 %v1857_v60, %v1848_v46  ;;  %v1862_v42 = vstv %s1861_s14  ;;  %s5039_s11 = sld [smem:[#allocation14 + %s1889_s9]]  ;;  %s1894_s2 = sadd.s32 2, %s1884_s10 }
 0x20f   : >> { %v1854_v3 = vadd.f32 %v3574_v28, %v1853_v25  ;;  %v1863_v34 = vmul.f32 %v1862_v42, %v1848_v46  ;;  %v1869_v29 = vstv %s1868_s4  ;;  %s5041_s15 = sld [smem:[#allocation14 + %s1894_s2]]  ;;  %s1901_s17 = sadd.s32 %s1900_s3, %s5001_s5  ;;  %v1967_v46 = vld [vmem:[%s5028_s28 + $0xb] sm:$0x7f] }
 0x210   : >> { %v1859_v19 = vadd.f32 %v3570_v52, %v1858_v59  ;;  %v1870_v20 = vmul.f32 %v1869_v29, %v1865_v41  ;;  %v1874_v61 = vstv %s1873_s29  ;;  %s5044_s18 = sld [smem:[#allocation14 + %s1901_s17]]  ;;  %s1906_s19 = sadd.s32 1, %s1901_s17 }
 0x211   : >> { %v1864_v32 = vadd.f32 %v3566_v44, %v1863_v34  ;;  %v1875_v55 = vmul.f32 %v1874_v61, %v1865_v41  ;;  %v1879_v63 = vstv %s5031_s30  ;;  %s5048_s22 = sld [smem:[#allocation14 + %s1906_s19]]  ;;  %s1911_s1 = sadd.s32 2, %s1901_s17  ;;  %v1984_v61 = vld [vmem:[%s5028_s28 + $0xc] sm:$0x7f] }
 0x212   : >> { %v1871_v53 = vadd.f32 %v1870_v20, %v1854_v3  ;;  %v1880_v30 = vmul.f32 %v1879_v63, %v1865_v41  ;;  %s5050_s23 = sld [smem:[#allocation14 + %s1911_s1]]  ;;  %s1917_s12 = sadd.s32 1944, %s5022_s21 }
 0x213   : >> { %v1876_v26 = vadd.f32 %v1875_v55, %v1859_v19  ;;  %v1886_v37 = vstv %s5037_s13  ;;  %s1918_s24 = sadd.s32 %s1917_s12, %s5001_s5  ;;  %s1934_s25 = sadd.s32 2430, %s5022_s21 }
 0x214   : >> { %v1881_v1 = vadd.f32 %v1880_v30, %v1864_v32  ;;  %v1887_v18 = vmul.f32 %v1886_v37, %v1882_v22  ;;  %v1891_v23 = vstv %s5039_s11  ;;  %s5058_s14 = sld [smem:[#allocation14 + %s1918_s24]]  ;;  %s1923_s26 = sadd.s32 1, %s1918_s24 }
 0x215   : >> { %v1892_v12 = vmul.f32 %v1891_v23, %v1882_v22  ;;  %v1896_v51 = vstv %s5041_s15  ;;  %s5061_s4 = sld [smem:[#allocation14 + %s1923_s26]]  ;;  %s1928_s27 = sadd.s32 2, %s1918_s24 }
 0x216   : >> { %v1888_v9 = vadd.f32 %v1887_v18, %v1871_v53  ;;  %v1897_v50 = vmul.f32 %v1896_v51, %v1882_v22  ;;  %v1903_v27 = vstv %s5044_s18  ;;  %s5064_s29 = sld [smem:[#allocation14 + %s1928_s27]]  ;;  %s1935_s16 = sadd.s32 %s1934_s25, %s5001_s5 }
 0x217   : >> { %v1893_v4 = vadd.f32 %v1892_v12, %v1876_v26  ;;  %v1904_v49 = vmul.f32 %v1903_v27, %v1899_v38  ;;  %v1908_v31 = vstv %s5048_s22  ;;  %s5068_s30 = sld [smem:[#allocation14 + %s1935_s16]]  ;;  %s1940_s20 = sadd.s32 1, %s1935_s16 }
 0x218   : >> { %v1898_v47 = vadd.f32 %v1897_v50, %v1881_v1  ;;  %v1909_v24 = vmul.f32 %v1908_v31, %v1899_v38  ;;  %v1913_v5 = vstv %s5050_s23  ;;  %s5072_s10 = sld [smem:[#allocation14 + %s1940_s20]]  ;;  %s1945_s3 = sadd.s32 2, %s1935_s16 }
 0x219   : >> { %v1905_v45 = vadd.f32 %v1904_v49, %v1888_v9  ;;  %v1914_v56 = vmul.f32 %v1913_v5, %v1899_v38  ;;  %s5074_s13 = sld [smem:[#allocation14 + %s1945_s3]]  ;;  %s1951_s9 = sadd.s32 2916, %s5022_s21 }
 0x21a   : >> { %v1910_v16 = vadd.f32 %v1909_v24, %v1893_v4  ;;  %v1920_v2 = vstv %s5058_s14  ;;  %s1952_s11 = sadd.s32 %s1951_s9, %s5001_s5  ;;  %s1968_s2 = sadd.s32 3402, %s5022_s21 }
 0x21b   : >> { %v1915_v62 = vadd.f32 %v1914_v56, %v1898_v47  ;;  %v1921_v17 = vmul.f32 %v1920_v2, %v1916_v8  ;;  %v1925_v21 = vstv %s5061_s4  ;;  %s5082_s15 = sld [smem:[#allocation14 + %s1952_s11]]  ;;  %s1957_s17 = sadd.s32 1, %s1952_s11 }
 0x21c   : >> { %v1926_v6 = vmul.f32 %v1925_v21, %v1916_v8  ;;  %v1930_v7 = vstv %s5064_s29  ;;  %s5085_s18 = sld [smem:[#allocation14 + %s1957_s17]]  ;;  %s1962_s19 = sadd.s32 2, %s1952_s11 }
 0x21d   : >> { %v1922_v35 = vadd.f32 %v1921_v17, %v1905_v45  ;;  %v1931_v48 = vmul.f32 %v1930_v7, %v1916_v8  ;;  %v1937_v10 = vstv %s5068_s30  ;;  %s5088_s22 = sld [smem:[#allocation14 + %s1962_s19]]  ;;  %s1969_s1 = sadd.s32 %s1968_s2, %s5001_s5 }
 0x21e   : >> { %v1927_v40 = vadd.f32 %v1926_v6, %v1910_v16  ;;  %v1938_v43 = vmul.f32 %v1937_v10, %v1933_v39  ;;  %v1942_v36 = vstv %s5072_s10  ;;  %s1970_s23 = sld [smem:[#allocation14 + %s1969_s1]]  ;;  %s1974_s12 = sadd.s32 1, %s1969_s1 }
 0x21f   : >> { %v1932_v57 = vadd.f32 %v1931_v48, %v1915_v62  ;;  %v1943_v13 = vmul.f32 %v1942_v36, %v1933_v39  ;;  %v1947_v14 = vstv %s5074_s13  ;;  %s1975_s24 = sld [smem:[#allocation14 + %s1974_s12]]  ;;  %s1979_s25 = sadd.s32 2, %s1969_s1 }
 0x220   : >> { %v1939_v54 = vadd.f32 %v1938_v43, %v1922_v35  ;;  %v1948_v0 = vmul.f32 %v1947_v14, %v1933_v39  ;;  %s1980_s14 = sld [smem:[#allocation14 + %s1979_s25]]  ;;  %s1985_s26 = sadd.s32 3888, %s5022_s21 }
 0x221   : >> { %v1944_v11 = vadd.f32 %v1943_v13, %v1927_v40  ;;  %v1954_v33 = vstv %s5082_s15  ;;  %s1986_s4 = sadd.s32 %s1985_s26, %s5001_s5  ;;  %p1839_p9 = scmp.ge.s32.totalorder %s1842_s0, 18  }
 0x222   : >> { %v1949_v28 = vadd.f32 %v1948_v0, %v1932_v57  ;;  %v1955_v52 = vmul.f32 %v1954_v33, %v1950_v58  ;;  %v1959_v44 = vstv %s5085_s18  ;;  %s1987_s27 = sld [smem:[#allocation14 + %s1986_s4]]  ;;  %s1991_s29 = sadd.s32 1, %s1986_s4 }
 0x223   : >> { %v1960_v15 = vmul.f32 %v1959_v44, %v1950_v58  ;;  %v1964_v25 = vstv %s5088_s22  ;;  %s1992_s16 = sld [smem:[#allocation14 + %s1991_s29]]  ;;  %s1996_s30 = sadd.s32 2, %s1986_s4 }
 0x224   : >> { %v1956_v60 = vadd.f32 %v1955_v52, %v1939_v54  ;;  %v1965_v41 = vmul.f32 %v1964_v25, %v1950_v58  ;;  %v1971_v59 = vstv %s1970_s23  ;;  %s1997_s20 = sld [smem:[#allocation14 + %s1996_s30]]  ;;  %s2010_s21 = scalar_lea.vmem (%p1839_p9), [#allocation5], %s5001_s5 }
 0x225   : >> { %v1961_v42 = vadd.f32 %v1960_v15, %v1944_v11  ;;  %v1972_v3 = vmul.f32 %v1971_v59, %v1967_v46  ;;  %v1976_v34 = vstv %s1975_s24  ;;  %s1827_s6 = sadd.s32 (%p1839_p9), 1, %s3562_s6  }
 0x226   : >> { %v1966_v29 = vadd.f32 %v1965_v41, %v1949_v28  ;;  %v1977_v19 = vmul.f32 %v1976_v34, %v1967_v46  ;;  %v1981_v20 = vstv %s1980_s14  ;;  %p1824_p10 = scmp.ge.s32.totalorder (%p1839_p9), %s1827_s6, 9  }
 0x227   : >> { %v1973_v32 = vadd.f32 %v1972_v3, %v1956_v60  ;;  %v1982_v55 = vmul.f32 %v1981_v20, %v1967_v46 }
 0x228   : >> { %v1978_v63 = vadd.f32 %v1977_v19, %v1961_v42  ;;  %v1988_v22 = vstv %s1987_s27 }
 0x229   : >> { %v1983_v53 = vadd.f32 %v1982_v55, %v1966_v29  ;;  %v1989_v30 = vmul.f32 %v1988_v22, %v1984_v61  ;;  %v1993_v26 = vstv %s1992_s16  ;;  %1841 = sbr.rel (!%p1839_p9) target bundleno = 515 (0x203), region = 292 }
 0x22a   : >> { %v1994_v37 = vmul.f32 %v1993_v26, %v1984_v61  ;;  %v1998_v1 = vstv %s1997_s20 }
 0x22b   : >> { %v1990_v18 = vadd.f32 %v1989_v30, %v1973_v32   ;;  %v1999_v23 = vmul.f32 %v1998_v1, %v1984_v61 }
 0x22c   : >> { %v1995_v38 = vadd.f32 %v1994_v37, %v1978_v63  }
 0x22d   : >> { %v2000_v12 = vadd.f32 %v1999_v23, %v1983_v53   ;;  %v5246_v28 = vmov %v1990_v18  ;;  %v2001_v51 = vmax.f32 (%p1839_p9), %v1990_v18, 0.0 }
 0x22e   : >> { %v5245_v52 = vmov %v1995_v38  ;;  %v2012_v9 = vmax.f32 (%p1839_p9), %v1995_v38, 0.0 }
 0x22f   : >> { %v5244_v44 = vmov %v2000_v12  ;;  %2002 = vst [vmem:[#allocation6] sm:$0x7f] (%p1839_p9), %v2001_v51  ;;  %v2023_v5 = vmax.f32 (%p1839_p9), %v2000_v12, 0.0 }
 0x230   :  { %vm2171_vm0 = vcmask (%p1824_p10), 1040384   ;;  %vm2173_vm1 = vcmask (%p1824_p10), 1041408   ;;  %vm2175_vm2 = vcmask (%p1824_p10), 1042432   ;;  %vm2177_vm3 = vcmask (%p1824_p10), 1043456   ;;  %v2256_v23 = vld [vmem:[%s5160_s7] sm:$0xff] (%p1824_p10) }
 0x231   :  { %vm2179_vm4 = vcmask (%p1824_p10), 1044480   ;;  %vm2181_vm5 = vcmask (%p1824_p10), 1045504   ;;  %vm2183_vm6 = vcmask (%p1824_p10), 1046528   ;;  %vm2258_vm7 = vcmask (%p1824_p10), 228352  }
 0x232   :  { %2744 = vmatprep.mubr.msk.f32.mxu0 (%p1824_p10), %vm2258_vm7, %v2256_v23  ;;  %vm3586_vm8 = vmmov (%p1824_p10), 1  }
 0x233   :  { %vm2752_vm9 = vmpackc.low (%p1824_p10), %vm2177_vm3, %vm3586_vm8 }
 0x236   : > { %v2003_v50 = vld [vmem:[#allocation6] sm:$0x1]  ;;  %v2004_v27 = vld [vmem:[#allocation6 + $0x1] sm:$0x1]  ;;  %v2005_v4 = vld [vmem:[#allocation6 + $0x5] sm:$0x1] }
 0x237   : > { %v2006_v49 = vld [vmem:[#allocation6 + $0x6] sm:$0x1]  ;;  %v2007_v31 = vmax.f32 %v2003_v50, %v2004_v27 }
 0x238   : > { %2013 = vst [vmem:[#allocation6] sm:$0x7f] %v2012_v9  ;;  %v2008_v47 = vmax.f32 %v2005_v4, %v2006_v49 }
 0x23a   : > { %v2009_v24 = vmax.f32 %v2007_v31, %v2008_v47 }
 0x23c   : > { %2011 = vst [vmem:[%s2010_s21] sm:$0x1] %v2009_v24 }
 0x23f   : > { %v2014_v8 = vld [vmem:[#allocation6] sm:$0x1]  ;;  %v2015_v45 = vld [vmem:[#allocation6 + $0x1] sm:$0x1]  ;;  %v2016_v56 = vld [vmem:[#allocation6 + $0x5] sm:$0x1] }
 0x240   : > { %v2017_v16 = vld [vmem:[#allocation6 + $0x6] sm:$0x1]  ;;  %v2018_v2 = vmax.f32 %v2014_v8, %v2015_v45 }
 0x241   : > { %2024 = vst [vmem:[#allocation6] sm:$0x7f] %v2023_v5  ;;  %v2019_v62 = vmax.f32 %v2016_v56, %v2017_v16 }
 0x243   : > { %v2020_v17 = vmax.f32 %v2018_v2, %v2019_v62  ;;  %v2257_v2 = vld [vmem:[%s5160_s7 + $0x8] sm:$0x3] (%p1824_p10) }
 0x245   : > { %2695 = vst [vmem:[%s2010_s21 + $0x1] sm:$0x1] %v2020_v17 }
 0x248   : > { %v2025_v21 = vld [vmem:[#allocation6] sm:$0x1]  ;;  %v2026_v39 = vld [vmem:[#allocation6 + $0x1] sm:$0x1]  ;;  %v2027_v6 = vld [vmem:[#allocation6 + $0x5] sm:$0x1] }
 0x249   : > { %v2028_v7 = vld [vmem:[#allocation6 + $0x6] sm:$0x1]  ;;  %v2029_v35 = vmax.f32 %v2025_v21, %v2026_v39  ;;  %1826 = sbr.rel (!%p1824_p10) target bundleno = 504 (0x1f8), region = 303 }
 0x24a   : > { %v2030_v48 = vmax.f32 %v2027_v6, %v2028_v7 }
 0x24c   : > { %v2031_v10 = vmax.f32 %v2029_v35, %v2030_v48 }
 0x24e   : > { %2696 = vst [vmem:[%s2010_s21 + $0x2] sm:$0x1] %v2031_v10 }
 0x255   :  { %v2034_v40 = vld [vmem:[#allocation5] sm:$0x1]  ;;  %v2697_v43 = vld [vmem:[#allocation5 + $0x1] ss:$0 sm:$0xff]  ;;  %v2698_v36 = vld [vmem:[#allocation5 + $0x2] ss:$0 sm:$0xff] }
 0x256   :  { %v2050_v57 = vld [vmem:[#allocation5 + $0x8] sm:$0x1]  ;;  %v2699_v13 = vld [vmem:[#allocation5 + $0x3] ss:$0 sm:$0xff]  ;;  %v2704_v14 = vld [vmem:[#allocation5 + $0x9] ss:$0 sm:$0xff]  ;;  %v2172_v25 = vsel %vm2171_vm0, %v2034_v40, %v2697_v43 }
 0x257   :  { %v2705_v58 = vld [vmem:[#allocation5 + $0xa] ss:$0 sm:$0xff]  ;;  %v2066_v54 = vld [vmem:[#allocation5 + $0x10] sm:$0x1]  ;;  %v2700_v0 = vld [vmem:[#allocation5 + $0x4] ss:$0 sm:$0xff]  ;;  %v2174_v42 = vsel %vm2173_vm1, %v2172_v25, %v2698_v36  ;;  %v2185_v3 = vsel %vm2171_vm0, %v2050_v57, %v2704_v14 }
 0x258   :  { %v2706_v11 = vld [vmem:[#allocation5 + $0xb] ss:$0 sm:$0xff]  ;;  %v2711_v33 = vld [vmem:[#allocation5 + $0x11] ss:$0 sm:$0xff]  ;;  %v2712_v28 = vld [vmem:[#allocation5 + $0x12] ss:$0 sm:$0xff]  ;;  %v2176_v55 = vsel %vm2175_vm2, %v2174_v42, %v2699_v13  ;;  %v2186_v63 = vsel %vm2173_vm1, %v2185_v3, %v2705_v58 }
 0x259   :  { %v2713_v52 = vld [vmem:[#allocation5 + $0x13] ss:$0 sm:$0xff]  ;;  %v2701_v44 = vld [vmem:[#allocation5 + $0x5] ss:$0 sm:$0xff]  ;;  %v2082_v46 = vld [vmem:[#allocation5 + $0x18] sm:$0x1]  ;;  %v2246_v34 = vsel %vm2171_vm0, %v2066_v54, %v2711_v33  ;;  %v2178_v37 = vsel %vm2177_vm3, %v2176_v55, %v2700_v0  ;;  %v2187_v1 = vsel %vm2175_vm2, %v2186_v63, %v2706_v11 }
 0x25a   :  { %v2702_v15 = vld [vmem:[#allocation5 + $0x6] ss:$0 sm:$0xff]  ;;  %v2718_v60 = vld [vmem:[#allocation5 + $0x19] ss:$0 sm:$0xff]  ;;  %v2707_v41 = vld [vmem:[#allocation5 + $0xc] ss:$0 sm:$0xff]  ;;  %v2247_v22 = vsel %vm2173_vm1, %v2246_v34, %v2712_v28  ;;  %v2180_v51 = vsel %vm2179_vm4, %v2178_v37, %v2701_v44 }
 0x25b   :  { %v2714_v59 = vld [vmem:[#allocation5 + $0x14] ss:$0 sm:$0xff]  ;;  %v2719_v29 = vld [vmem:[#allocation5 + $0x1a] ss:$0 sm:$0xff]  ;;  %v2253_v19 = vsel %vm2171_vm0, %v2082_v46, %v2718_v60  ;;  %v2703_v20 = vld [vmem:[#allocation5 + $0x7] ss:$0 sm:$0xff]  ;;  %v2248_v18 = vsel %vm2175_vm2, %v2247_v22, %v2713_v52  ;;  %v2188_v9 = vsel %vm2177_vm3, %v2187_v1, %v2707_v41  ;;  %v2182_v4 = vsel %vm2181_vm5, %v2180_v51, %v2702_v15 }
 0x25c   :  { %v2708_v61 = vld [vmem:[#allocation5 + $0xd] ss:$0 sm:$0xff]  ;;  %v2715_v32 = vld [vmem:[#allocation5 + $0x15] ss:$0 sm:$0xff]  ;;  %v2254_v53 = vsel %vm2173_vm1, %v2253_v19, %v2719_v29  ;;  %v2709_v30 = vld [vmem:[#allocation5 + $0xe] ss:$0 sm:$0xff]  ;;  %v2249_v50 = vsel %vm2177_vm3, %v2248_v18, %v2714_v59  ;;  %v2184_v47 = vsel %vm2183_vm6, %v2182_v4, %v2703_v20 }
 0x25d   :  { %v2716_v26 = vld [vmem:[#allocation5 + $0x16] ss:$0 sm:$0xff]  ;;  %v2710_v38 = vld [vmem:[#allocation5 + $0xf] ss:$0 sm:$0xff]  ;;  %v2717_v12 = vld [vmem:[#allocation5 + $0x17] ss:$0 sm:$0xff]  ;;  %v2189_v49 = vsel %vm2179_vm4, %v2188_v9, %v2708_v61  ;;  %v2250_v31 = vsel %vm2179_vm4, %v2249_v50, %v2715_v32 }
 0x25e   :  { %v2255_v27 = vsel %vm2175_vm2, %v2254_v53, 1.0  ;;  %v2190_v24 = vsel %vm2181_vm5, %v2189_v49, %v2709_v30  ;;  %v2251_v5 = vsel %vm2181_vm5, %v2250_v31, %v2716_v26 }
 0x25f   :  { %v2191_v8 = vsel %vm2183_vm6, %v2190_v24, %v2710_v38  ;;  %v2252_v45 = vsel %vm2183_vm6, %v2251_v5, %v2717_v12 }
 0x260   :  { %v2747_v56 = vpack.c.bf16 %v2191_v8, %v2184_v47  ;;  %v2751_v16 = vpack.c.bf16 %v2255_v27, %v2252_v45 }
 0x262   :  { %2748 = vmatprep.subr.bf16.mxu0 %v2747_v56 }
 0x263   :  { %2750 = vmatpush3.bf16.msra.mxu0 %v2747_v56 }
 0x264   :  { %2753 = vmatprep.subr.msk.bf16.mxu0 %vm2752_vm9, %v2751_v16 }
 0x267   :  { %2756 = vmatpush3.bf16.msk.msra.mxu0 %vm2752_vm9, %v2751_v16 }
 0x26a   :  { %2745 = vmatmul.mubr.msk.f32.vlgmr.msra.gmra.mrb[0].mxu0 %vm2258_vm7, %v2257_v2 }
 0x33d   :  { %v2746_v62 = vpop.f32.mrb[0].mxu0 }
 0x33e   :  { %2344 = vst [vmem:[%s5161_s8 + $0x8] sm:$0x3] %v2746_v62  ;;  %v2334_v17 = vpop.f32.mrb[1].mxu0 }
 0x33f   :  { %2343 = vst [vmem:[%s5161_s8] sm:$0xff] %v2334_v17 }
 0x340   :  { %2349 = vsyncpa [#allocation8], 1 }
 0x341   :  { %2350 = vsyncpa [#allocation10], 1 }
 0x342   :  { %2351 = vsyncpa [#allocation13], 1 }
 0x343   :  { %2352 = vsyncpa [#allocation16], 1 }

</bundles_post_ra>
